<compile_context>
chip_gen: v7x
topology: tpu7x:2x2x1
jax: 0.10.0
libtpu: 0.0.40
codegen_flags: <defaults>
</compile_context>

<pallas_src>
from functools import partial

import jax
import jax.numpy as jnp
from jax.experimental import pallas as pl
from jax.experimental.pallas import tpu as pltpu


STRUCT = [7, 3, 3, 3, 1, 1]        # conv kernel sizes
STRIDES = [1, 1, 1, 2, 1, 1]       # stride 2 on the third 3x3 conv


def _fused_kernel(x_ref, w1_ref, w2_ref, w3_ref, wt_ref, o_ref, scr_ref, *,
                  W, HW, widths, ipg, H4, row_w, n_pad):
    """One grid step = `ipg` single-channel (H,W) images, flattened as c*HW + y*W + x
    and lane-packed.  widths = (M0..M4): flat frame widths kept per layer ("shrinking
    full-frame": every layer runs with stride-1 geometry; only valid columns are used).
    """
    M0, M1, M2, M3, M4 = widths
    taps7 = [kh * W + kw for kh in range(7) for kw in range(7)]
    taps3 = [kh * W + kw for kh in range(3) for kw in range(3)]

    # ---- layer 1: 7x7, 1 -> F.  K=49 im2col; shifted rows are unaligned loads of the
    # ---- bf16 input block.  One MXU dot, f32 accumulation. ----
    patch = jnp.concatenate([x_ref[:, d:d + M1] for d in taps7], axis=0)    # (49, M1)
    act = jnp.dot(w1_ref[...], patch, preferred_element_type=jnp.float32)   # (F, M1) f32

    # ---- layers 2,3: 3x3, F -> F.  One K=9F dot each; the previous activation is
    # ---- staged (bf16) in VMEM scratch and the 9 taps are shifted ref loads. ----
    for w_ref, m_in, m_out in ((w2_ref, M1, M2), (w3_ref, M2, M3)):
        scr_ref[:, :m_in] = act.astype(jnp.bfloat16)
        chunk = jnp.concatenate([scr_ref[:, d:d + m_out] for d in taps3], axis=0)
        act = jnp.dot(w_ref[...], chunk, preferred_element_type=jnp.float32)

    # ---- layer 4 (3x3, stride 2) with the linear 1x1 tail (F->F, F->1) folded into
    # ---- its weights: a single (1, 9F) x (9F, M4) dot gives the final 1-ch map. ----
    scr_ref[:, :M3] = act.astype(jnp.bfloat16)
    chunk = jnp.concatenate([scr_ref[:, d:d + M4] for d in taps3], axis=0)
    final = jnp.dot(wt_ref[...], chunk, preferred_element_type=jnp.float32)  # (1, M4)

    # ---- in-kernel stride-2 row subsample: keep only even rows of the valid window
    # ---- (contiguous slices), trimmed to the 2*W4-1 lanes covering the even cols. ----
    segs = [final[:, j * HW + 2 * yo * W: j * HW + 2 * yo * W + row_w]
            for j in range(ipg) for yo in range(H4)]
    out = segs[0] if len(segs) == 1 else jnp.concatenate(segs, axis=1)
    if n_pad:                                        # keep the HBM store lane-dense
        out = jnp.concatenate([out, jnp.zeros((1, n_pad), jnp.float32)], axis=1)
    o_ref[...] = out


def _pack_params(params_oihw, dtype=jnp.bfloat16):
    """torch-layout OIHW weights -> MXU matmul layouts (bf16), with the linear 1x1
    tail (layers 5 and 6) folded into the layer-4 3x3 weights (valid: net is linear)."""
    w1, w2, w3, w4, w5, w6 = params_oihw
    F = w1.shape[0]

    def pack(w):                                     # (O,I,KH,KW) -> (O, KH*KW*I)
        o, i, kh, kw = w.shape
        return jnp.transpose(w, (0, 2, 3, 1)).reshape(o, kh * kw * i)

    w56 = jnp.matmul(w6.reshape(1, F), w5.reshape(F, F))               # (1, F)
    w_tail = jnp.einsum('f,fchw->chw', w56[0], w4)[None]               # (1, F, 3, 3)
    return tuple(pack(w).astype(dtype) for w in (w1, w2, w3, w_tail))


def generator_dn_v2_forward(x_nchw, params_oihw, images_per_step=None):
    """Forward pass. x_nchw: (B, 3, H, W) float32 -> (B, 3, H', W') float32."""
    B, C, H, W = x_nchw.shape
    assert C == 3 and H >= 13 and W >= 13
    F = params_oihw[0].shape[0]
    HW = H * W

    # 3 lane-packed images per grid step for small frames (amortizes ~0.35us/step
    # pipeline overhead); 1 image per step for large frames (3x smaller VMEM working
    # set and 3x more parallel steps for v7x's two TensorCores).
    if images_per_step is None:
        images_per_step = 3 if HW <= 96 * 96 else 1
    ipg = images_per_step
    assert ipg in (1, 3)
    ngrid = (B * 3) // ipg

    # Shrinking full-frame widths (stride-1 geometry on the flat frame).
    M0 = ipg * HW
    M1 = M0 - (6 * W + 6)          # after 7x7
    M2 = M1 - (2 * W + 2)          # after first 3x3
    M3 = M2 - (2 * W + 2)          # after second 3x3
    M4 = M3 - (2 * W + 2)          # after third 3x3 (stride-1 view)
    H4 = (H - 13) // 2 + 1         # true stride-2 output extent
    W4 = (W - 13) // 2 + 1
    row_w = 2 * W4 - 1             # lanes kept per output row (covers the even cols)
    n_valid = ipg * H4 * row_w
    n_out = ((n_valid + 127) // 128) * 128          # lane-dense (unmasked) store width

    w1p, w2p, w3p, wtp = _pack_params(params_oihw)
    x_flat = x_nchw.reshape(ngrid, 1, M0).astype(jnp.bfloat16)

    # Explicit VMEM budget (portable to v7x's 64 MiB per-TensorCore VMEM) + soft guard.
    vmem_limit = 56 * 1024 * 1024
    est_vmem = (2 * M0 * 2 + 2 * n_out * 4 + F * M1 * 2        # in/out blocks + scratch
                + 2 * sum(int(w.size) for w in (w1p, w2p, w3p, wtp))
                + (49 + 9 * F) * M1 * 2 + 3 * F * M1 * 4)      # live patch / act values
    # TODO(synk): halo-tile the flat axis for frames whose working set exceeds VMEM.
    assert est_vmem < 0.75 * vmem_limit, (
        f"frame too large for the single-block design (~{est_vmem / 2**20:.1f} MiB/step)")

    kernel = partial(_fused_kernel, W=W, HW=HW,
                     widths=(M0, M1, M2, M3, M4), ipg=ipg, H4=H4,
                     row_w=row_w, n_pad=n_out - n_valid)

    def wspec(shape):
        return pl.BlockSpec(shape, lambda g: (0,) * len(shape))

    out_flat = pl.pallas_call(
        kernel,
        out_shape=jax.ShapeDtypeStruct((ngrid, 1, n_out), jnp.float32),
        grid=(ngrid,),
        in_specs=[
            pl.BlockSpec((None, 1, M0), lambda g: (g, 0, 0)),
            wspec(w1p.shape), wspec(w2p.shape), wspec(w3p.shape), wspec(wtp.shape),
        ],
        out_specs=pl.BlockSpec((None, 1, n_out), lambda g: (g, 0, 0)),
        scratch_shapes=[pltpu.VMEM((F, M1), jnp.bfloat16)],
        compiler_params=pltpu.CompilerParams(
            dimension_semantics=("parallel",),
            vmem_limit_bytes=vmem_limit),
    )(x_flat, w1p, w2p, w3p, wtp)

    # Tiny epilogue on the compacted output: drop lane padding, reshape to rows, and
    # take the even columns (the deferred half of the layer-4 stride-2 subsample).
    rows = out_flat[:, 0, :n_valid].reshape(B, 3, H4, row_w)
    return rows[:, :, :, ::2]


def init_params(key, features=16):
    """Deterministic synthetic weights in torch layout (Cout, Cin, KH, KW),
    1/sqrt(fan_in)-scaled so activations stay O(1) (keeps the bf16 check meaningful)."""
    shapes = [(features, 1, STRUCT[0], STRUCT[0])]
    for layer in range(1, len(STRUCT) - 1):
        shapes.append((features, features, STRUCT[layer], STRUCT[layer]))
    shapes.append((1, features, STRUCT[-1], STRUCT[-1]))
    params = []
    for shp in shapes:
        key, sub = jax.random.split(key)
        fan_in = shp[1] * shp[2] * shp[3]
        params.append(jax.random.normal(sub, shp, jnp.float32) / jnp.sqrt(fan_in))
    return params


def reference_forward(x_nchw, params_oihw):
    """Pure-JAX (XLA conv, f32) reference matching the PyTorch module."""
    B, _, H, W = x_nchw.shape
    x = x_nchw.reshape(B * 3, 1, H, W)
    for w, s in zip(params_oihw, STRIDES):
        x = jax.lax.conv_general_dilated(
            x, w, window_strides=(s, s), padding="VALID",
            dimension_numbers=("NCHW", "OIHW", "NCHW"))
    return x.reshape(B, 3, x.shape[2], x.shape[3])


if __name__ == "__main__":
    key = jax.random.PRNGKey(0)
    k_x, k_p = jax.random.split(key)

    B, H, W = 2, 16, 16
    features = 16

    x = jax.random.normal(k_x, (B, 3, H, W), dtype=jnp.float32)
    params = init_params(k_p, features=features)

    out = jax.block_until_ready(generator_dn_v2_forward(x, params))
    # Spatial trace: 16 -7-> 10 -3-> 8 -3-> 6 -3,s2-> 2 -1-> 2 -1-> 2
    assert out.shape == (B, 3, 2, 2), out.shape

    ref = reference_forward(x, params)
    max_err = float(jnp.max(jnp.abs(out - ref)))
    # bf16 MXU operands with f32 accumulation: expect ~1% error vs the f32 reference.
    assert jnp.allclose(out, ref, rtol=5e-2, atol=5e-2), max_err

    # Also exercise the per-image grid path (large-frame / v7x configuration).
    out1 = jax.block_until_ready(
        generator_dn_v2_forward(x, params, images_per_step=1))
    assert out1.shape == (B, 3, 2, 2), out1.shape
    assert jnp.allclose(out1, ref, rtol=5e-2, atol=5e-2), float(
        jnp.max(jnp.abs(out1 - ref)))

    print("KERNEL_OK")
</pallas_src>

<mosaic_0001>
module attributes {stable_mosaic.version = 11 : i64} {
  func.func @_fused_kernel(%arg0: i32, %arg1: memref<1x1x768xbf16, #tpu.memory_space<vmem>>, %arg2: memref<16x49xbf16, #tpu.memory_space<vmem>>, %arg3: memref<16x144xbf16, #tpu.memory_space<vmem>>, %arg4: memref<16x144xbf16, #tpu.memory_space<vmem>>, %arg5: memref<1x144xbf16, #tpu.memory_space<vmem>>, %arg6: memref<1x1x128xf32, #tpu.memory_space<vmem>>, %arg7: memref<16x666xbf16, #tpu.memory_space<vmem>>) attributes {dimension_semantics = [#tpu.dimension_semantics<parallel>], iteration_bounds = array<i64: 2>, scalar_prefetch = 0 : i64, scratch_operands = 1 : i64, tpu.core_type = #tpu.core_type<tc>, window_params = [{transform_indices = @transform_0, window_bounds = array<i64: 1, 1, 768>}, {pipeline_mode = #tpu.pipeline_mode<synchronous>, transform_indices = @transform_1, window_bounds = array<i64: 16, 49>}, {pipeline_mode = #tpu.pipeline_mode<synchronous>, transform_indices = @transform_2, window_bounds = array<i64: 16, 144>}, {pipeline_mode = #tpu.pipeline_mode<synchronous>, transform_indices = @transform_3, window_bounds = array<i64: 16, 144>}, {pipeline_mode = #tpu.pipeline_mode<synchronous>, transform_indices = @transform_4, window_bounds = array<i64: 1, 144>}, {transform_indices = @transform_5, window_bounds = array<i64: 1, 1, 128>}]} {
    %c0 = arith.constant 0 : index
    %c0_0 = arith.constant 0 : index
    %c0_1 = arith.constant 0 : index
    %0 = vector.load %arg1[%c0, %c0_0, %c0_1] : memref<1x1x768xbf16, #tpu.memory_space<vmem>>, vector<1x1x666xbf16>
    %1 = vector.shape_cast %0 : vector<1x1x666xbf16> to vector<1x666xbf16>
    %c0_2 = arith.constant 0 : index
    %c0_3 = arith.constant 0 : index
    %c1 = arith.constant 1 : index
    %2 = vector.load %arg1[%c0_2, %c0_3, %c1] : memref<1x1x768xbf16, #tpu.memory_space<vmem>>, vector<1x1x666xbf16>
    %3 = vector.shape_cast %2 : vector<1x1x666xbf16> to vector<1x666xbf16>
    %c0_4 = arith.constant 0 : index
    %c0_5 = arith.constant 0 : index
    %c2 = arith.constant 2 : index
    %4 = vector.load %arg1[%c0_4, %c0_5, %c2] : memref<1x1x768xbf16, #tpu.memory_space<vmem>>, vector<1x1x666xbf16>
    %5 = vector.shape_cast %4 : vector<1x1x666xbf16> to vector<1x666xbf16>
    %c0_6 = arith.constant 0 : index
    %c0_7 = arith.constant 0 : index
    %c3 = arith.constant 3 : index
    %6 = vector.load %arg1[%c0_6, %c0_7, %c3] : memref<1x1x768xbf16, #tpu.memory_space<vmem>>, vector<1x1x666xbf16>
    %7 = vector.shape_cast %6 : vector<1x1x666xbf16> to vector<1x666xbf16>
    %c0_8 = arith.constant 0 : index
    %c0_9 = arith.constant 0 : index
    %c4 = arith.constant 4 : index
    %8 = vector.load %arg1[%c0_8, %c0_9, %c4] : memref<1x1x768xbf16, #tpu.memory_space<vmem>>, vector<1x1x666xbf16>
    %9 = vector.shape_cast %8 : vector<1x1x666xbf16> to vector<1x666xbf16>
    %c0_10 = arith.constant 0 : index
    %c0_11 = arith.constant 0 : index
    %c5 = arith.constant 5 : index
    %10 = vector.load %arg1[%c0_10, %c0_11, %c5] : memref<1x1x768xbf16, #tpu.memory_space<vmem>>, vector<1x1x666xbf16>
    %11 = vector.shape_cast %10 : vector<1x1x666xbf16> to vector<1x666xbf16>
    %c0_12 = arith.constant 0 : index
    %c0_13 = arith.constant 0 : index
    %c6 = arith.constant 6 : index
    %12 = vector.load %arg1[%c0_12, %c0_13, %c6] : memref<1x1x768xbf16, #tpu.memory_space<vmem>>, vector<1x1x666xbf16>
    %13 = vector.shape_cast %12 : vector<1x1x666xbf16> to vector<1x666xbf16>
    %c0_14 = arith.constant 0 : index
    %c0_15 = arith.constant 0 : index
    %c16 = arith.constant 16 : index
    %14 = vector.load %arg1[%c0_14, %c0_15, %c16] : memref<1x1x768xbf16, #tpu.memory_space<vmem>>, vector<1x1x666xbf16>
    %15 = vector.shape_cast %14 : vector<1x1x666xbf16> to vector<1x666xbf16>
    %c0_16 = arith.constant 0 : index
    %c0_17 = arith.constant 0 : index
    %c17 = arith.constant 17 : index
    %16 = vector.load %arg1[%c0_16, %c0_17, %c17] : memref<1x1x768xbf16, #tpu.memory_space<vmem>>, vector<1x1x666xbf16>
    %17 = vector.shape_cast %16 : vector<1x1x666xbf16> to vector<1x666xbf16>
    %c0_18 = arith.constant 0 : index
    %c0_19 = arith.constant 0 : index
    %c18 = arith.constant 18 : index
    %18 = vector.load %arg1[%c0_18, %c0_19, %c18] : memref<1x1x768xbf16, #tpu.memory_space<vmem>>, vector<1x1x666xbf16>
    %19 = vector.shape_cast %18 : vector<1x1x666xbf16> to vector<1x666xbf16>
    %c0_20 = arith.constant 0 : index
    %c0_21 = arith.constant 0 : index
    %c19 = arith.constant 19 : index
    %20 = vector.load %arg1[%c0_20, %c0_21, %c19] : memref<1x1x768xbf16, #tpu.memory_space<vmem>>, vector<1x1x666xbf16>
    %21 = vector.shape_cast %20 : vector<1x1x666xbf16> to vector<1x666xbf16>
    %c0_22 = arith.constant 0 : index
    %c0_23 = arith.constant 0 : index
    %c20 = arith.constant 20 : index
    %22 = vector.load %arg1[%c0_22, %c0_23, %c20] : memref<1x1x768xbf16, #tpu.memory_space<vmem>>, vector<1x1x666xbf16>
    %23 = vector.shape_cast %22 : vector<1x1x666xbf16> to vector<1x666xbf16>
    %c0_24 = arith.constant 0 : index
    %c0_25 = arith.constant 0 : index
    %c21 = arith.constant 21 : index
    %24 = vector.load %arg1[%c0_24, %c0_25, %c21] : memref<1x1x768xbf16, #tpu.memory_space<vmem>>, vector<1x1x666xbf16>
    %25 = vector.shape_cast %24 : vector<1x1x666xbf16> to vector<1x666xbf16>
    %c0_26 = arith.constant 0 : index
    %c0_27 = arith.constant 0 : index
    %c22 = arith.constant 22 : index
    %26 = vector.load %arg1[%c0_26, %c0_27, %c22] : memref<1x1x768xbf16, #tpu.memory_space<vmem>>, vector<1x1x666xbf16>
    %27 = vector.shape_cast %26 : vector<1x1x666xbf16> to vector<1x666xbf16>
    %c0_28 = arith.constant 0 : index
    %c0_29 = arith.constant 0 : index
    %c32 = arith.constant 32 : index
    %28 = vector.load %arg1[%c0_28, %c0_29, %c32] : memref<1x1x768xbf16, #tpu.memory_space<vmem>>, vector<1x1x666xbf16>
    %29 = vector.shape_cast %28 : vector<1x1x666xbf16> to vector<1x666xbf16>
    %c0_30 = arith.constant 0 : index
    %c0_31 = arith.constant 0 : index
    %c33 = arith.constant 33 : index
    %30 = vector.load %arg1[%c0_30, %c0_31, %c33] : memref<1x1x768xbf16, #tpu.memory_space<vmem>>, vector<1x1x666xbf16>
    %31 = vector.shape_cast %30 : vector<1x1x666xbf16> to vector<1x666xbf16>
    %c0_32 = arith.constant 0 : index
    %c0_33 = arith.constant 0 : index
    %c34 = arith.constant 34 : index
    %32 = vector.load %arg1[%c0_32, %c0_33, %c34] : memref<1x1x768xbf16, #tpu.memory_space<vmem>>, vector<1x1x666xbf16>
    %33 = vector.shape_cast %32 : vector<1x1x666xbf16> to vector<1x666xbf16>
    %c0_34 = arith.constant 0 : index
    %c0_35 = arith.constant 0 : index
    %c35 = arith.constant 35 : index
    %34 = vector.load %arg1[%c0_34, %c0_35, %c35] : memref<1x1x768xbf16, #tpu.memory_space<vmem>>, vector<1x1x666xbf16>
    %35 = vector.shape_cast %34 : vector<1x1x666xbf16> to vector<1x666xbf16>
    %c0_36 = arith.constant 0 : index
    %c0_37 = arith.constant 0 : index
    %c36 = arith.constant 36 : index
    %36 = vector.load %arg1[%c0_36, %c0_37, %c36] : memref<1x1x768xbf16, #tpu.memory_space<vmem>>, vector<1x1x666xbf16>
    %37 = vector.shape_cast %36 : vector<1x1x666xbf16> to vector<1x666xbf16>
    %c0_38 = arith.constant 0 : index
    %c0_39 = arith.constant 0 : index
    %c37 = arith.constant 37 : index
    %38 = vector.load %arg1[%c0_38, %c0_39, %c37] : memref<1x1x768xbf16, #tpu.memory_space<vmem>>, vector<1x1x666xbf16>
    %39 = vector.shape_cast %38 : vector<1x1x666xbf16> to vector<1x666xbf16>
    %c0_40 = arith.constant 0 : index
    %c0_41 = arith.constant 0 : index
    %c38 = arith.constant 38 : index
    %40 = vector.load %arg1[%c0_40, %c0_41, %c38] : memref<1x1x768xbf16, #tpu.memory_space<vmem>>, vector<1x1x666xbf16>
    %41 = vector.shape_cast %40 : vector<1x1x666xbf16> to vector<1x666xbf16>
    %c0_42 = arith.constant 0 : index
    %c0_43 = arith.constant 0 : index
    %c48 = arith.constant 48 : index
    %42 = vector.load %arg1[%c0_42, %c0_43, %c48] : memref<1x1x768xbf16, #tpu.memory_space<vmem>>, vector<1x1x666xbf16>
    %43 = vector.shape_cast %42 : vector<1x1x666xbf16> to vector<1x666xbf16>
    %c0_44 = arith.constant 0 : index
    %c0_45 = arith.constant 0 : index
    %c49 = arith.constant 49 : index
    %44 = vector.load %arg1[%c0_44, %c0_45, %c49] : memref<1x1x768xbf16, #tpu.memory_space<vmem>>, vector<1x1x666xbf16>
    %45 = vector.shape_cast %44 : vector<1x1x666xbf16> to vector<1x666xbf16>
    %c0_46 = arith.constant 0 : index
    %c0_47 = arith.constant 0 : index
    %c50 = arith.constant 50 : index
    %46 = vector.load %arg1[%c0_46, %c0_47, %c50] : memref<1x1x768xbf16, #tpu.memory_space<vmem>>, vector<1x1x666xbf16>
    %47 = vector.shape_cast %46 : vector<1x1x666xbf16> to vector<1x666xbf16>
    %c0_48 = arith.constant 0 : index
    %c0_49 = arith.constant 0 : index
    %c51 = arith.constant 51 : index
    %48 = vector.load %arg1[%c0_48, %c0_49, %c51] : memref<1x1x768xbf16, #tpu.memory_space<vmem>>, vector<1x1x666xbf16>
    %49 = vector.shape_cast %48 : vector<1x1x666xbf16> to vector<1x666xbf16>
    %c0_50 = arith.constant 0 : index
    %c0_51 = arith.constant 0 : index
    %c52 = arith.constant 52 : index
    %50 = vector.load %arg1[%c0_50, %c0_51, %c52] : memref<1x1x768xbf16, #tpu.memory_space<vmem>>, vector<1x1x666xbf16>
    %51 = vector.shape_cast %50 : vector<1x1x666xbf16> to vector<1x666xbf16>
    %c0_52 = arith.constant 0 : index
    %c0_53 = arith.constant 0 : index
    %c53 = arith.constant 53 : index
    %52 = vector.load %arg1[%c0_52, %c0_53, %c53] : memref<1x1x768xbf16, #tpu.memory_space<vmem>>, vector<1x1x666xbf16>
    %53 = vector.shape_cast %52 : vector<1x1x666xbf16> to vector<1x666xbf16>
    %c0_54 = arith.constant 0 : index
    %c0_55 = arith.constant 0 : index
    %c54 = arith.constant 54 : index
    %54 = vector.load %arg1[%c0_54, %c0_55, %c54] : memref<1x1x768xbf16, #tpu.memory_space<vmem>>, vector<1x1x666xbf16>
    %55 = vector.shape_cast %54 : vector<1x1x666xbf16> to vector<1x666xbf16>
    %c0_56 = arith.constant 0 : index
    %c0_57 = arith.constant 0 : index
    %c64 = arith.constant 64 : index
    %56 = vector.load %arg1[%c0_56, %c0_57, %c64] : memref<1x1x768xbf16, #tpu.memory_space<vmem>>, vector<1x1x666xbf16>
    %57 = vector.shape_cast %56 : vector<1x1x666xbf16> to vector<1x666xbf16>
    %c0_58 = arith.constant 0 : index
    %c0_59 = arith.constant 0 : index
    %c65 = arith.constant 65 : index
    %58 = vector.load %arg1[%c0_58, %c0_59, %c65] : memref<1x1x768xbf16, #tpu.memory_space<vmem>>, vector<1x1x666xbf16>
    %59 = vector.shape_cast %58 : vector<1x1x666xbf16> to vector<1x666xbf16>
    %c0_60 = arith.constant 0 : index
    %c0_61 = arith.constant 0 : index
    %c66 = arith.constant 66 : index
    %60 = vector.load %arg1[%c0_60, %c0_61, %c66] : memref<1x1x768xbf16, #tpu.memory_space<vmem>>, vector<1x1x666xbf16>
    %61 = vector.shape_cast %60 : vector<1x1x666xbf16> to vector<1x666xbf16>
    %c0_62 = arith.constant 0 : index
    %c0_63 = arith.constant 0 : index
    %c67 = arith.constant 67 : index
    %62 = vector.load %arg1[%c0_62, %c0_63, %c67] : memref<1x1x768xbf16, #tpu.memory_space<vmem>>, vector<1x1x666xbf16>
    %63 = vector.shape_cast %62 : vector<1x1x666xbf16> to vector<1x666xbf16>
    %c0_64 = arith.constant 0 : index
    %c0_65 = arith.constant 0 : index
    %c68 = arith.constant 68 : index
    %64 = vector.load %arg1[%c0_64, %c0_65, %c68] : memref<1x1x768xbf16, #tpu.memory_space<vmem>>, vector<1x1x666xbf16>
    %65 = vector.shape_cast %64 : vector<1x1x666xbf16> to vector<1x666xbf16>
    %c0_66 = arith.constant 0 : index
    %c0_67 = arith.constant 0 : index
    %c69 = arith.constant 69 : index
    %66 = vector.load %arg1[%c0_66, %c0_67, %c69] : memref<1x1x768xbf16, #tpu.memory_space<vmem>>, vector<1x1x666xbf16>
    %67 = vector.shape_cast %66 : vector<1x1x666xbf16> to vector<1x666xbf16>
    %c0_68 = arith.constant 0 : index
    %c0_69 = arith.constant 0 : index
    %c70 = arith.constant 70 : index
    %68 = vector.load %arg1[%c0_68, %c0_69, %c70] : memref<1x1x768xbf16, #tpu.memory_space<vmem>>, vector<1x1x666xbf16>
    %69 = vector.shape_cast %68 : vector<1x1x666xbf16> to vector<1x666xbf16>
    %c0_70 = arith.constant 0 : index
    %c0_71 = arith.constant 0 : index
    %c80 = arith.constant 80 : index
    %70 = vector.load %arg1[%c0_70, %c0_71, %c80] : memref<1x1x768xbf16, #tpu.memory_space<vmem>>, vector<1x1x666xbf16>
    %71 = vector.shape_cast %70 : vector<1x1x666xbf16> to vector<1x666xbf16>
    %c0_72 = arith.constant 0 : index
    %c0_73 = arith.constant 0 : index
    %c81 = arith.constant 81 : index
    %72 = vector.load %arg1[%c0_72, %c0_73, %c81] : memref<1x1x768xbf16, #tpu.memory_space<vmem>>, vector<1x1x666xbf16>
    %73 = vector.shape_cast %72 : vector<1x1x666xbf16> to vector<1x666xbf16>
    %c0_74 = arith.constant 0 : index
    %c0_75 = arith.constant 0 : index
    %c82 = arith.constant 82 : index
    %74 = vector.load %arg1[%c0_74, %c0_75, %c82] : memref<1x1x768xbf16, #tpu.memory_space<vmem>>, vector<1x1x666xbf16>
    %75 = vector.shape_cast %74 : vector<1x1x666xbf16> to vector<1x666xbf16>
    %c0_76 = arith.constant 0 : index
    %c0_77 = arith.constant 0 : index
    %c83 = arith.constant 83 : index
    %76 = vector.load %arg1[%c0_76, %c0_77, %c83] : memref<1x1x768xbf16, #tpu.memory_space<vmem>>, vector<1x1x666xbf16>
    %77 = vector.shape_cast %76 : vector<1x1x666xbf16> to vector<1x666xbf16>
    %c0_78 = arith.constant 0 : index
    %c0_79 = arith.constant 0 : index
    %c84 = arith.constant 84 : index
    %78 = vector.load %arg1[%c0_78, %c0_79, %c84] : memref<1x1x768xbf16, #tpu.memory_space<vmem>>, vector<1x1x666xbf16>
    %79 = vector.shape_cast %78 : vector<1x1x666xbf16> to vector<1x666xbf16>
    %c0_80 = arith.constant 0 : index
    %c0_81 = arith.constant 0 : index
    %c85 = arith.constant 85 : index
    %80 = vector.load %arg1[%c0_80, %c0_81, %c85] : memref<1x1x768xbf16, #tpu.memory_space<vmem>>, vector<1x1x666xbf16>
    %81 = vector.shape_cast %80 : vector<1x1x666xbf16> to vector<1x666xbf16>
    %c0_82 = arith.constant 0 : index
    %c0_83 = arith.constant 0 : index
    %c86 = arith.constant 86 : index
    %82 = vector.load %arg1[%c0_82, %c0_83, %c86] : memref<1x1x768xbf16, #tpu.memory_space<vmem>>, vector<1x1x666xbf16>
    %83 = vector.shape_cast %82 : vector<1x1x666xbf16> to vector<1x666xbf16>
    %c0_84 = arith.constant 0 : index
    %c0_85 = arith.constant 0 : index
    %c96 = arith.constant 96 : index
    %84 = vector.load %arg1[%c0_84, %c0_85, %c96] : memref<1x1x768xbf16, #tpu.memory_space<vmem>>, vector<1x1x666xbf16>
    %85 = vector.shape_cast %84 : vector<1x1x666xbf16> to vector<1x666xbf16>
    %c0_86 = arith.constant 0 : index
    %c0_87 = arith.constant 0 : index
    %c97 = arith.constant 97 : index
    %86 = vector.load %arg1[%c0_86, %c0_87, %c97] : memref<1x1x768xbf16, #tpu.memory_space<vmem>>, vector<1x1x666xbf16>
    %87 = vector.shape_cast %86 : vector<1x1x666xbf16> to vector<1x666xbf16>
    %c0_88 = arith.constant 0 : index
    %c0_89 = arith.constant 0 : index
    %c98 = arith.constant 98 : index
    %88 = vector.load %arg1[%c0_88, %c0_89, %c98] : memref<1x1x768xbf16, #tpu.memory_space<vmem>>, vector<1x1x666xbf16>
    %89 = vector.shape_cast %88 : vector<1x1x666xbf16> to vector<1x666xbf16>
    %c0_90 = arith.constant 0 : index
    %c0_91 = arith.constant 0 : index
    %c99 = arith.constant 99 : index
    %90 = vector.load %arg1[%c0_90, %c0_91, %c99] : memref<1x1x768xbf16, #tpu.memory_space<vmem>>, vector<1x1x666xbf16>
    %91 = vector.shape_cast %90 : vector<1x1x666xbf16> to vector<1x666xbf16>
    %c0_92 = arith.constant 0 : index
    %c0_93 = arith.constant 0 : index
    %c100 = arith.constant 100 : index
    %92 = vector.load %arg1[%c0_92, %c0_93, %c100] : memref<1x1x768xbf16, #tpu.memory_space<vmem>>, vector<1x1x666xbf16>
    %93 = vector.shape_cast %92 : vector<1x1x666xbf16> to vector<1x666xbf16>
    %c0_94 = arith.constant 0 : index
    %c0_95 = arith.constant 0 : index
    %c101 = arith.constant 101 : index
    %94 = vector.load %arg1[%c0_94, %c0_95, %c101] : memref<1x1x768xbf16, #tpu.memory_space<vmem>>, vector<1x1x666xbf16>
    %95 = vector.shape_cast %94 : vector<1x1x666xbf16> to vector<1x666xbf16>
    %c0_96 = arith.constant 0 : index
    %c0_97 = arith.constant 0 : index
    %c102 = arith.constant 102 : index
    %96 = vector.load %arg1[%c0_96, %c0_97, %c102] : memref<1x1x768xbf16, #tpu.memory_space<vmem>>, vector<1x1x666xbf16>
    %97 = vector.shape_cast %96 : vector<1x1x666xbf16> to vector<1x666xbf16>
    %98 = tpu.concatenate %1, %3, %5, %7, %9, %11, %13, %15, %17, %19, %21, %23, %25, %27, %29, %31 in 0 : vector<1x666xbf16>, vector<1x666xbf16>, vector<1x666xbf16>, vector<1x666xbf16>, vector<1x666xbf16>, vector<1x666xbf16>, vector<1x666xbf16>, vector<1x666xbf16>, vector<1x666xbf16>, vector<1x666xbf16>, vector<1x666xbf16>, vector<1x666xbf16>, vector<1x666xbf16>, vector<1x666xbf16>, vector<1x666xbf16>, vector<1x666xbf16> -> vector<16x666xbf16>
    %99 = tpu.concatenate %33, %35, %37, %39, %41, %43, %45, %47, %49, %51, %53, %55, %57, %59, %61, %63 in 0 : vector<1x666xbf16>, vector<1x666xbf16>, vector<1x666xbf16>, vector<1x666xbf16>, vector<1x666xbf16>, vector<1x666xbf16>, vector<1x666xbf16>, vector<1x666xbf16>, vector<1x666xbf16>, vector<1x666xbf16>, vector<1x666xbf16>, vector<1x666xbf16>, vector<1x666xbf16>, vector<1x666xbf16>, vector<1x666xbf16>, vector<1x666xbf16> -> vector<16x666xbf16>
    %100 = tpu.concatenate %65, %67, %69, %71, %73, %75, %77, %79, %81, %83, %85, %87, %89, %91, %93, %95 in 0 : vector<1x666xbf16>, vector<1x666xbf16>, vector<1x666xbf16>, vector<1x666xbf16>, vector<1x666xbf16>, vector<1x666xbf16>, vector<1x666xbf16>, vector<1x666xbf16>, vector<1x666xbf16>, vector<1x666xbf16>, vector<1x666xbf16>, vector<1x666xbf16>, vector<1x666xbf16>, vector<1x666xbf16>, vector<1x666xbf16>, vector<1x666xbf16> -> vector<16x666xbf16>
    %101 = tpu.concatenate %98, %99, %100, %97 in 0 : vector<16x666xbf16>, vector<16x666xbf16>, vector<16x666xbf16>, vector<1x666xbf16> -> vector<49x666xbf16>
    %c0_98 = arith.constant 0 : index
    %c0_99 = arith.constant 0 : index
    %102 = vector.load %arg2[%c0_98, %c0_99] : memref<16x49xbf16, #tpu.memory_space<vmem>>, vector<16x49xbf16>
    %cst = arith.constant dense<0.000000e+00> : vector<16x666xf32>
    %103 = tpu.matmul %102, %101, %cst {dimension_numbers = #tpu.dot_dimension_numbers<[1], [0], [0], [1], [0, 0, 1, 1], [], []>} : vector<16x49xbf16>, vector<49x666xbf16>, vector<16x666xf32> -> vector<16x666xf32>
    %104 = arith.truncf %103 : vector<16x666xf32> to vector<16x666xbf16>
    %c0_100 = arith.constant 0 : index
    %c0_101 = arith.constant 0 : index
    %105 = vector.load %arg7[%c0_100, %c0_101] : memref<16x666xbf16, #tpu.memory_space<vmem>>, vector<16x666xbf16>
    tpu.vector_store %arg7[%c0_100, %c0_101], %104 {strides = array<i32>} : memref<16x666xbf16, #tpu.memory_space<vmem>>, vector<16x666xbf16>,
    %c0_102 = arith.constant 0 : index
    %c0_103 = arith.constant 0 : index
    %106 = vector.load %arg7[%c0_102, %c0_103] : memref<16x666xbf16, #tpu.memory_space<vmem>>, vector<16x632xbf16>
    %c0_104 = arith.constant 0 : index
    %c1_105 = arith.constant 1 : index
    %107 = vector.load %arg7[%c0_104, %c1_105] : memref<16x666xbf16, #tpu.memory_space<vmem>>, vector<16x632xbf16>
    %c0_106 = arith.constant 0 : index
    %c2_107 = arith.constant 2 : index
    %108 = vector.load %arg7[%c0_106, %c2_107] : memref<16x666xbf16, #tpu.memory_space<vmem>>, vector<16x632xbf16>
    %c0_108 = arith.constant 0 : index
    %c16_109 = arith.constant 16 : index
    %109 = vector.load %arg7[%c0_108, %c16_109] : memref<16x666xbf16, #tpu.memory_space<vmem>>, vector<16x632xbf16>
    %c0_110 = arith.constant 0 : index
    %c17_111 = arith.constant 17 : index
    %110 = vector.load %arg7[%c0_110, %c17_111] : memref<16x666xbf16, #tpu.memory_space<vmem>>, vector<16x632xbf16>
    %c0_112 = arith.constant 0 : index
    %c18_113 = arith.constant 18 : index
    %111 = vector.load %arg7[%c0_112, %c18_113] : memref<16x666xbf16, #tpu.memory_space<vmem>>, vector<16x632xbf16>
    %c0_114 = arith.constant 0 : index
    %c32_115 = arith.constant 32 : index
    %112 = vector.load %arg7[%c0_114, %c32_115] : memref<16x666xbf16, #tpu.memory_space<vmem>>, vector<16x632xbf16>
    %c0_116 = arith.constant 0 : index
    %c33_117 = arith.constant 33 : index
    %113 = vector.load %arg7[%c0_116, %c33_117] : memref<16x666xbf16, #tpu.memory_space<vmem>>, vector<16x632xbf16>
    %c0_118 = arith.constant 0 : index
    %c34_119 = arith.constant 34 : index
    %114 = vector.load %arg7[%c0_118, %c34_119] : memref<16x666xbf16, #tpu.memory_space<vmem>>, vector<16x632xbf16>
    %115 = tpu.concatenate %106, %107, %108, %109, %110, %111, %112, %113, %114 in 0 : vector<16x632xbf16>, vector<16x632xbf16>, vector<16x632xbf16>, vector<16x632xbf16>, vector<16x632xbf16>, vector<16x632xbf16>, vector<16x632xbf16>, vector<16x632xbf16>, vector<16x632xbf16> -> vector<144x632xbf16>
    %c0_120 = arith.constant 0 : index
    %c0_121 = arith.constant 0 : index
    %116 = vector.load %arg3[%c0_120, %c0_121] : memref<16x144xbf16, #tpu.memory_space<vmem>>, vector<16x144xbf16>
    %cst_122 = arith.constant dense<0.000000e+00> : vector<16x632xf32>
    %117 = tpu.matmul %116, %115, %cst_122 {dimension_numbers = #tpu.dot_dimension_numbers<[1], [0], [0], [1], [0, 0, 1, 1], [], []>} : vector<16x144xbf16>, vector<144x632xbf16>, vector<16x632xf32> -> vector<16x632xf32>
    %118 = arith.truncf %117 : vector<16x632xf32> to vector<16x632xbf16>
    %c0_123 = arith.constant 0 : index
    %c0_124 = arith.constant 0 : index
    %119 = vector.load %arg7[%c0_123, %c0_124] : memref<16x666xbf16, #tpu.memory_space<vmem>>, vector<16x632xbf16>
    tpu.vector_store %arg7[%c0_123, %c0_124], %118 {strides = array<i32>} : memref<16x666xbf16, #tpu.memory_space<vmem>>, vector<16x632xbf16>,
    %c0_125 = arith.constant 0 : index
    %c0_126 = arith.constant 0 : index
    %120 = vector.load %arg7[%c0_125, %c0_126] : memref<16x666xbf16, #tpu.memory_space<vmem>>, vector<16x598xbf16>
    %c0_127 = arith.constant 0 : index
    %c1_128 = arith.constant 1 : index
    %121 = vector.load %arg7[%c0_127, %c1_128] : memref<16x666xbf16, #tpu.memory_space<vmem>>, vector<16x598xbf16>
    %c0_129 = arith.constant 0 : index
    %c2_130 = arith.constant 2 : index
    %122 = vector.load %arg7[%c0_129, %c2_130] : memref<16x666xbf16, #tpu.memory_space<vmem>>, vector<16x598xbf16>
    %c0_131 = arith.constant 0 : index
    %c16_132 = arith.constant 16 : index
    %123 = vector.load %arg7[%c0_131, %c16_132] : memref<16x666xbf16, #tpu.memory_space<vmem>>, vector<16x598xbf16>
    %c0_133 = arith.constant 0 : index
    %c17_134 = arith.constant 17 : index
    %124 = vector.load %arg7[%c0_133, %c17_134] : memref<16x666xbf16, #tpu.memory_space<vmem>>, vector<16x598xbf16>
    %c0_135 = arith.constant 0 : index
    %c18_136 = arith.constant 18 : index
    %125 = vector.load %arg7[%c0_135, %c18_136] : memref<16x666xbf16, #tpu.memory_space<vmem>>, vector<16x598xbf16>
    %c0_137 = arith.constant 0 : index
    %c32_138 = arith.constant 32 : index
    %126 = vector.load %arg7[%c0_137, %c32_138] : memref<16x666xbf16, #tpu.memory_space<vmem>>, vector<16x598xbf16>
    %c0_139 = arith.constant 0 : index
    %c33_140 = arith.constant 33 : index
    %127 = vector.load %arg7[%c0_139, %c33_140] : memref<16x666xbf16, #tpu.memory_space<vmem>>, vector<16x598xbf16>
    %c0_141 = arith.constant 0 : index
    %c34_142 = arith.constant 34 : index
    %128 = vector.load %arg7[%c0_141, %c34_142] : memref<16x666xbf16, #tpu.memory_space<vmem>>, vector<16x598xbf16>
    %129 = tpu.concatenate %120, %121, %122, %123, %124, %125, %126, %127, %128 in 0 : vector<16x598xbf16>, vector<16x598xbf16>, vector<16x598xbf16>, vector<16x598xbf16>, vector<16x598xbf16>, vector<16x598xbf16>, vector<16x598xbf16>, vector<16x598xbf16>, vector<16x598xbf16> -> vector<144x598xbf16>
    %c0_143 = arith.constant 0 : index
    %c0_144 = arith.constant 0 : index
    %130 = vector.load %arg4[%c0_143, %c0_144] : memref<16x144xbf16, #tpu.memory_space<vmem>>, vector<16x144xbf16>
    %cst_145 = arith.constant dense<0.000000e+00> : vector<16x598xf32>
    %131 = tpu.matmul %130, %129, %cst_145 {dimension_numbers = #tpu.dot_dimension_numbers<[1], [0], [0], [1], [0, 0, 1, 1], [], []>} : vector<16x144xbf16>, vector<144x598xbf16>, vector<16x598xf32> -> vector<16x598xf32>
    %132 = arith.truncf %131 : vector<16x598xf32> to vector<16x598xbf16>
    %c0_146 = arith.constant 0 : index
    %c0_147 = arith.constant 0 : index
    %133 = vector.load %arg7[%c0_146, %c0_147] : memref<16x666xbf16, #tpu.memory_space<vmem>>, vector<16x598xbf16>
    tpu.vector_store %arg7[%c0_146, %c0_147], %132 {strides = array<i32>} : memref<16x666xbf16, #tpu.memory_space<vmem>>, vector<16x598xbf16>,
    %c0_148 = arith.constant 0 : index
    %c0_149 = arith.constant 0 : index
    %134 = vector.load %arg7[%c0_148, %c0_149] : memref<16x666xbf16, #tpu.memory_space<vmem>>, vector<16x564xbf16>
    %c0_150 = arith.constant 0 : index
    %c1_151 = arith.constant 1 : index
    %135 = vector.load %arg7[%c0_150, %c1_151] : memref<16x666xbf16, #tpu.memory_space<vmem>>, vector<16x564xbf16>
    %c0_152 = arith.constant 0 : index
    %c2_153 = arith.constant 2 : index
    %136 = vector.load %arg7[%c0_152, %c2_153] : memref<16x666xbf16, #tpu.memory_space<vmem>>, vector<16x564xbf16>
    %c0_154 = arith.constant 0 : index
    %c16_155 = arith.constant 16 : index
    %137 = vector.load %arg7[%c0_154, %c16_155] : memref<16x666xbf16, #tpu.memory_space<vmem>>, vector<16x564xbf16>
    %c0_156 = arith.constant 0 : index
    %c17_157 = arith.constant 17 : index
    %138 = vector.load %arg7[%c0_156, %c17_157] : memref<16x666xbf16, #tpu.memory_space<vmem>>, vector<16x564xbf16>
    %c0_158 = arith.constant 0 : index
    %c18_159 = arith.constant 18 : index
    %139 = vector.load %arg7[%c0_158, %c18_159] : memref<16x666xbf16, #tpu.memory_space<vmem>>, vector<16x564xbf16>
    %c0_160 = arith.constant 0 : index
    %c32_161 = arith.constant 32 : index
    %140 = vector.load %arg7[%c0_160, %c32_161] : memref<16x666xbf16, #tpu.memory_space<vmem>>, vector<16x564xbf16>
    %c0_162 = arith.constant 0 : index
    %c33_163 = arith.constant 33 : index
    %141 = vector.load %arg7[%c0_162, %c33_163] : memref<16x666xbf16, #tpu.memory_space<vmem>>, vector<16x564xbf16>
    %c0_164 = arith.constant 0 : index
    %c34_165 = arith.constant 34 : index
    %142 = vector.load %arg7[%c0_164, %c34_165] : memref<16x666xbf16, #tpu.memory_space<vmem>>, vector<16x564xbf16>
    %143 = tpu.concatenate %134, %135, %136, %137, %138, %139, %140, %141, %142 in 0 : vector<16x564xbf16>, vector<16x564xbf16>, vector<16x564xbf16>, vector<16x564xbf16>, vector<16x564xbf16>, vector<16x564xbf16>, vector<16x564xbf16>, vector<16x564xbf16>, vector<16x564xbf16> -> vector<144x564xbf16>
    %c0_166 = arith.constant 0 : index
    %c0_167 = arith.constant 0 : index
    %144 = vector.load %arg5[%c0_166, %c0_167] : memref<1x144xbf16, #tpu.memory_space<vmem>>, vector<1x144xbf16>
    %cst_168 = arith.constant dense<0.000000e+00> : vector<1x564xf32>
    %145 = tpu.matmul %144, %143, %cst_168 {dimension_numbers = #tpu.dot_dimension_numbers<[1], [0], [0], [1], [0, 0, 1, 1], [], []>} : vector<1x144xbf16>, vector<144x564xbf16>, vector<1x564xf32> -> vector<1x564xf32>
    %146 = vector.extract_strided_slice %145 {offsets = [0, 0], sizes = [1, 3], strides = [1, 1]} : vector<1x564xf32> to vector<1x3xf32>
    %147 = vector.extract_strided_slice %145 {offsets = [0, 32], sizes = [1, 3], strides = [1, 1]} : vector<1x564xf32> to vector<1x3xf32>
    %148 = vector.extract_strided_slice %145 {offsets = [0, 256], sizes = [1, 3], strides = [1, 1]} : vector<1x564xf32> to vector<1x3xf32>
    %149 = vector.extract_strided_slice %145 {offsets = [0, 288], sizes = [1, 3], strides = [1, 1]} : vector<1x564xf32> to vector<1x3xf32>
    %150 = vector.extract_strided_slice %145 {offsets = [0, 512], sizes = [1, 3], strides = [1, 1]} : vector<1x564xf32> to vector<1x3xf32>
    %151 = vector.extract_strided_slice %145 {offsets = [0, 544], sizes = [1, 3], strides = [1, 1]} : vector<1x564xf32> to vector<1x3xf32>
    %152 = tpu.concatenate %146, %147, %148, %149, %150, %151 in 1 : vector<1x3xf32>, vector<1x3xf32>, vector<1x3xf32>, vector<1x3xf32>, vector<1x3xf32>, vector<1x3xf32> -> vector<1x18xf32>
    %cst_169 = arith.constant 0.000000e+00 : f32
    %153 = vector.broadcast %cst_169 : f32 to vector<1x110xf32>
    %154 = tpu.concatenate %152, %153 in 1 : vector<1x18xf32>, vector<1x110xf32> -> vector<1x128xf32>
    %c0_170 = arith.constant 0 : index
    %c0_171 = arith.constant 0 : index
    %c0_172 = arith.constant 0 : index
    %155 = vector.load %arg6[%c0_170, %c0_171, %c0_172] : memref<1x1x128xf32, #tpu.memory_space<vmem>>, vector<1x1x128xf32>
    %156 = vector.shape_cast %155 : vector<1x1x128xf32> to vector<1x128xf32>
    %157 = vector.shape_cast %154 : vector<1x128xf32> to vector<1x1x128xf32>
    tpu.vector_store %arg6[%c0_170, %c0_171, %c0_172], %157 {strides = array<i32>} : memref<1x1x128xf32, #tpu.memory_space<vmem>>, vector<1x1x128xf32>,
    return
  }
  func.func @transform_0(%arg0: i32) -> (i32, i32, i32) {
    %c0_i32 = arith.constant 0 : i32
    %c0_i32_0 = arith.constant 0 : i32
    %c0_i32_1 = arith.constant 0 : i32
    return %arg0, %c0_i32, %c0_i32_0 : i32, i32, i32
  }
  func.func @transform_1(%arg0: i32) -> (i32, i32) {
    %c0_i32 = arith.constant 0 : i32
    %c0_i32_0 = arith.constant 0 : i32
    %c0_i32_1 = arith.constant 0 : i32
    return %c0_i32, %c0_i32_0 : i32, i32
  }
  func.func @transform_2(%arg0: i32) -> (i32, i32) {
    %c0_i32 = arith.constant 0 : i32
    %c0_i32_0 = arith.constant 0 : i32
    %c0_i32_1 = arith.constant 0 : i32
    return %c0_i32, %c0_i32_0 : i32, i32
  }
  func.func @transform_3(%arg0: i32) -> (i32, i32) {
    %c0_i32 = arith.constant 0 : i32
    %c0_i32_0 = arith.constant 0 : i32
    %c0_i32_1 = arith.constant 0 : i32
    return %c0_i32, %c0_i32_0 : i32, i32
  }
  func.func @transform_4(%arg0: i32) -> (i32, i32) {
    %c0_i32 = arith.constant 0 : i32
    %c0_i32_0 = arith.constant 0 : i32
    %c0_i32_1 = arith.constant 0 : i32
    return %c0_i32, %c0_i32_0 : i32, i32
  }
  func.func @transform_5(%arg0: i32) -> (i32, i32, i32) {
    %c0_i32 = arith.constant 0 : i32
    %c0_i32_0 = arith.constant 0 : i32
    %c0_i32_1 = arith.constant 0 : i32
    return %arg0, %c0_i32, %c0_i32_0 : i32, i32, i32
  }
}

</mosaic_0001>

<bundles_post_ra>
// kernel: tpu_custom_call.1
= control target key start
LH: loop header
LB: loop body
LE: loop exit
PB: predicated region body
PF: predicated region fallthrough
CT: control target
= control target key end

     0   :  { %10 = vsyncpa [#allocation4], 0  ;;  %s5319_s0 = inlined_call_operand.vmem [shape: bf16[2,1,768], index: 0, kind: input, shape index: {}]   ;;  %s5320_s1 = inlined_call_operand.vmem [shape: bf16[16,49], index: 1, kind: input, shape index: {}]   ;;  %s5321_s2 = inlined_call_operand.vmem [shape: bf16[16,144], index: 2, kind: input, shape index: {}]   ;;  %s5322_s3 = inlined_call_operand.hbm [shape: bf16[16,144], index: 3, kind: input, shape index: {}]   ;;  %s5323_s4 = inlined_call_operand.vmem [shape: bf16[1,144], index: 4, kind: input, shape index: {}]   ;;  %s5324_s5 = inlined_call_operand.hbm [shape: f32[2,1,128], index: 5, kind: output, shape index: {}]  }
   0x1   :  { %11 = vsyncpa [#allocation5], 0 }
   0x2   :  { %13 = vsyncpa [#allocation5 + $0x1], 0  ;;  %s3215_s18 = smov 0   ;;  %s3217_s19 = smov 0  }
   0x3   :  { %s3219_s20 = smov 0   ;;  %s3221_s21 = smov 0  }
   0x4 LB: > { %s3236_s22 = sadd.s32 4294967295, %s3148_s21   ;;  %s2764_s23 = sadd.s32 4294967294, %s3148_s21   ;;  %s3148_s21 = sphi %s3221_s21, %s5752_s21   ;;  %s3144_s20 = sphi %s3219_s20, %s5751_s20   ;;  %s3140_s19 = sphi %s3217_s19, %s5750_s19   ;;  %s3136_s18 = sphi %s3215_s18, %s5749_s18  }
   0x5   : > { %s3240_s24 = sadd.s32 1, %s3148_s21   ;;  %s136_s25 = sadd.s32 1, %s3144_s20 }
   0x6   : > { %s133_s26 = ssub.s32 %s3148_s21, %s3240_s24  ;;  %p146_p0 = scmp.ne.s32.totalorder %s3144_s20, %s3140_s19 }
   0x7   : > { %p134_p1 = scmp.eq.s32.totalorder %s133_s26, 0  ;;  %p147_p2 = scmp.eq.s32.totalorder %s3236_s22, 1 }
   0x8   : > { %p152_p3 = scmp.ne.s32.totalorder %s3140_s19, %s3136_s18  ;;  %p153_p4 = scmp.eq.s32.totalorder %s2764_s23, 1 }
   0x9   : > { %s3251_s27 = scalar_select %p134_p1, %s3144_s20, %s136_s25  }
   0xa   : > { %p3253_p5 = por %p147_p2, %p146_p0  ;;  %p3257_p6 = por %p153_p4, %p152_p3 }
   0xb   : > { %p2765_p7 = scmp.ge.s32.totalorder %s3148_s21, 1  ;;  %p160_p8 = scmp.lt.s32.totalorder %s3148_s21, 3 }
   0xc   : > { %s5401_s28 = scalar_select %p3253_p5, 1, 0 }
   0xd   : > { %s5402_s29 = scalar_select %p3257_p6, 1, 0 }
   0xe   : > { %p5325_p9 = scmp.eq.s32.totalorder %s3236_s22, 0  ;;  %p3264_p10 = pnand %p2765_p7, %p160_p8 }
   0xf   : > { %s3150_s6 = smov [#allocation3]   ;;  %s3054_s11 = scalar_lea.hbm %s5322_s3, 256 }
  0x10   : > { %s5403_s30 = scalar_select %p3264_p10, 1, 0 }
  0x11   : > { %s178_s7 = sshll.u32 %s3150_s6, 4  ;;  %p2798_p11 = pneg %p3264_p10  ;;  %s179_s7 = int_to_ptr.vmem [resolvable:$true] %s178_s7 }
  0x12   : > { %p3055_p13 = scmp.ne.s32.totalorder %s5322_s3, %s3054_s11  ;;  %p3061_p3 = scmp.lt.u32.totalorder %s3054_s11, %s5322_s3 }
  0x13   : > { %p3272_p12 = pnand %p5325_p9, %p2798_p11 }
  0x15   : > { %p3056_p0 = pneg %p3272_p12 }
  0x17   : > { %p3057_p1 = pnand %p3056_p0, %p3055_p13 }
  0x19   : > { %p3058_p2 = pneg %p3057_p1 }
  0x1b   : > { %p3063_p4 = pnand %p3061_p3, %p3058_p2 }
  0x1d   : > { %3066 = shalt.err (!%p3063_p4)
}
  0x1e   : > { %s3067_s16 = scalar_lea.vmem %s179_s7, 256  ;;  %p3075_p9 = scmp.lt.s32.totalorder %s179_s7, %s179_s7 }
  0x1f   : > { %p3068_p7 = scmp.ne.s32.totalorder %s179_s7, %s3067_s16  ;;  %p3076_p6 = scmp.lt.s32.totalorder %s3067_s16, %s3067_s16 }
  0x21   : > { %p3070_p8 = pnand %p3068_p7, %p3056_p0  ;;  %p3077_p5 = por %p3076_p6, %p3075_p9 }
  0x23   : > { %p3071_p11 = pneg %p3070_p8 }
  0x25   : > { %p3078_p10 = pnand %p3077_p5, %p3071_p11 }
  0x27   : > { %3081 = shalt.err (!%p3078_p10)
}
  0x28   : > { %s3151_s17 = smov 128   ;;  %s3152_s23 = smov 8  }
  0x29   : > { %2801 = dma.hbm_to_vmem [thread:$0]  (!%p3272_p12), %s5322_s3, 256, %s179_s7, [#allocation4], %s3151_s17, %s3151_s17, %s3152_s23  }
  0x2a   : > { %p5405_p13 = scmp.ne.s32.totalorder %s5403_s30, 0 }
  0x2c   : > { %204 = sbr.rel (%p5405_p13) target bundleno = 2025 (0x7e9), region = 40 }
  0x33   : > { %p5406_p1 = scmp.eq.s32.totalorder %s3236_s22, 0 }
  0x35   : > { %3127 = dma.done.wait (%p5406_p1), [#allocation4], 256   ;;  %p5407_p0 = pmov %p5406_p1 }
  0x36   : > { %p230_p5 = scmp.lt.s32.totalorder %s3236_s22, 1  ;;  %v241_v0 = vlaneseq  ;;  %v3153_v1 = vmov 1966171168   ;;  %s3154_s10 = smov 124   ;;  %vm5339_vm0 = vcmask 1039360   ;;  %vm5350_vm1 = vcmask 1040384  }
  0x37   : > { %3129 = vsyncadd (%p5407_p0), [#allocation4], 4294967040  ;;  %v239_v2 = vunpack.c.l.s4 %v3153_v1  ;;  %s3155_s11 = smov 126   ;;  %s3156_s12 = smov 127   ;;  %vm729_vm2 = vsmask.f32 256 }
  0x38   : > { %s231_s6 = scalar_select %p230_p5, %s3236_s22, 1  ;;  %v242_v3 = vshrl.u32 %v241_v0, 7  ;;  %vm3703_vm3 = vmand %vm5350_vm1, %vm729_vm2  ;;  %vm5348_vm4 = vcmask 1022976   ;;  %vm5370_vm5 = vcmask 1041408   ;;  %vm763_vm6 = vsmask.f32 1280 }
  0x39   : > { %v240_v4 = vunpack.c.0.s8 %v239_v2  ;;  %s3157_s13 = smov 125   ;;  %s3158_s14 = smov 114   ;;  %vm5349_vm7 = vcmask 1031168   ;;  %vm5352_vm8 = vcmask 1014784   ;;  %vm5351_vm9 = vcmask 932864   ;;  %vm3730_vm11 = vmand %vm5370_vm5, %vm763_vm6 }
  0x3a   : > { %s2791_s8 = smul.u32 6, %s231_s6  ;;  %s3159_s15 = smov 113   ;;  %vm5376_vm10 = vcmask 1042432   ;;  %vm797_vm12 = vsmask.f32 2304  ;;  %vm5363_vm13 = vcmask 924672  }
  0x3b   : > { %v3300_v5 = vsub.s32 %v240_v4, %v242_v3  ;;  %s3160_s16 = smov 112   ;;  %s3161_s17 = smov 116   ;;  %vm5365_vm14 = vcmask 916480   ;;  %vm5364_vm15 = vcmask 949248   ;;  %vm5369_vm2 = vcmask 908288   ;;  %vm3774_vm6 = vmand %vm5376_vm10, %vm797_vm12 }
  0x3c   : > { %s233_s9 = scalar_lea.vmem %s5319_s0, %s2791_s8  ;;  %s3162_s23 = smov 111   ;;  %vm5448_vm12 = vcmask 1044480  }
  0x3d   : > { %5408 = vst [vmem:[#allocation9_spill] sm:$0xff] %v3300_v5  ;;  %v3305_v6 = vld [vmem:[%s233_s9] sm:$0x3f]  ;;  %s3163_s25 = smov 115   ;;  %s3164_s26 = smov 110  }
  0x3e   : > { %v332_v7 = vcombine.low %v3305_v6, %v3305_v6  ;;  %v244_v8 = vrot.slane %v3305_v6, %v3300_v5  ;;  %s3165_s6 = smov 109   ;;  %s5328_s8 = smov 108  }
  0x3f   : > { %s5330_s30 = smov 98   ;;  %s5329_s7 = smov 97  }
  0x40   : > { %v339_v9 = vrot.slane %v332_v7, %v3300_v5  ;;  %v252_v10 = vcombine.high %v244_v8, %v244_v8  ;;  %v3313_v11 = vrot.slane %v244_v8, %v3300_v5  ;;  %v405_v19 = vcombine.low %v244_v8, %v244_v8  ;;  %s3169_s9 = smov 96   ;;  %p5747_p9 = scmp.ne.s32.totalorder %s5401_s28, 0 }
  0x42   : > { %v3316_v12 = vrot.slane %v339_v9, %v3300_v5  ;;  %v3319_v13 = vrot.slane %v252_v10, %v3300_v5  ;;  %424 = vrot.lane.b32.xlu0 %v3313_v11, %s3154_s10  ;;  %v340_v14 = vcombine.high %v339_v9, %v339_v9  ;;  %v3325_v15 = vcombine.high %v3313_v11, %v3313_v11 }
  0x43   : > { %v3343_v21 = vshll.u32 %v3313_v11, 16  ;;  %v3357_v25 = vrot.slane %v405_v19, %v3300_v5  ;;  %v470_v44 = vcombine.low %v339_v9, %v339_v9  ;;  %v3454_v3 = vcombine.low %v3313_v11, %v3313_v11 }
  0x44   : > { %357 = vrot.lane.b32.xlu1 %v3316_v12, %s3155_s11  ;;  %v3330_v16 = vrot.slane %v340_v14, %v3300_v5  ;;  %v3333_v17 = vshll.u32 %v3319_v13, 16  ;;  %v3337_v18 = vcombine.high %v3319_v13, %v3319_v13  ;;  %v3340_v20 = vshll.u32 %v3325_v15, 16 }
  0x45   : > { %v3354_v24 = vcombine.high %v3316_v12, %v3316_v12  ;;  %v3366_v27 = vcombine.high %v3357_v25, %v3357_v25  ;;  %v375_v34 = vrot.slane %v3343_v21, 7  ;;  %v698_v42 = vrot.slane %v3343_v21, 1 }
  0x46   : > { %5409 = vst [vmem:[#allocation10_spill] sm:$0xff] %v3337_v18  ;;  %v3346_v22 = vshll.u32 %v3337_v18, 16  ;;  %v2875_v23 = vpack.i.bf16 %v3340_v20, %v3333_v17  ;;  %v356_v28 = vcombine.high %v3330_v16, %v3330_v16  ;;  %v376_v29 = vrot.slane %v3333_v17, 7 }
  0x47   : > { %v377_v30 = vrot.slane %v3340_v20, 7  ;;  %v600_v31 = vrot.slane %v3333_v17, 3  ;;  %v601_v32 = vrot.slane %v3340_v20, 3  ;;  %v650_v33 = vrot.slane %v3333_v17, 2 }
  0x48   : > { %359 = vrot.lane.b32.xlu1 %v3330_v16, %s3155_s11  ;;  %2876 = vrot.lane.b32.xlu0 %v2875_v23, %s3156_s12  ;;  %v2880_v26 = vpack.i.bf16 %v3343_v21, %v3346_v22  ;;  %v378_v35 = vrot.slane %v3346_v22, 7  ;;  %v651_v37 = vrot.slane %v3340_v20, 2  ;;  %v699_v39 = vrot.slane %v3333_v17, 1 }
  0x49   : > { %v3380_v36 = vpack.i.bf16 %v601_v32, %v600_v31  ;;  %v2885_v38 = vpack.i.bf16 %v377_v30, %v376_v29  ;;  %v700_v40 = vrot.slane %v3340_v20, 1  ;;  %v701_v43 = vrot.slane %v3346_v22, 1 }
  0x4a   : > { %v3386_v41 = vpack.i.bf16 %v651_v37, %v650_v33  ;;  %v2895_v46 = vpack.i.bf16 %v375_v34, %v378_v35  ;;  %v440_v47 = vrot.slane %v3343_v21, 6  ;;  %v443_v48 = vrot.slane %v3346_v22, 6 }
  0x4b   : > { %v3390_v45 = vpack.i.bf16 %v700_v40, %v699_v39  ;;  %v3396_v49 = vpack.i.bf16 %v698_v42, %v701_v43  ;;  %v441_v50 = vrot.slane %v3333_v17, 6  ;;  %v442_v51 = vrot.slane %v3340_v20, 6 }
  0x4c   : > { %361 = vrot.lane.b32.xlu1 %v3354_v24, %s3155_s11  ;;  %2881 = vrot.lane.b32.xlu0 %v2880_v26, %s3156_s12  ;;  %v2900_v52 = vpack.i.bf16 %v440_v47, %v443_v48  ;;  %v3403_v53 = vrot.slane %v470_v44, %v3300_v5  ;;  %v498_v56 = vrot.slane %v3333_v17, 5  ;;  %v499_v57 = vrot.slane %v3340_v20, 5 }
  0x4d   : > { %v3407_v54 = vpack.i.bf16 %v442_v51, %v441_v50  ;;  %v497_v59 = vrot.slane %v3343_v21, 5  ;;  %v500_v60 = vrot.slane %v3346_v22, 5  ;;  %v3430_v62 = vpack.i.bf16 %v443_v48, %v440_v47 }
  0x4e   : > { %v3412_v55 = vcombine.high %v3403_v53, %v3403_v53  ;;  %v2905_v58 = vpack.i.bf16 %v499_v57, %v498_v56  ;;  %v3436_v63 = vcombine.low %v3319_v13, %v3319_v13  ;;  %v550_v0 = vrot.slane %v3333_v17, 4 }
  0x4f   : > { %v2910_v61 = vpack.i.bf16 %v497_v59, %v500_v60  ;;  %v551_v1 = vrot.slane %v3340_v20, 4  ;;  %v549_v4 = vrot.slane %v3343_v21, 4  ;;  %v552_v7 = vrot.slane %v3346_v22, 4 }
  0x50   : > { %426 = vrot.lane.b32.xlu1 %v3366_v27, %s3154_s10  ;;  %363 = vrot.lane.b32.xlu0 %v356_v28, %s3155_s11  ;;  %v580_v9 = vcombine.low %v3330_v16, %v3330_v16  ;;  %v579_v10 = vcombine.low %v3316_v12, %v3316_v12  ;;  %v599_v14 = vrot.slane %v3343_v21, 3  ;;  %v602_v17 = vrot.slane %v3346_v22, 3 }
  0x51   : > { %v2925_v2 = vpack.i.bf16 %v551_v1, %v550_v0  ;;  %v2930_v8 = vpack.i.bf16 %v549_v4, %v552_v7  ;;  %v3483_v20 = vcombine.low %v3357_v25, %v3357_v25  ;;  %v649_v23 = vrot.slane %v3343_v21, 2 }
  0x52   : > { %v2940_v19 = vpack.i.bf16 %v599_v14, %v602_v17  ;;  %v5335_v26 = vrot.slane %v3346_v22, 2  ;;  %v237_v28 = vcombine.high %v3305_v6, %v3305_v6  ;;  %v679_v30 = vcombine.low %v3403_v53, %v3403_v53 }
  0x54   : > { %422 = vrot.lane.b32.xlu1 %v3357_v25, %s3154_s10  ;;  %2886 = vrot.lane.b32.xlu0 %v2885_v38, %s3157_s13  ;;  %v251_v29 = vrot.slane %v237_v28, %v3300_v5 }
  0x56   : > { %v253_v6 = vcombine.high %v251_v29, %v251_v29  ;;  %v3518_v31 = vrot.slane %v251_v29, %v3300_v5  ;;  %v406_v40 = vcombine.low %v251_v29, %v251_v29 }
  0x58   : > { %2896 = vrot.lane.b32.xlu1 %v2895_v46, %s3157_s13  ;;  %428 = vrot.lane.b32.xlu0 %v3325_v15, %s3154_s10  ;;  %v3522_v32 = vrot.slane %v253_v6, %v3300_v5 }
  0x5a   : > { %5410 = vst [vmem:[#allocation11_spill] sm:$0xff] %v3522_v32  ;;  %v3531_v33 = vshll.u32 %v3522_v32, 16  ;;  %v530_v1 = vcombine.low %v3522_v32, %v3522_v32 }
  0x5c   : > { %2901 = vrot.lane.b32.xlu1 %v2900_v52, %s3158_s14  ;;  %2891 = vrot.lane.b32.xlu0 %v3407_v54, %s3158_s14  ;;  %5411 = vst [vmem:[#allocation12_spill] sm:$0xff] %v3531_v33  ;;  %v380_v35 = vrot.slane %v3531_v33, 7  ;;  %v5333_v44 = vrot.slane %v3531_v33, 6  ;;  %v502_v48 = vrot.slane %v3531_v33, 5  ;;  %v554_v0 = vrot.slane %v3531_v33, 4 }
  0x5d   : > { %v604_v14 = vrot.slane %v3531_v33, 3  ;;  %v5332_v29 = vrot.slane %v3531_v33, 2 }
  0x60   : > { %1003 = vrot.lane.b32.xlu1 %v3412_v55, %s3159_s15  ;;  %1001 = vrot.lane.b32.xlu0 %v3316_v12, %s3159_s15 }
  0x64   : > { %2906 = vrot.lane.b32.xlu1 %v2905_v58, %s3160_s16  ;;  %1005 = vrot.lane.b32.xlu0 %v3354_v24, %s3159_s15  ;;  %v3580_v58 = vcombine.low %v3518_v31, %v3518_v31 }
  0x66   : > { %5413 = vst [vmem:[#allocation14_spill] sm:$0xff] %v3580_v58 }
  0x68   : > { %999 = vrot.lane.b32.xlu1 %v3403_v53, %s3159_s15  ;;  %2911 = vrot.lane.b32.xlu0 %v2910_v61, %s3160_s16 }
  0x6c   : > { %2921 = vrot.lane.b32.xlu1 %v2895_v46, %s3161_s17  ;;  %2916 = vrot.lane.b32.xlu0 %v2885_v38, %s3161_s17 }
  0x70   : > { %535 = vrot.lane.b32.xlu1 %v3313_v11, %s3162_s23  ;;  %533 = vrot.lane.b32.xlu0 %v3436_v63, %s3162_s23 }
  0x74   : > { %1223 = vrot.lane.b32.xlu1 %v3313_v11, %s3163_s25  ;;  %537 = vrot.lane.b32.xlu0 %v3319_v13, %s3162_s23 }
  0x78   : > { %1227 = vrot.lane.b32.xlu1 %v3325_v15, %s3163_s25  ;;  %1225 = vrot.lane.b32.xlu0 %v3366_v27, %s3163_s25  ;;  %v2950_v27 = vpack.i.bf16 %v649_v23, %v5335_v26 }
  0x7c   : > { %2926 = vrot.lane.b32.xlu1 %v2925_v2, %s3164_s26  ;;  %531 = vrot.lane.b32.xlu0 %v3454_v3, %s3162_s23 }
  0x80   : > { %1221 = vrot.lane.b32.xlu1 %v3357_v25, %s3163_s25  ;;  %2931 = vrot.lane.b32.xlu0 %v2930_v8, %s3164_s26 }
  0x84   : > { %585 = vrot.lane.b32.xlu1 %v3316_v12, %s3165_s6  ;;  %583 = vrot.lane.b32.xlu0 %v580_v9, %s3165_s6 }
  0x88   : > { %581 = vrot.lane.b32.xlu1 %v579_v10, %s3165_s6  ;;  %587 = vrot.lane.b32.xlu0 %v3330_v16, %s3165_s6 }
  0x8c   : > { %2941 = vrot.lane.b32.xlu1 %v2940_v19, %s5328_s8  ;;  %2936 = vrot.lane.b32.xlu0 %v3380_v36, %s5328_s8  ;;  %s3170_s8 = smov 100  }
  0x90   : > { %1021 = vrot.lane.b32.xlu1 %v3357_v25, %s5330_s30  ;;  %1019 = vrot.lane.b32.xlu0 %v3454_v3, %s5330_s30 }
  0x94   : > { %1017 = vrot.lane.b32.xlu1 %v3483_v20, %s5330_s30  ;;  %1023 = vrot.lane.b32.xlu0 %v3313_v11, %s5330_s30  ;;  %s3172_s30 = smov 99  }
  0x98   : > { %2951 = vrot.lane.b32.xlu1 %v2950_v27, %s5329_s7  ;;  %2946 = vrot.lane.b32.xlu0 %v3386_v41, %s5329_s7  ;;  %s3171_s7 = smov 95  }
  0x9c   : > { %684 = vrot.lane.b32.xlu1 %v3403_v53, %s3169_s9  ;;  %682 = vrot.lane.b32.xlu0 %v579_v10, %s3169_s9 }
  0xa0   : > { %1241 = vrot.lane.b32.xlu1 %v580_v9, %s3170_s8  ;;  %686 = vrot.lane.b32.xlu0 %v3316_v12, %s3169_s9 }
  0xa4   : > { %1245 = vrot.lane.b32.xlu1 %v3330_v16, %s3170_s8  ;;  %1243 = vrot.lane.b32.xlu0 %v3316_v12, %s3170_s8  ;;  %v3528_v16 = vshll.u32 %v3518_v31, 16 }
  0xa6   : > { %v379_v34 = vrot.slane %v3528_v16, 7  ;;  %v2975_v37 = vpack.i.bf16 %v3531_v33, %v3528_v16  ;;  %v5336_v43 = vrot.slane %v3528_v16, 6  ;;  %v501_v47 = vrot.slane %v3528_v16, 5 }
  0xa7   : > { %v553_v61 = vrot.slane %v3528_v16, 4  ;;  %v5334_v28 = vrot.slane %v3528_v16, 2 }
  0xa8   : > { %2956 = vrot.lane.b32.xlu1 %v3390_v45, %s3171_s7  ;;  %680 = vrot.lane.b32.xlu0 %v679_v30, %s3169_s9  ;;  %v2980_v38 = vpack.i.bf16 %v380_v35, %v379_v34  ;;  %v2990_v52 = vpack.i.bf16 %v502_v48, %v501_v47  ;;  %v702_v47 = vrot.slane %v3528_v16, 1  ;;  %v703_v48 = vrot.slane %v3531_v33, 1 }
  0xa9   : > { %v3000_v7 = vpack.i.bf16 %v554_v0, %v553_v61  ;;  %v3010_v35 = vpack.i.bf16 %v5332_v29, %v5334_v28 }
  0xaa   : > { %v3015_v61 = vpack.i.bf16 %v703_v48, %v702_v47 }
  0xac   : > { %1239 = vrot.lane.b32.xlu1 %v579_v10, %s3170_s8  ;;  %2961 = vrot.lane.b32.xlu0 %v3396_v49, %s3171_s7  ;;  %v2985_v49 = vpack.i.bf16 %v5333_v44, %v5336_v43  ;;  %v603_v10 = vrot.slane %v3528_v16, 3 }
  0xae   : > { %v3005_v30 = vpack.i.bf16 %v604_v14, %v603_v10 }
  0xb0   : > { %2971 = vrot.lane.b32.xlu1 %v2940_v19, %s3172_s30  ;;  %2966 = vrot.lane.b32.xlu0 %v3380_v36, %s3172_s30  ;;  %v420_v36 = vrot.slane %v406_v40, %v3300_v5 }
  0xb2   : > { %v3616_v27 = vcombine.low %v420_v36, %v420_v36 }
  0xb4   : > { %365 = vrot.lane.b32.xlu1 %v3313_v11, %s3155_s11  ;;  %2976 = vrot.lane.b32.xlu0 %v2975_v37, %s3156_s12  ;;  %v3543_v39 = vpop.permute.xlu0 %424 }
  0xb6   : > { %v3545_v42 = vpop.permute.xlu1 %357 }
  0xb8   : > { %2981 = vrot.lane.b32.xlu1 %v2980_v38, %s3157_s13  ;;  %367 = vrot.lane.b32.xlu0 %v3319_v13, %s3155_s11  ;;  %s5419_s13 = smov 108  }
  0xba   : > { %v3553_v45 = vpop.permute.xlu1 %359  ;;  %v3555_v46 = vpop.permute.xlu0 %2876 }
  0xbc   : > { %432 = vrot.lane.b32.xlu1 %v3518_v31, %s3154_s10  ;;  %430 = vrot.lane.b32.xlu0 %v420_v36, %s3154_s10  ;;  %s5418_s10 = smov 98  }
  0xbe   : > { %v3566_v50 = vpop.permute.xlu1 %361  ;;  %v3568_v51 = vpop.permute.xlu0 %2881 }
  0xbf   : > { %v5340_v48 = vunpack.i.l.bf16 %v3568_v51 }
  0xc0   : > { %1007 = vrot.lane.b32.xlu1 %v3357_v25, %s3159_s15  ;;  %2986 = vrot.lane.b32.xlu0 %v2985_v49, %s3158_s14  ;;  %s5420_s14 = smov 97  }
  0xc2   : > { %v3573_v56 = vpop.permute.xlu1 %426  ;;  %v3575_v57 = vpop.permute.xlu0 %363 }
  0xc3   : > { %5412 = vst [vmem:[#allocation13_spill] sm:$0xff] %v3575_v57 }
  0xc4   : > { %2991 = vrot.lane.b32.xlu1 %v2990_v52, %s3160_s16  ;;  %1009 = vrot.lane.b32.xlu0 %v3313_v11, %s3159_s15  ;;  %s3173_s15 = smov 123  }
  0xc6   : > { %v3584_v59 = vpop.permute.xlu1 %422  ;;  %v3586_v60 = vpop.permute.xlu0 %2886 }
  0xc8   : > { %539 = vrot.lane.b32.xlu1 %v3580_v58, %s3162_s23  ;;  %2996 = vrot.lane.b32.xlu0 %v2980_v38, %s3161_s17  ;;  %s3174_s17 = smov 122  }
  0xca   : > { %v3595_v2 = vpop.permute.xlu1 %2896  ;;  %v3597_v4 = vpop.permute.xlu0 %428 }
  0xcb   : > { %5414 = vst [vmem:[#allocation15_spill] sm:$0xff] %v3595_v2  ;;  %5415 = vst [vmem:[#allocation16_spill] sm:$0xff] %v3597_v4  ;;  %v2899_v43 = vunpack.i.h.bf16 %v3595_v2  ;;  %v5429_v33 = vunpack.i.l.bf16 %v3595_v2 }
  0xcc   : > { %1229 = vrot.lane.b32.xlu1 %v420_v36, %s3163_s25  ;;  %541 = vrot.lane.b32.xlu0 %v530_v1, %s3162_s23 }
  0xce   : > { %v3601_v8 = vpop.permute.xlu1 %2901  ;;  %v3603_v9 = vpop.permute.xlu0 %2891 }
  0xcf   : > { %5416 = vst [vmem:[#allocation17_spill] sm:$0xff] %v3601_v8  ;;  %v2904_v32 = vunpack.i.h.bf16 %v3601_v8 }
  0xd0   : > { %3001 = vrot.lane.b32.xlu1 %v3000_v7, %s3164_s26  ;;  %1231 = vrot.lane.b32.xlu0 %v3518_v31, %s3163_s25  ;;  %s3175_s25 = smov 107  }
  0xd2   : > { %v3610_v17 = vpop.permute.xlu1 %1003  ;;  %v3612_v19 = vpop.permute.xlu0 %1001 }
  0xd4   : > { %591 = vrot.lane.b32.xlu1 %v3436_v63, %s3165_s6  ;;  %589 = vrot.lane.b32.xlu0 %v3454_v3, %s3165_s6  ;;  %s3176_s6 = smov 106  }
  0xd6   : > { %v3622_v6 = vpop.permute.xlu1 %2906  ;;  %v3624_v34 = vpop.permute.xlu0 %1005 }
  0xd7   : > { %5417 = vst [vmem:[#allocation18_spill] sm:$0xff] %v3624_v34 }
  0xd8   : > { %1025 = vrot.lane.b32.xlu1 %v3616_v27, %s5418_s10  ;;  %3006 = vrot.lane.b32.xlu0 %v3005_v30, %s5419_s13  ;;  %s3180_s13 = smov 26  }
  0xda   : > { %v3633_v37 = vpop.permute.xlu1 %999  ;;  %v3635_v38 = vpop.permute.xlu0 %2911 }
  0xdc   : > { %3011 = vrot.lane.b32.xlu1 %v3010_v35, %s5420_s14  ;;  %1027 = vrot.lane.b32.xlu0 %v3580_v58, %s5418_s10  ;;  %s3178_s10 = smov 60  }
  0xde   : > { %v3640_v40 = vpop.permute.xlu1 %2921  ;;  %v3642_v36 = vpop.permute.xlu0 %2916 }
  0xdf   : > { %5421 = vst [vmem:[#allocation19_spill] sm:$0xff] %v3640_v40 }
  0xe0   : > { %690 = vrot.lane.b32.xlu1 %v3454_v3, %s3169_s9  ;;  %688 = vrot.lane.b32.xlu0 %v3483_v20, %s3169_s9 }
  0xe2   : > { %v3650_v49 = vpop.permute.xlu1 %535  ;;  %v3652_v52 = vpop.permute.xlu0 %533 }
  0xe4   : > { %1249 = vrot.lane.b32.xlu1 %v3436_v63, %s3170_s8  ;;  %1247 = vrot.lane.b32.xlu0 %v3454_v3, %s3170_s8  ;;  %s3177_s8 = smov 94  }
  0xe6   : > { %v3658_v0 = vpop.permute.xlu1 %1223  ;;  %v3660_v1 = vpop.permute.xlu0 %537 }
  0xe8   : > { %3021 = vrot.lane.b32.xlu1 %v3005_v30, %s3172_s30  ;;  %3016 = vrot.lane.b32.xlu0 %v3015_v61, %s3171_s7  ;;  %v2889_v61 = vunpack.i.h.bf16 %v3586_v60 }
  0xea   : > { %v3664_v7 = vpop.permute.xlu1 %1227  ;;  %v3666_v10 = vpop.permute.xlu0 %1225 }
  0xeb   : > { %5422 = vst [vmem:[#allocation20_spill] sm:$0xff] %v3664_v7 }
  0xec   : > { %3031 = vrot.lane.b32.xlu1 %v3430_v62, %s3173_s15  ;;  %3026 = vrot.lane.b32.xlu0 %v3407_v54, %s3173_s15  ;;  %v2879_v62 = vunpack.i.h.bf16 %v3555_v46 }
  0xee   : > { %v3672_v63 = vpop.permute.xlu1 %2926  ;;  %v3674_v14 = vpop.permute.xlu0 %531  ;;  %v323_v21 = vsel %vm5339_vm0, %v2879_v62, %v5340_v48 }
  0xf0   : > { %483 = vrot.lane.b32.xlu1 %v3412_v55, %s3174_s17  ;;  %481 = vrot.lane.b32.xlu0 %v3316_v12, %s3174_s17  ;;  %v2878_v55 = vunpack.i.l.bf16 %v3555_v46  ;;  %v2884_v12 = vunpack.i.h.bf16 %v3568_v51 }
  0xf2   : > { %v3680_v30 = vpop.permute.xlu1 %1221  ;;  %v3682_v35 = vpop.permute.xlu0 %2931  ;;  %v321_v28 = vsel %vm5339_vm0, %v2884_v12, %v2878_v55  ;;  %v2893_v12 = vunpack.i.l.bf16 %v3603_v9 }
  0xf3   : > { %5423 = vst [vmem:[#allocation21_spill] sm:$0xff] %v3682_v35  ;;  %v731_v48 = vsel %vm3703_vm3, %v3313_v11, %v321_v28  ;;  %v396_v28 = vsel %vm5348_vm4, %v2889_v61, %v5429_v33  ;;  %v2919_v33 = vunpack.i.h.bf16 %v3642_v36 }
  0xf4   : > { %633 = vrot.lane.b32.xlu1 %v3454_v3, %s3175_s25  ;;  %479 = vrot.lane.b32.xlu0 %v3403_v53, %s3174_s17  ;;  %v322_v3 = vsel %vm5339_vm0, %v2878_v55, %v2879_v62  ;;  %v2894_v55 = vunpack.i.h.bf16 %v3603_v9  ;;  %vm5366_vm0 = vcmask 941056   ;;  %v733_v9 = vsel %vm3703_vm3, %v3325_v15, %v323_v21 }
  0xf5   : > { %v732_v44 = vsel %vm3703_vm3, %v3319_v13, %v322_v3  ;;  %v372_v3 = vsel %vm5349_vm7, %v3566_v50, %v3575_v57  ;;  %v370_v21 = vsel %vm5349_vm7, %v3545_v42, %v3553_v45  ;;  %v436_v42 = vsel %vm5352_vm8, %v3543_v39, %v3573_v56 }
  0xf6   : > { %v3688_v54 = vpop.permute.xlu1 %585  ;;  %v3692_v47 = vpop.permute.xlu0 %583 }
  0xf8   : > { %631 = vrot.lane.b32.xlu1 %v3483_v20, %s3175_s25  ;;  %635 = vrot.lane.b32.xlu0 %v3357_v25, %s3175_s25  ;;  %v2888_v20 = vunpack.i.l.bf16 %v3586_v60  ;;  %v371_v60 = vsel %vm5349_vm7, %v3553_v45, %v3566_v50  ;;  %v748_v45 = vsel %vm5350_vm1, %v733_v9, %v372_v3  ;;  %v435_v50 = vsel %vm5352_vm8, %v3584_v59, %v3543_v39 }
  0xf9   : > { %v3742_v62 = vsel %vm5350_vm1, %v732_v44, %v371_v60  ;;  %v437_v39 = vsel %vm5352_vm8, %v3573_v56, %v3597_v4  ;;  %v3805_v59 = vsel %vm5351_vm9, %v2904_v32, %v2893_v12  ;;  %v1013_v56 = vsel %vm5363_vm13, %v3612_v19, %v3610_v17 }
  0xfa   : > { %v3699_v53 = vpop.permute.xlu1 %581  ;;  %v3710_v29 = vpop.permute.xlu0 %587  ;;  %v394_v58 = vsel %vm5348_vm4, %v2899_v43, %v2888_v20  ;;  %v2909_v32 = vunpack.i.h.bf16 %v3622_v6  ;;  %v1014_v4 = vsel %vm5363_vm13, %v3610_v17, %v3624_v34  ;;  %vm1047_vm7 = vcmask 793600  }
  0xfb   : > { %5426 = vst [vmem:[#allocation22_spill] sm:$0xff] %v3710_v29  ;;  %v2928_v34 = vunpack.i.l.bf16 %v3672_v63 }
  0xfc   : > { %655 = vrot.lane.b32.xlu1 %v649_v23, %s3176_s6  ;;  %3036 = vrot.lane.b32.xlu0 %v3386_v41, %s3176_s6  ;;  %v395_v23 = vsel %vm5348_vm4, %v2888_v20, %v2889_v61  ;;  %v2918_v61 = vunpack.i.l.bf16 %v3642_v36  ;;  %v3781_v20 = vsel %vm5350_vm1, %v731_v48, %v370_v21  ;;  %v767_v36 = vsel %vm3730_vm11, %v748_v45, %v396_v28 }
  0xfd   : > { %v766_v44 = vsel %vm3730_vm11, %v3742_v62, %v395_v23  ;;  %v3770_v23 = vsel %vm5351_vm9, %v2893_v12, %v2894_v55  ;;  %v765_v2 = vsel %vm3730_vm11, %v3781_v20, %v394_v58  ;;  %v5433_v58 = vunpack.i.l.bf16 %v3601_v8 }
  0xfe   : > { %v3724_v26 = vpop.permute.xlu1 %2941  ;;  %v3737_v5 = vpop.permute.xlu0 %2936  ;;  %v3796_v48 = vsel %vm5370_vm5, %v766_v44, %v436_v42  ;;  %v2908_v12 = vunpack.i.l.bf16 %v3622_v6  ;;  %v1211_v42 = vsel %vm5364_vm15, %v2918_v61, %v2919_v33  ;;  %v1235_v21 = vsel %vm5366_vm0, %v3658_v0, %v3666_v10 }
  0xff   : > { %5432 = vst [vmem:[#allocation23_spill] sm:$0xff] %v3796_v48  ;;  %v3810_v9 = vsel %vm5351_vm9, %v2894_v55, %v5433_v58  ;;  %v1060_v44 = vsel %vm3774_vm6, %v3796_v48, %v3770_v23  ;;  %v3825_v55 = vsel %vm5370_vm5, %v767_v36, %v437_v39  ;;  %v3828_v58 = vsel %vm5370_vm5, %v765_v2, %v435_v50 }
 0x100   : > { %5434 = vst [vmem:[#allocation24_spill] sm:$0xff] %v3825_v55  ;;  %5435 = vst [vmem:[#allocation25_spill] sm:$0xff] %v3828_v58  ;;  %v1061_v6 = vsel %vm3774_vm6, %v3825_v55, %v3810_v9  ;;  %v1059_v48 = vsel %vm3774_vm6, %v3828_v58, %v3805_v59  ;;  %v2924_v36 = vunpack.i.h.bf16 %v3640_v40  ;;  %v5436_v2 = vunpack.i.l.bf16 %v3640_v40 }
 0x101   : > { %v1071_v8 = vsel %vm5376_vm10, %v1060_v44, %v1013_v56  ;;  %v1282_v55 = vsel %vm3730_vm11, %v3742_v62, %v1211_v42  ;;  %v1236_v58 = vsel %vm5366_vm0, %v3666_v10, %v3664_v7  ;;  %v2914_v44 = vunpack.i.h.bf16 %v3635_v38 }
 0x102   : > { %v3756_v60 = vpop.permute.xlu1 %1021  ;;  %v3764_v57 = vpop.permute.xlu0 %1019  ;;  %v1212_v50 = vsel %vm5364_vm15, %v2919_v33, %v5436_v2  ;;  %v3860_v33 = vsel %vm5365_vm14, %v2908_v12, %v2909_v32  ;;  %vm5438_vm1 = vsmask.f32 3328  ;;  %vm5439_vm9 = vcmask 1043456  }
 0x103   : > { %5437 = vst [vmem:[#allocation26_spill] sm:$0xff] %v3860_v33  ;;  %vm3866_vm4 = vmand %vm5439_vm9, %vm5438_vm1  ;;  %v1293_v62 = vsel %vm5370_vm5, %v1282_v55, %v1235_v21  ;;  %v3874_v10 = vsel %vm5363_vm13, %v3633_v37, %v3612_v19  ;;  %v1283_v42 = vsel %vm3730_vm11, %v748_v45, %v1212_v50  ;;  %v2929_v2 = vunpack.i.h.bf16 %v3672_v63 }
 0x104   : > { %v1075_v7 = vsel %vm5376_vm10, %v1061_v6, %v1014_v4  ;;  %v1210_v18 = vsel %vm5364_vm15, %v2924_v36, %v2918_v61  ;;  %v3885_v21 = vsel %vm5369_vm2, %v3652_v52, %v3650_v49  ;;  %v1297_v55 = vsel %vm5370_vm5, %v1283_v42, %v1236_v58  ;;  %vm5445_vm15 = vmmov %vm5439_vm9 }
 0x105   : > { %5442 = vst [vmem:[#allocation27_spill] sm:$0xff] %v3885_v21  ;;  %v1090_v37 = vsel %vm3866_vm4, %v1071_v8, %v3860_v33  ;;  %v1312_v63 = vsel %vm3774_vm6, %v1293_v62, %v3770_v23  ;;  %v5367_v45 = vunpack.i.h.bf16 %v3737_v5  ;;  %v5368_v61 = vunpack.i.l.bf16 %v3737_v5 }
 0x106   : > { %v3799_v3 = vpop.permute.xlu1 %1017  ;;  %v3816_v28 = vpop.permute.xlu0 %1023  ;;  %v3901_v36 = vsel %vm5365_vm14, %v2914_v44, %v2908_v12  ;;  %v5443_v58 = vunpack.i.l.bf16 %v3635_v38  ;;  %v1067_v8 = vsel %vm5376_vm10, %v1059_v48, %v3874_v10  ;;  %v1234_v23 = vsel %vm5366_vm0, %v3680_v30, %v3658_v0 }
 0x107   : > { %vm967_vm13 = vsmask.f32 7424  ;;  %v1099_v62 = vsel %vm5445_vm15, %v1090_v37, %v3885_v21  ;;  %v1313_v12 = vsel %vm3774_vm6, %v1297_v55, %v3810_v9  ;;  %vm5446_vm1 = vcmask 900096  }
 0x108   : > { %v3906_v50 = vsel %vm5365_vm14, %v2909_v32, %v5443_v58  ;;  %v3919_v44 = vsel %vm5446_vm1, %v2928_v34, %v2929_v2  ;;  %v1281_v48 = vsel %vm3730_vm11, %v3781_v20, %v1210_v18  ;;  %vm5447_vm14 = vsmask.f32 4352 }
 0x109   : > { %5444 = vst [vmem:[#allocation28_spill] sm:$0xff] %v3906_v50  ;;  %vm3926_vm8 = vmand %vm5448_vm12, %vm5447_vm14  ;;  %v3933_v30 = vsel %vm5369_vm2, %v3650_v49, %v3660_v1  ;;  %v1321_v9 = vsel %vm5376_vm10, %v1312_v63, %v1013_v56  ;;  %v5371_v32 = vunpack.i.l.bf16 %v3682_v35  ;;  %vm5452_vm15 = vcmask 891904  }
 0x10a   : > { %v3845_v39 = vpop.permute.xlu1 %2951  ;;  %v3857_v40 = vpop.permute.xlu0 %2946  ;;  %5451 = vst [vmem:[#allocation29_spill] sm:$0xff] %v3933_v30  ;;  %v3940_v42 = vsel %vm5452_vm15, %v3692_v47, %v3688_v54  ;;  %vm5396_vm14 = vcmask 777216   ;;  %v1289_v20 = vsel %vm5370_vm5, %v1281_v48, %v1234_v23  ;;  %vm5454_vm12 = vcmask 883712  }
 0x10b   : > { %5453 = vst [vmem:[#allocation30_spill] sm:$0xff] %v3940_v42  ;;  %v3950_v49 = vsel %vm5454_vm12, %v5368_v61, %v5367_v45  ;;  %vm5456_vm1 = vsmask.f32 5376  ;;  %vm5457_vm0 = vcmask 1045504   ;;  %v2949_v55 = vunpack.i.h.bf16 %v3857_v40 }
 0x10c   : > { %5455 = vst [vmem:[#allocation31_spill] sm:$0xff] %v3950_v49  ;;  %vm3954_vm9 = vmand %vm5457_vm0, %vm5456_vm1  ;;  %v2948_v37 = vunpack.i.l.bf16 %v3857_v40  ;;  %v1324_v58 = vsel %vm5376_vm10, %v1313_v12, %v1014_v4  ;;  %v3966_v23 = vsel %vm5369_vm2, %v3674_v14, %v3652_v52  ;;  %v2934_v48 = vunpack.i.h.bf16 %v3682_v35 }
 0x10d   : > { %v1114_v45 = vsel %vm3926_vm8, %v1099_v62, %v3919_v44  ;;  %v1091_v61 = vsel %vm3866_vm4, %v1075_v7, %v3906_v50  ;;  %v1089_v40 = vsel %vm3866_vm4, %v1067_v8, %v3901_v36  ;;  %vm5460_vm0 = vcmask 1044480  }
 0x10e   : > { %v3888_v19 = vpop.permute.xlu1 %684  ;;  %v3898_v6 = vpop.permute.xlu0 %682  ;;  %v1123_v4 = vsel %vm5460_vm0, %v1114_v45, %v3940_v42  ;;  %v1336_v52 = vsel %vm3866_vm4, %v1321_v9, %v3860_v33  ;;  %vm5461_vm15 = vcmask 900096   ;;  %v1311_v7 = vsel %vm3774_vm6, %v1289_v20, %v3805_v59 }
 0x10f   : > { %v3986_v14 = vsel %vm5461_vm15, %v2929_v2, %v5371_v32  ;;  %vm5463_vm12 = vcmask 801792   ;;  %v1138_v45 = vsel %vm3954_vm9, %v1123_v4, %v3950_v49  ;;  %vm5464_vm1 = vcmask 1043456  }
 0x110   : > { %5462 = vst [vmem:[#allocation32_spill] sm:$0xff] %v3986_v14  ;;  %v3994_v8 = vsel %vm5463_vm12, %v3764_v57, %v3756_v60  ;;  %v1102_v12 = vsel %vm5464_vm1, %v1091_v61, %v3933_v30  ;;  %vm5465_vm0 = vmmov %vm5464_vm1  ;;  %v4006_v9 = vsel %vm1047_vm7, %v2948_v37, %v2949_v55  ;;  %v1337_v20 = vsel %vm3866_vm4, %v1324_v58, %v3906_v50 }
 0x111   : > { %v1096_v2 = vsel %vm5465_vm0, %v1089_v40, %v3966_v23  ;;  %vm5466_vm12 = vsmask.f32 6400  ;;  %vm5467_vm2 = vcmask 1046528   ;;  %vm5470_vm1 = vmmov %vm5461_vm15  ;;  %v2944_v40 = vunpack.i.h.bf16 %v3724_v26 }
 0x112   : > { %v3942_v18 = vpop.permute.xlu1 %1241  ;;  %v3960_v63 = vpop.permute.xlu0 %686  ;;  %vm4015_vm5 = vmand %vm5467_vm2, %vm5466_vm12  ;;  %v4020_v61 = vsel %vm5470_vm1, %v2934_v48, %v2928_v34  ;;  %v4026_v49 = vsel %vm5465_vm0, %v1336_v52, %v3885_v21  ;;  %v1318_v58 = vsel %vm5376_vm10, %v1311_v7, %v3874_v10  ;;  %v1115_v50 = vsel %vm3926_vm8, %v1102_v12, %v3986_v14 }
 0x113   : > { %vm5471_vm2 = vcmask 891904   ;;  %vm5473_vm12 = vcmask 1045504   ;;  %v2954_v32 = vunpack.i.h.bf16 %v3845_v39  ;;  %vm5474_vm1 = vcmask 785408  }
 0x114   : > { %v4036_v34 = vsel %vm5471_vm2, %v3699_v53, %v3692_v47  ;;  %v1149_v48 = vsel %vm5473_vm12, %v1138_v45, %v3994_v8  ;;  %v4045_v10 = vsel %vm5474_vm1, %v3898_v6, %v3888_v19  ;;  %vm5475_vm0 = vmmov %vm5471_vm2  ;;  %v1113_v53 = vsel %vm3926_vm8, %v1096_v2, %v4020_v61 }
 0x115   : > { %5472 = vst [vmem:[#allocation33_spill] sm:$0xff] %v4036_v34  ;;  %v1168_v12 = vsel %vm4015_vm5, %v1149_v48, %v4006_v9  ;;  %v4053_v47 = vsel %vm5475_vm0, %v3688_v54, %v3710_v29  ;;  %vm5477_vm2 = vcmask 1047552   ;;  %vm1269_vm1 = vcmask 809984  }
 0x116   : > { %v3999_v62 = vpop.permute.xlu1 %1245  ;;  %v4008_v59 = vpop.permute.xlu0 %1243  ;;  %5476 = vst [vmem:[#allocation34_spill] sm:$0xff] %v4053_v47  ;;  %vm4060_vm12 = vmand %vm5477_vm2, %vm967_vm13  ;;  %vm5480_vm10 = vcmask 1044480   ;;  %v5481_v54 = vunpack.i.l.bf16 %v3737_v5  ;;  %vm5482_vm0 = vcmask 883712   ;;  %v5483_v2 = vunpack.i.l.bf16 %v3724_v26 }
 0x117   : > { %v1120_v48 = vsel %vm5480_vm10, %v1113_v53, %v4036_v34  ;;  %v5484_v29 = vunpack.i.h.bf16 %v3737_v5  ;;  %vm5485_vm15 = vmmov %vm5482_vm0  ;;  %v1335_v35 = vsel %vm3866_vm4, %v1318_v58, %v3901_v36  ;;  %vm5487_vm13 = vcmask 801792  }
 0x118   : > { %v4069_v33 = vsel %vm5482_vm0, %v2944_v40, %v5481_v54  ;;  %v4084_v53 = vsel %vm5487_vm13, %v3756_v60, %v3816_v28  ;;  %vm5488_vm10 = vmmov %vm5487_vm13  ;;  %vm5490_vm2 = vcmask 1046528   ;;  %v4097_v58 = vsel %vm1047_vm7, %v2954_v32, %v2948_v37 }
 0x119   : > { %v1030_v40 = vsel %vm5488_vm10, %v3799_v3, %v3764_v57  ;;  %v1177_v5 = vsel %vm5490_vm2, %v1168_v12, %v4045_v10  ;;  %vm5493_vm0 = vcmask 785408   ;;  %vm5495_vm13 = vcmask 1043456  }
 0x11a   : > { %v2957_v7 = vpop.permute.xlu1 %2956  ;;  %v681_v45 = vpop.permute.xlu0 %680  ;;  %v4116_v32 = vsel %vm5493_vm0, %v3888_v19, %v3960_v63  ;;  %vm5496_vm10 = vcmask 1045504   ;;  %v1360_v19 = vsel %vm3926_vm8, %v4026_v49, %v3919_v44  ;;  %vm5499_vm0 = vcmask 818176  }
 0x11b   : > { %v2959_v52 = vunpack.i.h.bf16 %v2957_v7  ;;  %v2958_v42 = vunpack.i.l.bf16 %v2957_v7  ;;  %v4076_v7 = vsel %vm5485_vm15, %v5484_v29, %v5483_v2  ;;  %vm5491_vm15 = vcmask 1044480   ;;  %5494 = vst [vmem:[#allocation37_spill] sm:$0xff] %v4116_v32  ;;  %vm5497_vm2 = vmmov %vm5496_vm10 }
 0x11c   : > { %5486 = vst [vmem:[#allocation35_spill] sm:$0xff] %v4076_v7  ;;  %v1126_v29 = vsel %vm5491_vm15, %v1115_v50, %v4053_v47  ;;  %v5492_v2 = vunpack.i.l.bf16 %v3845_v39  ;;  %v1137_v50 = vsel %vm3954_vm9, %v1120_v48, %v4069_v33  ;;  %vm5498_vm15 = vmmov %vm5495_vm13 }
 0x11d   : > { %v4090_v54 = vsel %vm5396_vm14, %v2958_v42, %v2959_v52  ;;  %v1139_v3 = vsel %vm3954_vm9, %v1126_v29, %v4076_v7 }
 0x11e   : > { %5489 = vst [vmem:[#allocation36_spill] sm:$0xff] %v4090_v54  ;;  %v4102_v60 = vsel %vm1047_vm7, %v2949_v55, %v5492_v2  ;;  %v1240_v34 = vpop.permute.xlu1 %1239  ;;  %v1192_v57 = vsel %vm4060_vm12, %v1177_v5, %v4090_v54  ;;  %v1348_v55 = vsel %vm5495_vm13, %v1337_v20, %v3933_v30  ;;  %v4120_v37 = vpop.permute.xlu0 %2961  ;;  %v1153_v12 = vsel %vm5496_vm10, %v1139_v3, %v4084_v53 }
 0x11f   : > { %1451 = vrot.lane.b32.xlu0 %v1192_v57, %s3177_s8  ;;  %v1145_v5 = vsel %vm5497_vm2, %v1137_v50, %v1030_v40  ;;  %v2964_v48 = vunpack.i.h.bf16 %v4120_v37  ;;  %v5384_v29 = vunpack.i.l.bf16 %v4120_v37  ;;  %v1342_v20 = vsel %vm5498_vm15, %v1335_v35, %v3966_v23  ;;  %vm5504_vm2 = vmmov %vm5499_vm0 }
 0x120   : > { %v1169_v2 = vsel %vm4015_vm5, %v1153_v12, %v4102_v60  ;;  %v1167_v57 = vsel %vm4015_vm5, %v1145_v5, %v4097_v58  ;;  %v1253_v3 = vsel %vm5499_vm0, %v3942_v18, %v4008_v59  ;;  %vm5500_vm13 = vcmask 785408   ;;  %vm5506_vm15 = vmmov %vm5499_vm0 }
 0x121   : > { %v4145_v50 = vsel %vm5500_vm13, %v681_v45, %v3898_v6  ;;  %v4152_v35 = vsel %vm5396_vm14, %v2959_v52, %v5384_v29  ;;  %vm5503_vm10 = vcmask 1046528   ;;  %v1252_v5 = vsel %vm5504_vm2, %v1240_v34, %v3942_v18 }
 0x122   : > { %5501 = vst [vmem:[#allocation38_spill] sm:$0xff] %v4145_v50  ;;  %v4147_v49 = vpop.permute.xlu1 %2971  ;;  %5502 = vst [vmem:[#allocation39_spill] sm:$0xff] %v4152_v35  ;;  %v1180_v12 = vsel %vm5503_vm10, %v1169_v2, %v4116_v32  ;;  %v2967_v7 = vpop.permute.xlu0 %2966  ;;  %v5505_v6 = vrot.slane %v3528_v16, 6  ;;  %v1254_v45 = vsel %vm5506_vm15, %v4008_v59, %v3999_v62  ;;  %v4171_v18 = vsel %vm5396_vm14, %v2964_v48, %v2958_v42 }
 0x123   : > { %v2974_v47 = vunpack.i.h.bf16 %v4147_v49  ;;  %v5387_v30 = vunpack.i.l.bf16 %v4147_v49  ;;  %v1193_v52 = vsel %vm4060_vm12, %v1180_v12, %v4152_v35  ;;  %v2969_v2 = vunpack.i.h.bf16 %v2967_v7  ;;  %5507 = vst [vmem:[#allocation40_spill] sm:$0xff] %v4171_v18  ;;  %vm5509_vm13 = vmmov %vm5503_vm10 }
 0x124   : > { %454 = vrot.lane.b32.xlu0 %v5505_v6, %s3173_s15  ;;  %v2968_v29 = vunpack.i.l.bf16 %v2967_v7  ;;  %1453 = vrot.lane.b32.xlu1 %v1193_v52, %s3177_s8  ;;  %vm5508_vm0 = vcmask 1044480   ;;  %v1361_v6 = vsel %vm3926_vm8, %v1348_v55, %v3986_v14  ;;  %v1359_v12 = vsel %vm3926_vm8, %v1342_v20, %v4020_v61 }
 0x125   : > { %v1371_v34 = vsel %vm5508_vm0, %v1360_v19, %v1253_v3  ;;  %v1174_v59 = vsel %vm5509_vm13, %v1167_v57, %v4145_v50  ;;  %vm5510_vm10 = vmmov %vm5508_vm0  ;;  %v1272_v48 = vsel %vm1269_vm1, %v2969_v2, %v5387_v30  ;;  %vm5512_vm15 = vcmask 1045504  }
 0x126   : > { %v1367_v7 = vsel %vm5510_vm10, %v1359_v12, %v1252_v5  ;;  %v1271_v52 = vsel %vm1269_vm1, %v2968_v29, %v2969_v2  ;;  %v1270_v42 = vsel %vm1269_vm1, %v2974_v47, %v2968_v29  ;;  %v366_v19 = vpop.permute.xlu1 %365  ;;  %vm5511_vm2 = vmmov %vm5508_vm0  ;;  %v4193_v57 = vpop.permute.xlu0 %2976  ;;  %v1191_v47 = vsel %vm4060_vm12, %v1174_v59, %v4171_v18 }
 0x127   : > { %v1375_v55 = vsel %vm5511_vm2, %v1361_v6, %v1254_v45  ;;  %v1390_v3 = vsel %vm3954_vm9, %v1371_v34, %v1271_v52  ;;  %v1389_v20 = vsel %vm3954_vm9, %v1367_v7, %v1270_v42  ;;  %vm5513_vm0 = vmmov %vm5512_vm15  ;;  %v5385_v42 = vmov 0  }
 0x128   : > { %485 = vrot.lane.b32.xlu0 %v3354_v24, %s3174_s17  ;;  %v1391_v29 = vsel %vm3954_vm9, %v1375_v55, %v1272_v48  ;;  %1449 = vrot.lane.b32.xlu1 %v1191_v47, %s3177_s8  ;;  %v1399_v5 = vsel %vm5512_vm15, %v1390_v3, %v3994_v8  ;;  %v1396_v45 = vsel %vm5513_vm0, %v1389_v20, %v1030_v40  ;;  %vm5514_vm10 = vmmov %vm5513_vm0  ;;  %v5389_v55 = vunpack.i.h.bf16 %v4193_v57 }
 0x129   : > { %v1414_v2 = vsel %vm4015_vm5, %v1399_v5, %v4006_v9  ;;  %v1413_v12 = vsel %vm4015_vm5, %v1396_v45, %v4097_v58  ;;  %v1402_v8 = vsel %vm5514_vm10, %v1391_v29, %v4084_v53  ;;  %vm5515_vm2 = vmmov %vm5509_vm13  ;;  %1584 = vmatprep.mubr.bf16.mxu0 %v5385_v42  ;;  %v2978_v3 = vunpack.i.l.bf16 %v4193_v57 }
 0x12a   : > { %v4209_v34 = vpop.permute.xlu1 %2981  ;;  %v1423_v24 = vsel %vm5509_vm13, %v1414_v2, %v4045_v10  ;;  %v4213_v6 = vpop.permute.xlu0 %367  ;;  %v1420_v59 = vsel %vm5515_vm2, %v1413_v12, %v4145_v50  ;;  %v1415_v58 = vsel %vm4015_vm5, %v1402_v8, %v4102_v60  ;;  %vm5516_vm15 = vmmov %vm5515_vm2  ;;  %vm5517_vm0 = vcmask 1039360  }
 0x12b   : > { %v1438_v40 = vsel %vm4060_vm12, %v1423_v24, %v4090_v54  ;;  %v1426_v7 = vsel %vm5516_vm15, %v1415_v58, %v4116_v32  ;;  %v325_v29 = vsel %vm5517_vm0, %v2978_v3, %v5389_v55  ;;  %v5518_v5 = vrot.slane %v3346_v22, 2  ;;  %vm5521_vm13 = vmmov %vm5517_vm0 }
 0x12c   : > { %487 = vrot.lane.b32.xlu1 %v3357_v25, %s3174_s17  ;;  %1481 = vrot.lane.b32.xlu0 %v1438_v40, %s3178_s10  ;;  %v1437_v25 = vsel %vm4060_vm12, %v1420_v59, %v4171_v18  ;;  %v1439_v52 = vsel %vm4060_vm12, %v1426_v7, %v4152_v35  ;;  %v2983_v12 = vunpack.i.l.bf16 %v4209_v34  ;;  %vm5522_vm10 = vcmask 1031168   ;;  %v5524_v7 = vld [vmem:[#allocation13_spill] sm:$0xff] }
 0x12d   : > { %v374_v40 = vsel %vm5522_vm10, %v366_v19, %v4213_v6  ;;  %v735_v59 = vsel %vm3703_vm3, %v3518_v31, %v325_v29  ;;  %v5388_v22 = vunpack.i.h.bf16 %v4209_v34  ;;  %vm5525_vm2 = vmmov %vm5522_vm10  ;;  %vm5526_vm15 = vcmask 1040384  }
 0x12e   : > { %v4226_v9 = vpop.permute.xlu1 %432  ;;  %v431_v53 = vpop.permute.xlu0 %430  ;;  %vm5529_vm0 = vcmask 1022976   ;;  %vm5531_vm10 = vmmov %vm5526_vm15  ;;  %vm5559_vm14 = vcmask 1042432  }
 0x130   : > { %1479 = vrot.lane.b32.xlu0 %v1437_v25, %s3178_s10  ;;  %1483 = vrot.lane.b32.xlu1 %v1439_v52, %s3178_s10  ;;  %v373_v25 = vsel %vm5525_vm2, %v5524_v7, %v366_v19  ;;  %v756_v52 = vsel %vm5526_vm15, %v735_v59, %v374_v40  ;;  %v5532_v19 = vld [vmem:[#allocation16_spill] sm:$0xff]  ;;  %vm5533_vm2 = vcmask 1014784  }
 0x131   : > { %v438_v40 = vsel %vm5533_vm2, %v5532_v19, %v431_v53  ;;  %vm5534_vm15 = vmmov %vm5533_vm2 }
 0x132   : > { %v4244_v60 = vpop.permute.xlu1 %1007  ;;  %v2987_v48 = vpop.permute.xlu0 %2986 }
 0x134   : > { %1507 = vrot.lane.b32.xlu0 %v3325_v15, %s3180_s13  ;;  %1505 = vrot.lane.b32.xlu1 %v3319_v13, %s3180_s13  ;;  %v5519_v15 = vrot.slane %v3528_v16, 2  ;;  %v5520_v13 = vunpack.i.l.bf16 %v3568_v51  ;;  %v5523_v16 = vld [vmem:[#allocation10_spill] sm:$0xff] }
 0x136   : > { %v2992_v20 = vpop.permute.xlu1 %2991  ;;  %v4252_v47 = vpop.permute.xlu0 %1009  ;;  %v3040_v45 = vpack.i.bf16 %v5519_v15, %v5518_v5  ;;  %v324_v24 = vsel %vm5521_vm13, %v5520_v13, %v2978_v3  ;;  %v5527_v3 = vld [vmem:[#allocation15_spill] sm:$0xff]  ;;  %vm5530_vm13 = vmmov %vm5529_vm0  ;;  %v2988_v13 = vunpack.i.l.bf16 %v2987_v48 }
 0x137   : > { %v734_v51 = vsel %vm3703_vm3, %v5523_v16, %v324_v24  ;;  %v5528_v5 = vunpack.i.l.bf16 %v5527_v3  ;;  %v439_v3 = vsel %vm5534_vm15, %v431_v53, %v4226_v9  ;;  %v5543_v53 = vld [vmem:[#allocation17_spill] sm:$0xff]  ;;  %v4321_v35 = vunpack.i.h.bf16 %v2992_v20 }
 0x138   : > { %637 = vrot.lane.b32.xlu0 %v3313_v11, %s3175_s25  ;;  %1503 = vrot.lane.b32.xlu1 %v3313_v11, %s3180_s13  ;;  %v752_v42 = vsel %vm5531_vm10, %v734_v51, %v373_v25  ;;  %v5536_v51 = vld [vmem:[#allocation19_spill] sm:$0xff]  ;;  %vm5539_vm10 = vcmask 1041408   ;;  %v5544_v55 = vunpack.i.l.bf16 %v5543_v53 }
 0x139   : > { %v397_v29 = vsel %vm5529_vm0, %v5528_v5, %v2983_v12  ;;  %vm5535_vm0 = vcmask 932864   ;;  %v5537_v25 = vunpack.i.l.bf16 %v5536_v51  ;;  %vm5541_vm2 = vmmov %vm5539_vm10 }
 0x13a   : > { %v540_v2 = vpop.permute.xlu1 %539  ;;  %v4269_v8 = vpop.permute.xlu0 %2996  ;;  %v768_v59 = vsel %vm3730_vm11, %v752_v42, %v397_v29  ;;  %vm5545_vm15 = vmmov %vm5535_vm0 }
 0x13b   : > { %v2998_v24 = vunpack.i.l.bf16 %v4269_v8  ;;  %v2999_v5 = vunpack.i.h.bf16 %v4269_v8  ;;  %v2993_v8 = vunpack.i.l.bf16 %v2992_v20 }
 0x13c   : > { %3041 = vrot.lane.b32.xlu0 %v3040_v45, %s3176_s6  ;;  %639 = vrot.lane.b32.xlu1 %v3616_v27, %s3175_s25  ;;  %v398_v27 = vsel %vm5530_vm13, %v2983_v12, %v5388_v22  ;;  %v4294_v45 = vunpack.i.h.bf16 %v2987_v48  ;;  %vm5538_vm13 = vcmask 949248   ;;  %v4313_v22 = vsel %vm5539_vm10, %v768_v59, %v438_v40 }
 0x13d   : > { %v769_v12 = vsel %vm3730_vm11, %v756_v52, %v398_v27  ;;  %v1213_v19 = vsel %vm5538_vm13, %v5537_v25, %v2998_v24  ;;  %5540 = vst [vmem:[#allocation10_spill] sm:$0xff] %v4313_v22  ;;  %v991_v27 = vsel %vm5545_vm15, %v5544_v55, %v2988_v13  ;;  %v1214_v59 = vsel %vm5538_vm13, %v2998_v24, %v2999_v5  ;;  %v5547_v55 = vld [vmem:[#allocation20_spill] sm:$0xff] }
 0x13e   : > { %v1230_v58 = vpop.permute.xlu1 %1229  ;;  %v4289_v15 = vpop.permute.xlu0 %541  ;;  %v992_v30 = vsel %vm5535_vm0, %v2988_v13, %v4294_v45  ;;  %v4316_v29 = vsel %vm5541_vm2, %v769_v12, %v439_v3  ;;  %vm5546_vm0 = vcmask 924672   ;;  %v1284_v3 = vsel %vm3730_vm11, %v752_v42, %v1213_v19 }
 0x13f   : > { %5542 = vst [vmem:[#allocation13_spill] sm:$0xff] %v4316_v29  ;;  %v1016_v51 = vsel %vm5546_vm0, %v4244_v60, %v4252_v47  ;;  %v1063_v40 = vsel %vm3774_vm6, %v4316_v29, %v992_v30  ;;  %vm5548_vm10 = vcmask 941056   ;;  %v1062_v14 = vsel %vm3774_vm6, %v4313_v22, %v991_v27 }
 0x140   : > { %v1237_v13 = vsel %vm5548_vm10, %v5547_v55, %v1230_v58  ;;  %vm5549_vm2 = vmmov %vm5548_vm10  ;;  %vm5550_vm15 = vcmask 1042432   ;;  %v5551_v24 = vunpack.i.l.bf16 %v3635_v38  ;;  %vm5552_vm0 = vcmask 916480  }
 0x141   : > { %v1083_v29 = vsel %vm5550_vm15, %v1063_v40, %v1016_v51  ;;  %vm5553_vm13 = vmmov %vm5552_vm0  ;;  %vm5555_vm10 = vcmask 924672   ;;  %vm5557_vm15 = vcmask 1041408  }
 0x142   : > { %v3002_v7 = vpop.permute.xlu1 %3001  ;;  %v1232_v48 = vpop.permute.xlu0 %1231  ;;  %v4346_v18 = vsel %vm5552_vm0, %v5551_v24, %v2993_v8  ;;  %v4350_v42 = vsel %vm5553_vm13, %v2993_v8, %v4321_v35  ;;  %v1301_v38 = vsel %vm5557_vm15, %v1284_v3, %v1237_v13  ;;  %vm5558_vm0 = vmmov %vm5557_vm15  ;;  %vm5560_vm13 = vcmask 900096  }
 0x143   : > { %v1238_v20 = vsel %vm5549_vm2, %v1230_v58, %v1232_v48  ;;  %v4337_v25 = vunpack.i.h.bf16 %v3002_v7  ;;  %v3003_v53 = vunpack.i.l.bf16 %v3002_v7  ;;  %v1285_v58 = vsel %vm3730_vm11, %v756_v52, %v1214_v59  ;;  %v5554_v7 = vld [vmem:[#allocation18_spill] sm:$0xff] }
 0x144   : > { %v1015_v55 = vsel %vm5555_vm10, %v5554_v7, %v4244_v60  ;;  %vm5556_vm2 = vcmask 908288   ;;  %v1305_v24 = vsel %vm5558_vm0, %v1285_v58, %v1238_v20  ;;  %v5561_v60 = vunpack.i.h.bf16 %v4193_v57  ;;  %v5562_v7 = vld [vmem:[#allocation11_spill] sm:$0xff]  ;;  %v5565_v20 = vld [vmem:[#allocation21_spill] sm:$0xff] }
 0x145   : > { %v4359_v40 = vsel %vm5556_vm2, %v540_v2, %v4289_v15  ;;  %v1079_v8 = vsel %vm5559_vm14, %v1062_v14, %v1015_v55  ;;  %v4366_v54 = vsel %vm5560_vm13, %v3003_v53, %v4337_v25  ;;  %v1093_v3 = vsel %vm3866_vm4, %v1083_v29, %v4350_v42  ;;  %vm5563_vm10 = vmmov %vm5556_vm2 }
 0x146   : > { %v4323_v32 = vpop.permute.xlu1 %591  ;;  %v590_v12 = vpop.permute.xlu0 %589  ;;  %v736_v50 = vsel %vm3703_vm3, %v5562_v7, %v5561_v60  ;;  %v4380_v14 = vsel %vm5563_vm10, %v3660_v1, %v540_v2  ;;  %v1092_v13 = vsel %vm3866_vm4, %v1079_v8, %v4346_v18  ;;  %vm5564_vm14 = vcmask 1043456   ;;  %vm5567_vm3 = vmmov %vm5560_vm13 }
 0x147   : > { %v1314_v57 = vsel %vm3774_vm6, %v1301_v38, %v991_v27  ;;  %v1315_v46 = vsel %vm3774_vm6, %v1305_v24, %v992_v30  ;;  %v5566_v58 = vunpack.i.l.bf16 %v5565_v20  ;;  %vm5568_vm2 = vcmask 891904   ;;  %vm5571_vm0 = vmmov %vm5564_vm14 }
 0x148   : > { %v4398_v2 = vsel %vm5568_vm2, %v590_v12, %v4323_v32  ;;  %vm5570_vm15 = vcmask 1040384   ;;  %v1105_v30 = vsel %vm5571_vm0, %v1092_v13, %v4380_v14  ;;  %vm5572_vm13 = vcmask 883712  }
 0x149   : > { %v4394_v29 = vsel %vm5567_vm3, %v5566_v58, %v3003_v53  ;;  %5569 = vst [vmem:[#allocation15_spill] sm:$0xff] %v4398_v2  ;;  %v760_v27 = vsel %vm5570_vm15, %v736_v50, %v4213_v6  ;;  %vm5574_vm10 = vcmask 1042432   ;;  %vm5577_vm3 = vmmov %vm5568_vm2  ;;  %vm5578_vm2 = vcmask 1044480  }
 0x14a   : > { %v1026_v19 = vpop.permute.xlu1 %1025  ;;  %v3007_v22 = vpop.permute.xlu0 %3006  ;;  %v1327_v38 = vsel %vm5574_vm10, %v1314_v57, %v1015_v55  ;;  %v5579_v6 = vunpack.i.l.bf16 %v3724_v26  ;;  %vm5580_vm15 = vmmov %vm5572_vm13  ;;  %vm5581_vm0 = vcmask 801792  }
 0x14b   : > { %v4368_v52 = vunpack.i.h.bf16 %v3007_v22  ;;  %v3008_v59 = vunpack.i.l.bf16 %v3007_v22  ;;  %v1108_v22 = vsel %vm5564_vm14, %v1093_v3, %v4359_v40  ;;  %vm5575_vm14 = vmmov %vm5574_vm10  ;;  %v5576_v3 = vld [vmem:[#allocation22_spill] sm:$0xff] }
 0x14c   : > { %v1117_v8 = vsel %vm3926_vm8, %v1108_v22, %v4366_v54  ;;  %v1330_v24 = vsel %vm5575_vm14, %v1315_v46, %v1016_v51  ;;  %v4417_v20 = vsel %vm5577_vm3, %v5576_v3, %v590_v12  ;;  %v1116_v22 = vsel %vm3926_vm8, %v1105_v30, %v4394_v29  ;;  %vm5583_vm10 = vmmov %vm5578_vm2 }
 0x14d   : > { %v4411_v53 = vsel %vm5572_vm13, %v3008_v59, %v4368_v52  ;;  %v1132_v50 = vsel %vm5578_vm2, %v1117_v8, %v4398_v2  ;;  %v4427_v13 = vsel %vm5580_vm15, %v5579_v6, %v3008_v59  ;;  %v1286_v12 = vsel %vm3730_vm11, %v760_v27, %v2999_v5 }
 0x14e   : > { %v3012_v1 = vpop.permute.xlu1 %3011  ;;  %v4403_v60 = vpop.permute.xlu0 %1027  ;;  %5573 = vst [vmem:[#allocation16_spill] sm:$0xff] %v4411_v53  ;;  %v1141_v46 = vsel %vm3954_vm9, %v1132_v50, %v4411_v53  ;;  %vm5582_vm13 = vcmask 1041408   ;;  %v1129_v59 = vsel %vm5583_vm10, %v1116_v22, %v4417_v20  ;;  %v1338_v3 = vsel %vm3866_vm4, %v1327_v38, %v4346_v18 }
 0x14f   : > { %v4429_v58 = vunpack.i.h.bf16 %v3012_v1  ;;  %v3013_v55 = vunpack.i.l.bf16 %v3012_v1  ;;  %v1034_v57 = vsel %vm5581_vm0, %v1026_v19, %v4403_v60  ;;  %v1309_v26 = vsel %vm5582_vm13, %v1286_v12, %v1232_v48  ;;  %vm5588_vm2 = vmmov %vm5582_vm13 }
 0x150   : > { %v5584_v1 = vunpack.i.h.bf16 %v4209_v34  ;;  %v1140_v5 = vsel %vm3954_vm9, %v1129_v59, %v4427_v13  ;;  %v1339_v48 = vsel %vm3866_vm4, %v1330_v24, %v4350_v42  ;;  %vm5585_vm14 = vcmask 1045504  }
 0x151   : > { %v1161_v50 = vsel %vm5585_vm14, %v1141_v46, %v1034_v57  ;;  %v5586_v22 = vunpack.i.l.bf16 %v3845_v39  ;;  %v1052_v41 = vsel %vm1047_vm7, %v3013_v55, %v4429_v58  ;;  %v1316_v6 = vsel %vm3774_vm6, %v1309_v26, %v4294_v45  ;;  %vm5589_vm15 = vmmov %vm5585_vm14 }
 0x152   : > { %v4431_v51 = vpop.permute.xlu1 %690  ;;  %v689_v8 = vpop.permute.xlu0 %688  ;;  %v770_v30 = vsel %vm3730_vm11, %v760_v27, %v5584_v1  ;;  %vm5587_vm11 = vmmov %vm5581_vm0  ;;  %vm458_vm3 = vcmask 1006592   ;;  %vm5590_vm0 = vcmask 1043456   ;;  %vm5592_vm13 = vcmask 785408  }
 0x153   : > { %v1051_v34 = vsel %vm1047_vm7, %v5586_v22, %v3013_v55  ;;  %v1033_v38 = vsel %vm5587_vm11, %v3816_v28, %v1026_v19  ;;  %v4471_v24 = vsel %vm5588_vm2, %v770_v30, %v4226_v9  ;;  %v1351_v55 = vsel %vm5590_vm0, %v1338_v3, %v4380_v14  ;;  %vm5591_vm7 = vmmov %vm5590_vm0 }
 0x154   : > { %v1157_v39 = vsel %vm5589_vm15, %v1140_v5, %v1033_v38  ;;  %v1354_v46 = vsel %vm5591_vm7, %v1339_v48, %v4359_v40  ;;  %v4480_v26 = vsel %vm5592_vm13, %v3960_v63, %v689_v8  ;;  %vm5593_vm10 = vmmov %vm5592_vm13  ;;  %v1171_v9 = vsel %vm4015_vm5, %v1161_v50, %v1052_v41 }
 0x155   : > { %v4484_v28 = vsel %vm5593_vm10, %v689_v8, %v4431_v51  ;;  %v1170_v19 = vsel %vm4015_vm5, %v1157_v39, %v1051_v34  ;;  %v1064_v59 = vsel %vm3774_vm6, %v4471_v24, %v4294_v45  ;;  %vm5594_vm14 = vcmask 1042432  }
 0x156   : > { %v4462_v27 = vpop.permute.xlu1 %1249  ;;  %v1248_v12 = vpop.permute.xlu0 %1247  ;;  %v1333_v1 = vsel %vm5594_vm14, %v1316_v6, %v4252_v47  ;;  %vm5595_vm11 = vcmask 818176   ;;  %v1362_v5 = vsel %vm3926_vm8, %v1351_v55, %v4394_v29  ;;  %v1363_v3 = vsel %vm3926_vm8, %v1354_v46, %v4366_v54 }
 0x157   : > { %v1255_v63 = vsel %vm5595_vm11, %v3999_v62, %v1248_v12  ;;  %vm5596_vm2 = vmmov %vm5595_vm11  ;;  %vm5597_vm15 = vcmask 1046528   ;;  %vm5599_vm7 = vcmask 1044480   ;;  %v5601_v53 = vunpack.i.l.bf16 %v4147_v49 }
 0x158   : > { %v1256_v8 = vsel %vm5596_vm2, %v1248_v12, %v4462_v27  ;;  %v1186_v62 = vsel %vm5597_vm15, %v1171_v9, %v4484_v28  ;;  %vm5598_vm0 = vmmov %vm5597_vm15  ;;  %v1379_v39 = vsel %vm5599_vm7, %v1362_v5, %v1255_v63  ;;  %vm5602_vm10 = vcmask 777216  }
 0x159   : > { %v1183_v12 = vsel %vm5598_vm0, %v1170_v19, %v4480_v26  ;;  %vm5600_vm13 = vmmov %vm5599_vm7  ;;  %v5603_v63 = vunpack.i.l.bf16 %v4120_v37  ;;  %vm5605_vm11 = vcmask 1045504   ;;  %vm5607_vm15 = vcmask 1042432  }
 0x15a   : > { %v3022_v30 = vpop.permute.xlu1 %3021  ;;  %v3017_v48 = vpop.permute.xlu0 %3016  ;;  %v1383_v55 = vsel %vm5600_vm13, %v1363_v3, %v1256_v8  ;;  %vm5604_vm14 = vmmov %vm5602_vm10  ;;  %vm5608_vm0 = vcmask 1043456   ;;  %vm5609_vm7 = vcmask 1046528  }
 0x15b   : > { %v3024_v45 = vunpack.i.h.bf16 %v3022_v30  ;;  %v3023_v50 = vunpack.i.l.bf16 %v3022_v30  ;;  %v4506_v22 = vunpack.i.h.bf16 %v3017_v48  ;;  %v3018_v6 = vunpack.i.l.bf16 %v3017_v48  ;;  %vm5606_vm2 = vmmov %vm5605_vm11 }
 0x15c   : > { %vm5611_vm13 = vmmov %vm5609_vm7 }
 0x15d   : > { %v1273_v46 = vsel %vm1269_vm1, %v5601_v53, %v3023_v50  ;;  %v1274_v2 = vsel %vm1269_vm1, %v3023_v50, %v3024_v45  ;;  %v4526_v19 = vsel %vm5602_vm10, %v3018_v6, %v4506_v22  ;;  %v4531_v49 = vsel %vm5604_vm14, %v5603_v63, %v3018_v6  ;;  %vm5612_vm10 = vmmov %vm5608_vm0 }
 0x15e   : > { %v1392_v30 = vsel %vm3954_vm9, %v1379_v39, %v1273_v46  ;;  %v1393_v48 = vsel %vm3954_vm9, %v1383_v55, %v1274_v2  ;;  %v4522_v9 = vpop.permute.xlu1 %3031  ;;  %v1340_v53 = vsel %vm3866_vm4, %v1333_v1, %v4321_v35  ;;  %v4536_v8 = vpop.permute.xlu0 %3026  ;;  %v1195_v2 = vsel %vm4060_vm12, %v1186_v62, %v4526_v19  ;;  %vm5613_vm14 = vmmov %vm5607_vm15 }
 0x15f   : > { %v1194_v5 = vsel %vm4060_vm12, %v1183_v12, %v4531_v49  ;;  %vm491_vm1 = vcmask 998400   ;;  %v3029_v37 = vunpack.i.h.bf16 %v4536_v8  ;;  %v3028_v3 = vunpack.i.l.bf16 %v4536_v8  ;;  %1457 = vrot.lane.b32.xlu0 %v1195_v2, %s3177_s8 }
 0x160   : > { %1455 = vrot.lane.b32.xlu1 %v1194_v5, %s3177_s8  ;;  %v1408_v1 = vsel %vm5605_vm11, %v1393_v48, %v1034_v57  ;;  %v1405_v50 = vsel %vm5606_vm2, %v1392_v30, %v1033_v38  ;;  %v1087_v6 = vsel %vm5607_vm15, %v1064_v59, %v4252_v47  ;;  %v3033_v62 = vunpack.i.l.bf16 %v4522_v9  ;;  %v5610_v59 = vld [vmem:[#allocation23_spill] sm:$0xff]  ;;  %vm5617_vm2 = vmmov %vm5608_vm0 }
 0x161   : > { %v1417_v12 = vsel %vm4015_vm5, %v1408_v1, %v1052_v41  ;;  %v1416_v39 = vsel %vm4015_vm5, %v1405_v50, %v1051_v34  ;;  %v1357_v55 = vsel %vm5608_vm0, %v1340_v53, %v4289_v15  ;;  %v460_v57 = vsel %vm458_vm3, %v3028_v3, %v3029_v37  ;;  %vm5620_vm0 = vmmov %vm5613_vm14 }
 0x162   : > { %v4562_v46 = vpop.permute.xlu1 %483  ;;  %v1432_v47 = vsel %vm5609_vm7, %v1417_v12, %v4484_v28  ;;  %v482_v38 = vpop.permute.xlu0 %481  ;;  %v800_v41 = vsel %vm3774_vm6, %v5610_v59, %v460_v57  ;;  %v1429_v30 = vsel %vm5611_vm13, %v1416_v39, %v4480_v26  ;;  %v1094_v48 = vsel %vm3866_vm4, %v1087_v6, %v4321_v35  ;;  %v5615_v39 = vld [vmem:[#allocation26_spill] sm:$0xff]  ;;  %vm5622_vm13 = vmmov %vm5617_vm2 }
 0x163   : > { %v1441_v34 = vsel %vm4060_vm12, %v1432_v47, %v4526_v19  ;;  %v493_v63 = vsel %vm491_vm1, %v482_v38, %v4562_v46  ;;  %v1440_v53 = vsel %vm4060_vm12, %v1429_v30, %v4531_v49  ;;  %v1111_v2 = vsel %vm5612_vm10, %v1094_v48, %v4289_v15 }
 0x164   : > { %1487 = vrot.lane.b32.xlu0 %v1441_v34, %s3178_s10  ;;  %v1364_v5 = vsel %vm3926_vm8, %v1357_v55, %v4337_v25  ;;  %v459_v1 = vsel %vm458_vm3, %v3033_v62, %v3028_v3  ;;  %v812_v50 = vsel %vm5613_vm14, %v800_v41, %v493_v63  ;;  %1485 = vrot.lane.b32.xlu1 %v1440_v53, %s3178_s10  ;;  %vm5614_vm11 = vcmask 1044480   ;;  %v5616_v62 = vld [vmem:[#allocation27_spill] sm:$0xff]  ;;  %v5618_v34 = vld [vmem:[#allocation25_spill] sm:$0xff] }
 0x165   : > { %v1118_v6 = vsel %vm3926_vm8, %v1111_v2, %v4337_v25  ;;  %v1387_v12 = vsel %vm5614_vm11, %v1364_v5, %v4462_v27  ;;  %v834_v57 = vsel %vm3866_vm4, %v812_v50, %v5615_v39  ;;  %v799_v30 = vsel %vm3774_vm6, %v5618_v34, %v459_v1  ;;  %vm5619_vm15 = vmmov %vm5614_vm11  ;;  %v5624_v1 = vld [vmem:[#allocation12_spill] sm:$0xff]  ;;  %v5626_v50 = vld [vmem:[#allocation33_spill] sm:$0xff] }
 0x166   : > { %v634_v47 = vpop.permute.xlu1 %633  ;;  %v1394_v55 = vsel %vm3954_vm9, %v1387_v12, %v3024_v45  ;;  %v480_v3 = vpop.permute.xlu0 %479  ;;  %v846_v59 = vsel %vm5617_vm2, %v834_v57, %v5616_v62  ;;  %v1135_v27 = vsel %vm5619_vm15, %v1118_v6, %v4323_v32  ;;  %vm5621_vm7 = vcmask 1045504   ;;  %v5627_v12 = vld [vmem:[#allocation30_spill] sm:$0xff]  ;;  %vm5628_vm2 = vmmov %vm5614_vm11 }
 0x167   : > { %v492_v41 = vsel %vm491_vm1, %v480_v3, %v482_v38  ;;  %v1142_v45 = vsel %vm3954_vm9, %v1135_v27, %v4368_v52  ;;  %vm643_vm10 = vcmask 875520   ;;  %vm5623_vm14 = vmmov %vm5621_vm7  ;;  %vm667_vm15 = vcmask 867328  }
 0x168   : > { %1511 = vrot.lane.b32.xlu0 %v3518_v31, %s3180_s13  ;;  %v808_v48 = vsel %vm5620_vm0, %v799_v30, %v492_v41  ;;  %1509 = vrot.lane.b32.xlu1 %v5523_v16, %s3180_s13  ;;  %v1411_v31 = vsel %vm5621_vm7, %v1394_v55, %v4403_v60  ;;  %v868_v16 = vsel %vm3926_vm8, %v846_v59, %v3919_v44  ;;  %v5629_v59 = vrot.slane %v5624_v1, 2  ;;  %v5632_v30 = vld [vmem:[#allocation14_spill] sm:$0xff] }
 0x169   : > { %v833_v38 = vsel %vm3866_vm4, %v808_v48, %v3901_v36  ;;  %v1165_v5 = vsel %vm5623_vm14, %v1142_v45, %v4403_v60  ;;  %v1418_v44 = vsel %vm4015_vm5, %v1411_v31, %v4429_v58  ;;  %vm5630_vm0 = vcmask 1046528  }
 0x16a   : > { %v632_v63 = vpop.permute.xlu1 %631  ;;  %v842_v53 = vsel %vm5622_vm13, %v833_v38, %v3966_v23  ;;  %v4624_v2 = vpop.permute.xlu0 %635  ;;  %v5625_v23 = vrot.slane %v5624_v1, 6  ;;  %v1435_v41 = vsel %vm5630_vm0, %v1418_v44, %v4431_v51  ;;  %vm5633_vm13 = vmmov %vm5621_vm7 }
 0x16b   : > { %v867_v36 = vsel %vm3926_vm8, %v842_v53, %v4020_v61  ;;  %v645_v61 = vsel %vm643_vm10, %v634_v47, %v4624_v2  ;;  %v644_v39 = vsel %vm643_vm10, %v632_v63, %v634_v47  ;;  %v1172_v47 = vsel %vm4015_vm5, %v1165_v5, %v4429_v58  ;;  %vm5634_vm14 = vmmov %vm5630_vm0  ;;  %v5636_v5 = vld [vmem:[#allocation38_spill] sm:$0xff] }
 0x16c   : > { %489 = vrot.lane.b32.xlu0 %v3313_v11, %s3174_s17  ;;  %456 = vrot.lane.b32.xlu1 %v5625_v23, %s3173_s15  ;;  %v876_v6 = vsel %vm5614_vm11, %v867_v36, %v5626_v50  ;;  %v880_v11 = vsel %vm5628_vm2, %v868_v16, %v5627_v12  ;;  %v1442_v63 = vsel %vm4060_vm12, %v1435_v41, %v4506_v22  ;;  %vm5635_vm11 = vmmov %vm5630_vm0  ;;  %v5638_v23 = vld [vmem:[#allocation36_spill] sm:$0xff] }
 0x16d   : > { %v901_v60 = vsel %vm3954_vm9, %v876_v6, %v4069_v33  ;;  %v5631_v33 = vld [vmem:[#allocation31_spill] sm:$0xff]  ;;  %v1189_v31 = vsel %vm5634_vm14, %v1172_v47, %v4431_v51  ;;  %vm5637_vm2 = vmmov %vm5630_vm0  ;;  %v5639_v6 = vld [vmem:[#allocation40_spill] sm:$0xff]  ;;  %vm1461_vm0 = vcmask 769024  }
 0x16e   : > { %v4652_v57 = vpop.permute.xlu0 %3036  ;;  %v656_v55 = vpop.permute.xlu1 %655  ;;  %v902_v34 = vsel %vm3954_vm9, %v880_v11, %v5631_v33  ;;  %v910_v48 = vsel %vm5633_vm13, %v901_v60, %v644_v39  ;;  %v1196_v16 = vsel %vm4060_vm12, %v1189_v31, %v4506_v22  ;;  %v3034_v60 = vunpack.i.h.bf16 %v4522_v9  ;;  %v5644_v31 = vld [vmem:[#allocation28_spill] sm:$0xff] }
 0x16f   : > { %v3039_v3 = vunpack.i.h.bf16 %v4652_v57  ;;  %v3038_v62 = vunpack.i.l.bf16 %v4652_v57  ;;  %v914_v27 = vsel %vm5621_vm7, %v902_v34, %v645_v61  ;;  %v5640_v34 = vld [vmem:[#allocation10_spill] sm:$0xff]  ;;  %vm5642_vm7 = vcmask 1042432  }
 0x170   : > { %665 = vrot.lane.b32.xlu0 %v5629_v59, %s3176_s6  ;;  %641 = vrot.lane.b32.xlu1 %v5632_v30, %s3175_s25  ;;  %v461_v59 = vsel %vm458_vm3, %v3029_v37, %v3034_v60  ;;  %vm1491_vm13 = vcmask 490496   ;;  %vm5643_vm14 = vmmov %vm5642_vm7  ;;  %s3184_s25 = smov [#allocation6]  }
 0x171   : > { %v668_v45 = vsel %vm667_vm15, %v656_v55, %v3038_v62  ;;  %v669_v38 = vsel %vm667_vm15, %v3038_v62, %v3039_v3  ;;  %s3086_s6 = sshll.u32 %s3184_s25, 4  ;;  %s3087_s6 = int_to_ptr.vmem [resolvable:$false] %s3086_s6 }
 0x172   : > { %v935_v58 = vsel %vm4015_vm5, %v910_v48, %v668_v45  ;;  %v936_v53 = vsel %vm4015_vm5, %v914_v27, %v669_v38  ;;  %v5641_v27 = vld [vmem:[#allocation24_spill] sm:$0xff] }
 0x173   : > { %v948_v36 = vsel %vm5635_vm11, %v936_v53, %v4045_v10  ;;  %v944_v1 = vsel %vm5637_vm2, %v935_v58, %v5636_v5  ;;  %v801_v48 = vsel %vm3774_vm6, %v5641_v27, %v461_v59  ;;  %vm1515_vm11 = vcmask 211968   ;;  %v5652_v59 = vld [vmem:[#allocation34_spill] sm:$0xff] }
 0x174   : > { %1489 = vrot.lane.b32.xlu0 %v1442_v63, %s3178_s10  ;;  %1459 = vrot.lane.b32.xlu1 %v1196_v16, %s3177_s8  ;;  %v970_v50 = vsel %vm4060_vm12, %v948_v36, %v5638_v23  ;;  %v969_v44 = vsel %vm4060_vm12, %v944_v1, %v5639_v6  ;;  %v5645_v16 = vmov 0   ;;  %vm5646_vm2 = vcmask 1040384   ;;  %v5648_v23 = vld [vmem:[#allocation29_spill] sm:$0xff]  ;;  %s3088_s10 = scalar_lea.vmem %s3087_s6, 32 }
 0x175   : > { %1552 = vmatprep.subr.bf16.mxu0 %v970_v50  ;;  %v4738_v36 = vsel %vm5646_vm2, 65535, %v5645_v16  ;;  %vm5651_vm2 = vcmask 1044480  }
 0x176   : > { %1553 = vmatpush1.bf16.msra.mxu0 %v969_v44 }
 0x178   : > { %1513 = vrot.lane.b32.xlu1 %v5562_v7, %s3180_s13 }
 0x191   : > { %v1452_v12 = vpop.permute.xlu0 %1451 }
 0x196   : > { %v4701_v10 = vpop.permute.xlu0 %454  ;;  %v4703_v11 = vpop.permute.xlu1 %1453 }
 0x197   : > { %v1463_v61 = vsel %vm1461_vm0, %v1452_v12, %v4703_v11  ;;  %v462_v7 = vsel %vm458_vm3, %v3034_v60, %v4701_v10 }
 0x198   : > { %1554 = vmatprep.subr.bf16.mxu0 %v1463_v61  ;;  %v802_v30 = vsel %vm3774_vm6, %v5640_v34, %v462_v7 }
 0x19a   : > { %v486_v39 = vpop.permute.xlu0 %485  ;;  %v1450_v55 = vpop.permute.xlu1 %1449 }
 0x19b   : > { %v1462_v62 = vsel %vm1461_vm0, %v1450_v55, %v1452_v12  ;;  %v494_v47 = vsel %vm491_vm1, %v4562_v46, %v486_v39 }
 0x19c   : > { %1555 = vmatpush1.bf16.msra.mxu0 %v1462_v62  ;;  %v816_v37 = vsel %vm5643_vm14, %v801_v48, %v494_v47 }
 0x19d   : > { %v835_v53 = vsel %vm3866_vm4, %v816_v37, %v5644_v31  ;;  %v5658_v31 = vld [vmem:[#allocation37_spill] sm:$0xff] }
 0x19e   : > { %v4714_v41 = vpop.permute.xlu1 %487  ;;  %v1482_v33 = vpop.permute.xlu0 %1481 }
 0x19f   : > { %v495_v9 = vsel %vm491_vm1, %v486_v39, %v4714_v41  ;;  %v5650_v39 = vld [vmem:[#allocation32_spill] sm:$0xff] }
 0x1a0   : > { %v820_v8 = vsel %vm5642_vm7, %v802_v30, %v495_v9  ;;  %vm5647_vm7 = vcmask 1043456  }
 0x1a1   : > { %v836_v46 = vsel %vm3866_vm4, %v820_v8, %v4346_v18  ;;  %vm5649_vm14 = vmmov %vm5647_vm7  ;;  %v5654_v8 = vld [vmem:[#allocation35_spill] sm:$0xff] }
 0x1a2   : > { %v1480_v45 = vpop.permute.xlu0 %1479  ;;  %v1484_v38 = vpop.permute.xlu1 %1483  ;;  %v854_v5 = vsel %vm5647_vm7, %v836_v46, %v4380_v14  ;;  %v850_v50 = vsel %vm5649_vm14, %v835_v53, %v5648_v23  ;;  %vm5653_vm7 = vmmov %vm5651_vm2  ;;  %vm1528_vm14 = vcmask 400384  }
 0x1a3   : > { %v1493_v58 = vsel %vm1491_vm13, %v1482_v33, %v1484_v38  ;;  %v1492_v63 = vsel %vm1491_vm13, %v1480_v45, %v1482_v33  ;;  %v870_v12 = vsel %vm3926_vm8, %v854_v5, %v4394_v29  ;;  %v869_v60 = vsel %vm3926_vm8, %v850_v50, %v5650_v39  ;;  %v4761_v29 = vld [vmem:[%s5320_s1] sm:$0xff]  }
 0x1a4   : > { %1556 = vmatprep.subr.bf16.mxu0 %v1493_v58  ;;  %v888_v7 = vsel %vm5651_vm2, %v870_v12, %v4417_v20  ;;  %v884_v47 = vsel %vm5653_vm7, %v869_v60, %v5652_v59  ;;  %vm5655_vm2 = vcmask 1045504   ;;  %v5660_v5 = vld [vmem:[#allocation39_spill] sm:$0xff] }
 0x1a5   : > { %1557 = vmatpush1.bf16.msra.mxu0 %v1492_v63  ;;  %v904_v48 = vsel %vm3954_vm9, %v888_v7, %v4427_v13  ;;  %vm5656_vm7 = vmmov %vm5655_vm2 }
 0x1a6   : > { %v1508_v1 = vpop.permute.xlu0 %1507  ;;  %v1506_v18 = vpop.permute.xlu1 %1505 }
 0x1a7   : > { %v1517_v6 = vsel %vm1515_vm11, %v1506_v18, %v1508_v1 }
 0x1a8   : > { %v1538_v44 = vand.u32 %v4738_v36, %v1517_v6 }
 0x1aa   : > { %v638_v61 = vpop.permute.xlu0 %637  ;;  %v1504_v55 = vpop.permute.xlu1 %1503  ;;  %1558 = vmatprep.subr.bf16.mxu0 %v1538_v44 }
 0x1ab   : > { %v1516_v14 = vsel %vm1515_vm11, %v1504_v55, %v1506_v18  ;;  %v646_v33 = vsel %vm643_vm10, %v4624_v2, %v638_v61  ;;  %v903_v2 = vsel %vm3954_vm9, %v884_v47, %v5654_v8 }
 0x1ac   : > { %v1535_v62 = vand.u32 %v4738_v36, %v1516_v14  ;;  %v918_v45 = vsel %vm5656_vm7, %v903_v2, %v646_v33 }
 0x1ae   : > { %v4765_v9 = vpop.permute.xlu0 %3041  ;;  %v4767_v34 = vpop.permute.xlu1 %639  ;;  %1559 = vmatpush1.bf16.msra.mxu0 %v1535_v62 }
 0x1af   : > { %v3044_v30 = vunpack.i.h.bf16 %v4765_v9  ;;  %v3043_v20 = vunpack.i.l.bf16 %v4765_v9  ;;  %v647_v27 = vsel %vm643_vm10, %v638_v61, %v4767_v34 }
 0x1b0   : > { %v922_v37 = vsel %vm5655_vm2, %v904_v48, %v647_v27  ;;  %vm5657_vm2 = vcmask 1046528  }
 0x1b1   : > { %v670_v46 = vsel %vm667_vm15, %v3039_v3, %v3043_v20  ;;  %v671_v58 = vsel %vm667_vm15, %v3043_v20, %v3044_v30  ;;  %2771 = vmatmul.mubr.msk.bf16.vlgmr.msra.gmra.mrb[0].mxu0 %vm1528_vm14, %v4761_v29  ;;  %vm5659_vm7 = vmmov %vm5657_vm2 }
 0x1b2   : > { %v938_v13 = vsel %vm4015_vm5, %v922_v37, %v671_v58  ;;  %v937_v63 = vsel %vm4015_vm5, %v918_v45, %v670_v46  ;;  %1627 = vmatprep.mubr.bf16.mxu0 %v5645_v16  ;;  %v5669_v45 = vld [vmem:[#allocation16_spill] sm:$0xff] }
 0x1b3   : > { %v956_v57 = vsel %vm5657_vm2, %v938_v13, %v4480_v26  ;;  %v952_v3 = vsel %vm5659_vm7, %v937_v63, %v5658_v31  ;;  %vm5662_vm2 = vcmask 1042432  }
 0x1b4   : > { %v972_v53 = vsel %vm4060_vm12, %v956_v57, %v4531_v49  ;;  %v971_v18 = vsel %vm4060_vm12, %v952_v3, %v5660_v5  ;;  %vm5663_vm7 = vmmov %vm5662_vm2 }
 0x1b5   : > { %1595 = vmatprep.subr.bf16.mxu0 %v972_v53 }
 0x1b6   : > { %1596 = vmatpush1.bf16.msra.mxu0 %v971_v18 }
 0x1d1   : > { %v1458_v23 = vpop.permute.xlu0 %1457 }
 0x1d2   : > { %v1456_v50 = vpop.permute.xlu1 %1455 }
 0x1d3   : > { %v1465_v6 = vsel %vm1461_vm0, %v1456_v50, %v1458_v23  ;;  %v1464_v26 = vsel %vm1461_vm0, %v4703_v11, %v1456_v50 }
 0x1d4   : > { %1597 = vmatprep.subr.bf16.mxu0 %v1465_v6 }
 0x1d5   : > { %1598 = vmatpush1.bf16.msra.mxu0 %v1464_v26 }
 0x1d6   : > { %v1488_v44 = vpop.permute.xlu0 %1487  ;;  %v1486_v12 = vpop.permute.xlu1 %1485 }
 0x1d7   : > { %v1495_v61 = vsel %vm1491_vm13, %v1486_v12, %v1488_v44  ;;  %v1494_v49 = vsel %vm1491_vm13, %v1484_v38, %v1486_v12 }
 0x1d8   : > { %1599 = vmatprep.subr.bf16.mxu0 %v1495_v61 }
 0x1d9   : > { %1600 = vmatpush1.bf16.msra.mxu0 %v1494_v49 }
 0x1da   : > { %v1512_v39 = vpop.permute.xlu0 %1511  ;;  %v1510_v60 = vpop.permute.xlu1 %1509 }
 0x1db   : > { %v1518_v55 = vsel %vm1515_vm11, %v1508_v1, %v1510_v60  ;;  %v1519_v14 = vsel %vm1515_vm11, %v1510_v60, %v1512_v39  ;;  %v5661_v1 = vld [vmem:[#allocation13_spill] sm:$0xff] }
 0x1dc   : > { %v1541_v62 = vand.u32 %v4738_v36, %v1518_v55  ;;  %v1544_v11 = vand.u32 %v4738_v36, %v1519_v14 }
 0x1de   : > { %v490_v7 = vpop.permute.xlu0 %489  ;;  %v457_v47 = vpop.permute.xlu1 %456  ;;  %1601 = vmatprep.subr.bf16.mxu0 %v1544_v11 }
 0x1df   : > { %v496_v59 = vsel %vm491_vm1, %v4714_v41, %v490_v7  ;;  %v463_v38 = vsel %vm458_vm3, %v4701_v10, %v457_v47  ;;  %v804_v33 = vsel %vm3774_vm6, %v4471_v24, %v457_v47  ;;  %1602 = vmatpush1.bf16.msra.mxu0 %v1541_v62  ;;  %vm5664_vm3 = vcmask 1043456  }
 0x1e0   : > { %v803_v20 = vsel %vm3774_vm6, %v5661_v1, %v463_v38  ;;  %v828_v27 = vsel %vm5662_vm2, %v804_v33, %v490_v7  ;;  %vm5665_vm6 = vmmov %vm5664_vm3  ;;  %vm5670_vm2 = vcmask 1045504  }
 0x1e1   : > { %v824_v48 = vsel %vm5663_vm7, %v803_v20, %v496_v59  ;;  %v838_v41 = vsel %vm3866_vm4, %v828_v27, %v4321_v35  ;;  %vm5672_vm7 = vcmask 1046528  }
 0x1e2   : > { %v837_v10 = vsel %vm3866_vm4, %v824_v48, %v4350_v42  ;;  %v862_v24 = vsel %vm5664_vm3, %v838_v41, %v4289_v15  ;;  %2772 = vmatmul.mubr.msk.bf16.vlgmr.msra.gmra.mrb[4].mxu0 %vm1528_vm14, %v4761_v29  ;;  %v642_v2 = vpop.permute.xlu1 %641  ;;  %v666_v35 = vpop.permute.xlu0 %665  ;;  %vm5666_vm4 = vcmask 1044480   ;;  %v5667_v42 = vld [vmem:[#allocation15_spill] sm:$0xff]  ;;  %vm5680_vm3 = vcmask 908288  }
 0x1e3   : > { %v858_v43 = vsel %vm5665_vm6, %v837_v10, %v4359_v40  ;;  %v872_v8 = vsel %vm3926_vm8, %v862_v24, %v4337_v25  ;;  %1670 = vmatprep.mubr.bf16.mxu0 %v5645_v16  ;;  %vm5668_vm1 = vmmov %vm5666_vm4  ;;  %v648_v46 = vsel %vm643_vm10, %v4767_v34, %v642_v2 }
 0x1e4   : > { %v871_v17 = vsel %vm3926_vm8, %v858_v43, %v4366_v54  ;;  %v896_v15 = vsel %vm5666_vm4, %v872_v8, %v4323_v32  ;;  %v672_v54 = vsel %vm667_vm15, %v3044_v30, %v666_v35  ;;  %vm5671_vm8 = vmmov %vm5670_vm2  ;;  %vm5676_vm15 = vcmask 1031168  }
 0x1e5   : > { %v892_v37 = vsel %vm5668_vm1, %v871_v17, %v5667_v42  ;;  %v906_v40 = vsel %vm3954_vm9, %v896_v15, %v4368_v52  ;;  %vm5681_vm6 = vmmov %vm5680_vm3  ;;  %vm5682_vm4 = vcmask 900096  }
 0x1e6   : > { %v905_v25 = vsel %vm3954_vm9, %v892_v37, %v5669_v45  ;;  %v930_v0 = vsel %vm5670_vm2, %v906_v40, %v642_v2  ;;  %v1460_v13 = vpop.permute.xlu1 %1459  ;;  %vm5673_vm9 = vmmov %vm5672_vm7  ;;  %v1490_v63 = vpop.permute.xlu0 %1489  ;;  %vm5684_vm2 = vcmask 785408  }
 0x1e7   : > { %v926_v32 = vsel %vm5671_vm8, %v905_v25, %v648_v46  ;;  %v940_v58 = vsel %vm4015_vm5, %v930_v0, %v666_v35  ;;  %v1496_v31 = vsel %vm1491_vm13, %v1488_v44, %v1490_v63  ;;  %v4907_v44 = vld [vmem:[%s5321_s2 + $0x4] ss:$8 sps:$4 sm:$0xff]   ;;  %vm5677_vm13 = vmmov %vm5676_vm15 }
 0x1e8   : > { %v964_v52 = vsel %vm5672_vm7, %v940_v58, %v4431_v51  ;;  %v939_v56 = vsel %vm4015_vm5, %v926_v32, %v672_v54  ;;  %v1466_v51 = vsel %vm1461_vm0, %v1458_v23, %v1460_v13  ;;  %vm1887_vm5 = vcmask 130048   ;;  %vm5683_vm1 = vmmov %vm5682_vm4 }
 0x1e9   : > { %v974_v34 = vsel %vm4060_vm12, %v964_v52, %v4506_v22  ;;  %v960_v9 = vsel %vm5673_vm9, %v939_v56, %v4484_v28  ;;  %2776 = vmatprep.mubr.msk.bf16.mxu1 %vm1887_vm5, %v4907_v44  ;;  %vm5685_vm8 = vmmov %vm5684_vm2  ;;  %vm5686_vm7 = vcmask 777216  }
 0x1ea   : > { %1638 = vmatprep.subr.bf16.mxu0 %v974_v34  ;;  %v973_v30 = vsel %vm4060_vm12, %v960_v9, %v4526_v19  ;;  %v1514_v4 = vpop.permute.xlu1 %1513  ;;  %vm5674_vm12 = vcmask 1039360   ;;  %vm5687_vm9 = vmmov %vm5686_vm7 }
 0x1eb   : > { %1639 = vmatpush1.bf16.msra.mxu0 %v973_v30  ;;  %v1550_v57 = vand.u32 %v4738_v36, %v1514_v4  ;;  %v1520_v22 = vsel %vm1515_vm11, %v1512_v39, %v1514_v4  ;;  %vm5675_vm10 = vmmov %vm5674_vm12 }
 0x1ec   : > { %1640 = vmatprep.subr.bf16.mxu0 %v1460_v13  ;;  %v1547_v28 = vand.u32 %v4738_v36, %v1520_v22 }
 0x1ef   : > { %1641 = vmatpush1.bf16.msra.mxu0 %v1466_v51 }
 0x1f0   : > { %1642 = vmatprep.subr.bf16.mxu0 %v1490_v63 }
 0x1f3   : > { %1643 = vmatpush1.bf16.msra.mxu0 %v1496_v31 }
 0x1f4   : > { %1644 = vmatprep.subr.bf16.mxu0 %v1550_v57 }
 0x1f7   : > { %1645 = vmatpush1.bf16.msra.mxu0 %v1547_v28 }
 0x1fa   : > { %2773 = vmatmul.mubr.msk.bf16.vlgmr.msra.gmra.mrb[8].mxu0 %vm1528_vm14, %v4761_v29 }
 0x1fb   : > { %2777 = vmatprep.mubr.msk.bf16.mxu0 %vm1887_vm5, %v4907_v44 }
 0x284   : > { %v1586_v21 = vpop.f32.mrb[0].mxu0 }
 0x285   : > { %v1588_v19 = vpop.f32.mrb[1].mxu0 }
 0x286   : > { %v1590_v3 = vpop.f32.mrb[2].mxu0 }
 0x287   : > { %v1681_v53 = vpack.c.bf16 %v1590_v3, %v1586_v21  ;;  %v1592_v5 = vpop.f32.mrb[3].mxu0 }
 0x288   : > { %v1682_v18 = vpack.c.bf16 %v1592_v5, %v1588_v19  ;;  %v4989_v19 = vld [vmem:[%s5321_s2] ss:$8 sps:$4 sm:$0xff]  }
 0x289   : > { %1705 = vrot.lane.b32.xlu0 %v1681_v53, %s3156_s12  ;;  %1724 = vrot.lane.b32.xlu1 %v1681_v53, %s3155_s11 }
 0x28a   : > { %1891 = vmatprep.subr.bf16.mxu1 %v1682_v18 }
 0x28b   : > { %1892 = vmatpush1.bf16.msra.mxu1 %v1681_v53 }
 0x28d   : > { %1744 = vrot.lane.b32.xlu0 %v1681_v53, %s3160_s16  ;;  %1766 = vrot.lane.b32.xlu1 %v1681_v53, %s3162_s23 }
 0x291   : > { %1788 = vrot.lane.b32.xlu0 %v1681_v53, %s3164_s26  ;;  %1726 = vrot.lane.b32.xlu1 %v1682_v18, %s3155_s11 }
 0x295   : > { %1707 = vrot.lane.b32.xlu0 %v1682_v18, %s3156_s12  ;;  %1768 = vrot.lane.b32.xlu1 %v1682_v18, %s3162_s23 }
 0x299   : > { %1746 = vrot.lane.b32.xlu0 %v1682_v18, %s3160_s16  ;;  %1812 = vrot.lane.b32.xlu1 %v1682_v18, %s3169_s9 }
 0x29d   : > { %1790 = vrot.lane.b32.xlu0 %v1682_v18, %s3164_s26 }
 0x2a1   : > { %1834 = vrot.lane.b32.xlu0 %v1682_v18, %s3171_s7 }
 0x2b5   : > { %v1629_v36 = vpop.f32.mrb[4].mxu0 }
 0x2b6   : > { %v1631_v29 = vpop.f32.mrb[5].mxu0 }
 0x2b7   : > { %v1633_v23 = vpop.f32.mrb[6].mxu0 }
 0x2b8   : > { %v1683_v50 = vpack.c.bf16 %v1633_v23, %v1629_v36  ;;  %v1635_v6 = vpop.f32.mrb[7].mxu0 }
 0x2b9   : > { %v1684_v26 = vpack.c.bf16 %v1635_v6, %v1631_v29 }
 0x2ba   : > { %1728 = vrot.lane.b32.xlu0 %v1683_v50, %s3155_s11  ;;  %1709 = vrot.lane.b32.xlu1 %v1683_v50, %s3156_s12 }
 0x2bb   : > { %1934 = vmatprep.subr.bf16.mxu0 %v1684_v26 }
 0x2bc   : > { %1935 = vmatpush1.bf16.msra.mxu0 %v1683_v50 }
 0x2be   : > { %1832 = vrot.lane.b32.xlu0 %v1681_v53, %s3171_s7  ;;  %1810 = vrot.lane.b32.xlu1 %v1681_v53, %s3169_s9 }
 0x2c2   : > { %1770 = vrot.lane.b32.xlu0 %v1683_v50, %s3162_s23  ;;  %1748 = vrot.lane.b32.xlu1 %v1683_v50, %s3160_s16 }
 0x2c6   : > { %1814 = vrot.lane.b32.xlu0 %v1683_v50, %s3169_s9  ;;  %1856 = vrot.lane.b32.xlu1 %v1682_v18, %s3177_s8 }
 0x2ca   : > { %1858 = vrot.lane.b32.xlu0 %v1683_v50, %s3177_s8  ;;  %1792 = vrot.lane.b32.xlu1 %v1683_v50, %s3164_s26 }
 0x2cd   : > { %v1672_v12 = vpop.f32.mrb[8].mxu0 }
 0x2ce   : > { %1854 = vrot.lane.b32.xlu1 %v1681_v53, %s3177_s8  ;;  %1711 = vrot.lane.b32.xlu0 %v1684_v26, %s3156_s12  ;;  %v1674_v61 = vpop.f32.mrb[9].mxu0 }
 0x2cf   : > { %v1676_v49 = vpop.f32.mrb[10].mxu0 }
 0x2d0   : > { %v4915_v39 = vpack.c.bf16 %v1676_v49, %v1672_v12  ;;  %v1678_v60 = vpop.f32.mrb[11].mxu0 }
 0x2d1   : > { %v1686_v55 = vpack.c.bf16 %v1678_v60, %v1674_v61 }
 0x2d2   : > { %1691 = vst [vmem:[#allocation2 + $0x20] sm:$0xff] %v4915_v39  ;;  %1836 = vrot.lane.b32.xlu1 %v1683_v50, %s3171_s7  ;;  %1730 = vrot.lane.b32.xlu0 %v1684_v26, %s3155_s11 }
 0x2d3   : > { %1693 = vst.msk [vmem:[#allocation2 + $0x28] sm:$0xff] %vm1515_vm11, %v1686_v55  ;;  %vm5678_vm11 = vcmask 916480  }
 0x2d4   : > { %vm5679_vm14 = vmmov %vm5678_vm11 }
 0x2d6   : > { %1772 = vrot.lane.b32.xlu1 %v1684_v26, %s3162_s23  ;;  %1750 = vrot.lane.b32.xlu0 %v1684_v26, %s3160_s16 }
 0x2da   : > { %1816 = vrot.lane.b32.xlu1 %v1684_v26, %s3169_s9  ;;  %1794 = vrot.lane.b32.xlu0 %v1684_v26, %s3164_s26  ;;  %v1699_v14 = vld [vmem:[#allocation2 + $0x28] sm:$0xff] }
 0x2de   : > { %1774 = vrot.lane.b32.xlu0 %v4915_v39, %s3162_s23  ;;  %1713 = vrot.lane.b32.xlu1 %v4915_v39, %s3156_s12 }
 0x2e2   : > { %1732 = vrot.lane.b32.xlu1 %v4915_v39, %s3155_s11  ;;  %1754 = vrot.lane.b32.xlu0 %v1699_v14, %s3160_s16 }
 0x2e6   : > { %1752 = vrot.lane.b32.xlu1 %v4915_v39, %s3160_s16  ;;  %1818 = vrot.lane.b32.xlu0 %v4915_v39, %s3169_s9 }
 0x2ea   : > { %1796 = vrot.lane.b32.xlu1 %v4915_v39, %s3164_s26  ;;  %1798 = vrot.lane.b32.xlu0 %v1699_v14, %s3164_s26 }
 0x2ee   : > { %1776 = vrot.lane.b32.xlu1 %v1699_v14, %s3162_s23  ;;  %1838 = vrot.lane.b32.xlu0 %v1684_v26, %s3171_s7 }
 0x2f2   : > { %1840 = vrot.lane.b32.xlu1 %v4915_v39, %s3171_s7  ;;  %1842 = vrot.lane.b32.xlu0 %v1699_v14, %s3171_s7 }
 0x2f6   : > { %1820 = vrot.lane.b32.xlu1 %v1699_v14, %s3169_s9  ;;  %1862 = vrot.lane.b32.xlu0 %v4915_v39, %s3177_s8 }
 0x2fa   : > { %1860 = vrot.lane.b32.xlu1 %v1684_v26, %s3177_s8 }
 0x2fb   : > { %v1706_v62 = vpop.permute.xlu0 %1705  ;;  %v1725_v7 = vpop.permute.xlu1 %1724 }
 0x2fe   : > { %1864 = vrot.lane.b32.xlu1 %v1699_v14, %s3177_s8 }
 0x2ff   : > { %v1745_v11 = vpop.permute.xlu0 %1744  ;;  %v1767_v47 = vpop.permute.xlu1 %1766 }
 0x303   : > { %v1789_v59 = vpop.permute.xlu0 %1788  ;;  %v1727_v33 = vpop.permute.xlu1 %1726 }
 0x304   : > { %v1734_v15 = vsel %vm5677_vm13, %v1725_v7, %v1727_v33 }
 0x307   : > { %v1708_v38 = vpop.permute.xlu0 %1707  ;;  %v1769_v20 = vpop.permute.xlu1 %1768 }
 0x308   : > { %v1715_v8 = vsel %vm5675_vm10, %v1706_v62, %v1708_v38  ;;  %v1778_v54 = vsel %vm5681_vm6, %v1767_v47, %v1769_v20 }
 0x30b   : > { %v1747_v1 = vpop.permute.xlu0 %1746  ;;  %v1813_v48 = vpop.permute.xlu1 %1812 }
 0x30c   : > { %v1756_v45 = vsel %vm5679_vm14, %v1745_v11, %v1747_v1  ;;  %vm5690_vm14 = vmmov %vm5678_vm11 }
 0x30f   : > { %v1791_v27 = vpop.permute.xlu0 %1790 }
 0x310   : > { %v1800_v56 = vsel %vm5683_vm1, %v1789_v59, %v1791_v27 }
 0x313   : > { %v1835_v41 = vpop.permute.xlu0 %1834 }
 0x32c   : > { %v4949_v10 = vpop.permute.xlu0 %1728  ;;  %v1710_v24 = vpop.permute.xlu1 %1709 }
 0x32d   : > { %v1716_v43 = vsel %vm5674_vm12, %v1708_v38, %v1710_v24  ;;  %v1735_v2 = vsel %vm5676_vm15, %v1727_v33, %v4949_v10  ;;  %vm5688_vm12 = vmmov %vm5675_vm10 }
 0x32e   : > { %1893 = vmatprep.subr.bf16.mxu1 %v1716_v43  ;;  %vm5689_vm15 = vmmov %vm5677_vm13 }
 0x32f   : > { %1894 = vmatpush1.bf16.msra.mxu1 %v1715_v8 }
 0x330   : > { %v1833_v35 = vpop.permute.xlu0 %1832  ;;  %1895 = vmatprep.subr.bf16.mxu1 %v1735_v2  ;;  %v1811_v17 = vpop.permute.xlu1 %1810 }
 0x331   : > { %v1822_v30 = vsel %vm5685_vm8, %v1811_v17, %v1813_v48  ;;  %v1844_v57 = vsel %vm5687_vm9, %v1833_v35, %v1835_v41  ;;  %vm5694_vm8 = vmmov %vm5683_vm1 }
 0x332   : > { %vm5696_vm9 = vmmov %vm5683_vm1 }
 0x333   : > { %1896 = vmatpush1.bf16.msra.mxu1 %v1734_v15 }
 0x334   : > { %v4956_v42 = vpop.permute.xlu0 %1770  ;;  %v4958_v37 = vpop.permute.xlu1 %1748 }
 0x335   : > { %v1757_v40 = vsel %vm5678_vm11, %v1747_v1, %v4958_v37  ;;  %v1779_v25 = vsel %vm5680_vm3, %v1769_v20, %v4956_v42  ;;  %vm5691_vm3 = vmmov %vm5678_vm11 }
 0x336   : > { %1897 = vmatprep.subr.bf16.mxu1 %v1757_v40 }
 0x337   : > { %1898 = vmatpush1.bf16.msra.mxu1 %v1756_v45 }
 0x338   : > { %v4965_v46 = vpop.permute.xlu0 %1814  ;;  %1899 = vmatprep.subr.bf16.mxu1 %v1779_v25  ;;  %v1857_v0 = vpop.permute.xlu1 %1856 }
 0x339   : > { %v1823_v13 = vsel %vm5684_vm2, %v1813_v48, %v4965_v46 }
 0x33b   : > { %1900 = vmatpush1.bf16.msra.mxu1 %v1778_v54 }
 0x33c   : > { %v4968_v32 = vpop.permute.xlu0 %1858  ;;  %v4970_v58 = vpop.permute.xlu1 %1792 }
 0x33d   : > { %v1801_v52 = vsel %vm5682_vm4, %v1791_v27, %v4970_v58  ;;  %v1867_v22 = vsel %vm1461_vm0, %v1857_v0, %v4968_v32  ;;  %vm5692_vm4 = vmmov %vm5681_vm6 }
 0x33e   : > { %1901 = vmatprep.subr.bf16.mxu1 %v1801_v52  ;;  %vm5693_vm2 = vmmov %vm5692_vm4 }
 0x33f   : > { %1902 = vmatpush1.bf16.msra.mxu1 %v1800_v56 }
 0x340   : > { %1903 = vmatprep.subr.bf16.mxu1 %v1823_v13  ;;  %v1855_v34 = vpop.permute.xlu1 %1854  ;;  %v1712_v9 = vpop.permute.xlu0 %1711 }
 0x341   : > { %v1866_v21 = vsel %vm1461_vm0, %v1855_v34, %v1857_v0  ;;  %v1717_v29 = vsel %vm5675_vm10, %v1710_v24, %v1712_v9  ;;  %vm5698_vm10 = vcmask 777216  }
 0x343   : > { %1904 = vmatpush1.bf16.msra.mxu1 %v1822_v30 }
 0x344   : > { %v4978_v51 = vpop.permute.xlu1 %1836  ;;  %v1731_v63 = vpop.permute.xlu0 %1730 }
 0x345   : > { %v1845_v4 = vsel %vm5686_vm7, %v1835_v41, %v4978_v51  ;;  %v1736_v26 = vsel %vm5677_vm13, %v4949_v10, %v1731_v63  ;;  %vm5695_vm7 = vcmask 785408   ;;  %vm5700_vm13 = vmmov %vm5698_vm10 }
 0x346   : > { %1905 = vmatprep.subr.bf16.mxu1 %v1845_v4 }
 0x347   : > { %1906 = vmatpush1.bf16.msra.mxu1 %v1844_v57 }
 0x348   : > { %1907 = vmatprep.subr.bf16.mxu1 %v1867_v22  ;;  %v1773_v31 = vpop.permute.xlu1 %1772  ;;  %v1751_v28 = vpop.permute.xlu0 %1750  ;;  %v5073_v22 = vld [vmem:[#allocation3 + $0x4] ss:$8 sps:$4 sm:$0xff]  }
 0x349   : > { %v1780_v62 = vsel %vm5692_vm4, %v4956_v42, %v1773_v31  ;;  %vm5704_vm4 = vcmask 1031168  }
 0x34b   : > { %1908 = vmatpush1.bf16.msra.mxu1 %v1866_v21 }
 0x34c   : > { %v1817_v3 = vpop.permute.xlu1 %1816  ;;  %v1795_v53 = vpop.permute.xlu0 %1794  ;;  %1977 = vmatprep.subr.bf16.mxu1 %v5645_v16 }
 0x34d   : > { %v1802_v38 = vsel %vm5694_vm8, %v4970_v58, %v1795_v53 }
 0x34e   : > { %1924 = vmatmul.mubr.bf16.vlgmr.msra.gmra.mrb[0].mxu1 %v4989_v19 }
 0x34f   : > { %1978 = vmatpush1.bf16.msra.mxu1 %v4915_v39  ;;  %2778 = vmatprep.mubr.msk.bf16.mxu1 %vm1887_vm5, %v4907_v44  ;;  %v1758_v39 = vsel %vm5691_vm3, %v4958_v37, %v1751_v28  ;;  %vm5702_vm3 = vcmask 1039360  }
 0x350   : > { %v1775_v5 = vpop.permute.xlu0 %1774  ;;  %v1714_v18 = vpop.permute.xlu1 %1713  ;;  %1979 = vmatprep.subr.bf16.mxu1 %v5645_v16 }
 0x351   : > { %v1718_v36 = vsel %vm5688_vm12, %v1712_v9, %v1714_v18  ;;  %v1781_v60 = vsel %vm5681_vm6, %v1773_v31, %v1775_v5  ;;  %vm5697_vm12 = vmmov %vm5695_vm7 }
 0x352   : > { %1936 = vmatprep.subr.bf16.mxu0 %v1718_v36  ;;  %v1824_v48 = vsel %vm5697_vm12, %v4965_v46, %v1817_v3  ;;  %vm5703_vm6 = vmmov %vm5702_vm3  ;;  %vm5710_vm12 = vcmask 900096  }
 0x353   : > { %1937 = vmatpush1.bf16.msra.mxu0 %v1717_v29  ;;  %1980 = vmatpush1.bf16.msra.mxu1 %v1714_v18 }
 0x354   : > { %v1733_v23 = vpop.permute.xlu1 %1732  ;;  %v1755_v50 = vpop.permute.xlu0 %1754  ;;  %1981 = vmatprep.subr.bf16.mxu1 %v5645_v16 }
 0x355   : > { %v1737_v6 = vsel %vm5689_vm15, %v1731_v63, %v1733_v23  ;;  %vm5699_vm15 = vmmov %vm5695_vm7 }
 0x356   : > { %1938 = vmatprep.subr.bf16.mxu0 %v1737_v6 }
 0x357   : > { %1939 = vmatpush1.bf16.msra.mxu0 %v1736_v26  ;;  %1982 = vmatpush1.bf16.msra.mxu1 %v1733_v23 }
 0x358   : > { %v1753_v44 = vpop.permute.xlu1 %1752  ;;  %v1819_v12 = vpop.permute.xlu0 %1818  ;;  %1983 = vmatprep.subr.bf16.mxu1 %v5645_v16 }
 0x359   : > { %v1760_v61 = vsel %vm5678_vm11, %v1753_v44, %v1755_v50  ;;  %v1759_v49 = vsel %vm5690_vm14, %v1751_v28, %v1753_v44  ;;  %v1825_v33 = vsel %vm5695_vm7, %v1817_v3, %v1819_v12  ;;  %vm5701_vm11 = vmmov %vm5698_vm10  ;;  %vm2027_vm14 = vcmask 982016  }
 0x35a   : > { %1940 = vmatprep.subr.bf16.mxu0 %v1759_v49  ;;  %vm5708_vm7 = vcmask 908288  }
 0x35b   : > { %1941 = vmatpush1.bf16.msra.mxu0 %v1758_v39  ;;  %1984 = vmatpush1.bf16.msra.mxu1 %v1760_v61 }
 0x35c   : > { %1942 = vmatprep.subr.bf16.mxu0 %v1781_v60  ;;  %v1797_v55 = vpop.permute.xlu1 %1796  ;;  %v1799_v14 = vpop.permute.xlu0 %1798  ;;  %1985 = vmatprep.subr.bf16.mxu1 %v5645_v16 }
 0x35d   : > { %v1803_v11 = vsel %vm5683_vm1, %v1795_v53, %v1797_v55  ;;  %v1804_v20 = vsel %vm5696_vm9, %v1797_v55, %v1799_v14  ;;  %vm5705_vm1 = vmmov %vm5704_vm4 }
 0x35e   : > { %vm5709_vm9 = vmmov %vm5708_vm7 }
 0x35f   : > { %1943 = vmatpush1.bf16.msra.mxu0 %v1780_v62 }
 0x360   : > { %1944 = vmatprep.subr.bf16.mxu0 %v1803_v11  ;;  %v1777_v7 = vpop.permute.xlu1 %1776  ;;  %v1839_v59 = vpop.permute.xlu0 %1838 }
 0x361   : > { %v1782_v47 = vsel %vm5693_vm2, %v1775_v5, %v1777_v7  ;;  %v1846_v43 = vsel %vm5700_vm13, %v4978_v51, %v1839_v59  ;;  %vm5706_vm2 = vcmask 916480   ;;  %vm5712_vm13 = vmmov %vm5699_vm15 }
 0x362   : > { %1986 = vmatpush1.bf16.msra.mxu1 %v1782_v47  ;;  %vm5707_vm8 = vmmov %vm5706_vm2 }
 0x363   : > { %1945 = vmatpush1.bf16.msra.mxu0 %v1802_v38  ;;  %1987 = vmatprep.subr.bf16.mxu1 %v5645_v16 }
 0x364   : > { %v1841_v1 = vpop.permute.xlu1 %1840  ;;  %1946 = vmatprep.subr.bf16.mxu0 %v1825_v33  ;;  %v1843_v27 = vpop.permute.xlu0 %1842 }
 0x365   : > { %v1847_v41 = vsel %vm5698_vm10, %v1839_v59, %v1841_v1  ;;  %v1848_v35 = vsel %vm5701_vm11, %v1841_v1, %v1843_v27  ;;  %vm5711_vm10 = vmmov %vm5710_vm12 }
 0x366   : > { %1988 = vmatpush1.bf16.msra.mxu1 %v1804_v20  ;;  %vm5713_vm11 = vmmov %vm5702_vm3 }
 0x367   : > { %1947 = vmatpush1.bf16.msra.mxu0 %v1824_v48  ;;  %1989 = vmatprep.subr.bf16.mxu1 %v5645_v16 }
 0x368   : > { %v1821_v10 = vpop.permute.xlu1 %1820  ;;  %1948 = vmatprep.subr.bf16.mxu0 %v1847_v41  ;;  %v1863_v8 = vpop.permute.xlu0 %1862 }
 0x369   : > { %v1826_v24 = vsel %vm5699_vm15, %v1819_v12, %v1821_v10 }
 0x36a   : > { %1990 = vmatpush1.bf16.msra.mxu1 %v1826_v24 }
 0x36b   : > { %1949 = vmatpush1.bf16.msra.mxu0 %v1846_v43  ;;  %1991 = vmatprep.subr.bf16.mxu1 %v5645_v16 }
 0x36c   : > { %v1861_v2 = vpop.permute.xlu1 %1860 }
 0x36d   : > { %v1868_v17 = vsel %vm1461_vm0, %v4968_v32, %v1861_v2  ;;  %v1869_v15 = vsel %vm1461_vm0, %v1861_v2, %v1863_v8 }
 0x36e   : > { %1950 = vmatprep.subr.bf16.mxu0 %v1869_v15  ;;  %1992 = vmatpush1.bf16.msra.mxu1 %v1848_v35 }
 0x36f   : > { %1951 = vmatpush1.bf16.msra.mxu0 %v1868_v17  ;;  %1993 = vmatprep.subr.bf16.mxu1 %v5645_v16 }
 0x370   : > { %v1865_v42 = vpop.permute.xlu1 %1864 }
 0x371   : > { %v1870_v37 = vsel %vm1461_vm0, %v1863_v8, %v1865_v42 }
 0x372   : > { %1967 = vmatmul.mubr.bf16.vlgmr.msra.gmra.mrb[12].mxu0 %v4989_v19  ;;  %1994 = vmatpush1.bf16.msra.mxu1 %v1870_v37 }
 0x373   : > { %2781 = vmatprep.mubr.msk.bf16.mxu0 %vm1887_vm5, %v5073_v22 }
 0x375   : > { %2010 = vmatmul.mubr.bf16.vlgmr.msra.gmra.mrb[4].mxu1 %v4989_v19 }
 0x376   : > { %2782 = vmatprep.mubr.msk.bf16.mxu1 %vm1887_vm5, %v5073_v22 }
 0x421   : > { %v1925_v40 = vpop.f32.mrb[0].mxu1 }
 0x422   : > { %v1927_v45 = vpop.f32.mrb[1].mxu1 }
 0x423   : > { %v1929_v25 = vpop.f32.mrb[2].mxu1 }
 0x424   : > { %v2018_v46 = vpack.c.bf16 %v1929_v25, %v1925_v40  ;;  %v1931_v0 = vpop.f32.mrb[3].mxu1 }
 0x425   : > { %v2019_v54 = vpack.c.bf16 %v1931_v0, %v1927_v45 }
 0x426   : > { %2058 = vrot.lane.b32.xlu1 %v2018_v46, %s3155_s11  ;;  %2039 = vrot.lane.b32.xlu0 %v2018_v46, %s3156_s12 }
 0x427   : > { %2205 = vmatprep.subr.bf16.mxu0 %v2019_v54 }
 0x428   : > { %2206 = vmatpush1.bf16.msra.mxu0 %v2018_v46 }
 0x42a   : > { %2096 = vrot.lane.b32.xlu1 %v2018_v46, %s3162_s23  ;;  %2077 = vrot.lane.b32.xlu0 %v2018_v46, %s3160_s16 }
 0x42e   : > { %2134 = vrot.lane.b32.xlu1 %v2018_v46, %s3169_s9  ;;  %2115 = vrot.lane.b32.xlu0 %v2018_v46, %s3164_s26 }
 0x432   : > { %2060 = vrot.lane.b32.xlu1 %v2019_v54, %s3155_s11  ;;  %2041 = vrot.lane.b32.xlu0 %v2019_v54, %s3156_s12 }
 0x436   : > { %2098 = vrot.lane.b32.xlu1 %v2019_v54, %s3162_s23  ;;  %2079 = vrot.lane.b32.xlu0 %v2019_v54, %s3160_s16 }
 0x43a   : > { %2136 = vrot.lane.b32.xlu1 %v2019_v54, %s3169_s9  ;;  %2117 = vrot.lane.b32.xlu0 %v2019_v54, %s3164_s26 }
 0x445   : > { %v1968_v32 = vpop.f32.mrb[12].mxu0 }
 0x446   : > { %v1970_v58 = vpop.f32.mrb[13].mxu0 }
 0x447   : > { %v1972_v52 = vpop.f32.mrb[14].mxu0 }
 0x448   : > { %v2020_v56 = vpack.c.bf16 %v1972_v52, %v1968_v32  ;;  %v1974_v13 = vpop.f32.mrb[15].mxu0  ;;  %v2011_v34 = vpop.f32.mrb[4].mxu1 }
 0x449   : > { %v2021_v9 = vpack.c.bf16 %v1974_v13, %v1970_v58  ;;  %v2013_v30 = vpop.f32.mrb[5].mxu1 }
 0x44a   : > { %2062 = vrot.lane.b32.xlu0 %v2020_v56, %s3155_s11  ;;  %2043 = vrot.lane.b32.xlu1 %v2020_v56, %s3156_s12  ;;  %v2014_v51 = vpop.f32.mrb[6].mxu1 }
 0x44b   : > { %2248 = vmatprep.subr.bf16.mxu1 %v2021_v9  ;;  %v2022_v63 = vpack.c.bf16 %v2014_v51, %v2011_v34  ;;  %v2016_v4 = vpop.f32.mrb[7].mxu1 }
 0x44c   : > { %2249 = vmatpush1.bf16.msra.mxu1 %v2020_v56 }
 0x44d   : > { %2028 = vst.msk [vmem:[#allocation2 + $0x20] sm:$0xff] %vm2027_vm14, %v2022_v63  ;;  %vm5714_vm14 = vmmov %vm5702_vm3 }
 0x44e   : > { %2100 = vrot.lane.b32.xlu0 %v2020_v56, %s3162_s23  ;;  %2081 = vrot.lane.b32.xlu1 %v2020_v56, %s3160_s16 }
 0x452   : > { %2138 = vrot.lane.b32.xlu0 %v2020_v56, %s3169_s9  ;;  %2119 = vrot.lane.b32.xlu1 %v2020_v56, %s3164_s26 }
 0x454   : > { %v5059_v57 = vld [vmem:[#allocation2 + $0x20] sm:$0xff] }
 0x456   : > { %2064 = vrot.lane.b32.xlu0 %v2021_v9, %s3155_s11  ;;  %2045 = vrot.lane.b32.xlu1 %v2021_v9, %s3156_s12 }
 0x45a   : > { %2102 = vrot.lane.b32.xlu0 %v2021_v9, %s3162_s23  ;;  %2083 = vrot.lane.b32.xlu1 %v2021_v9, %s3160_s16 }
 0x45e   : > { %2140 = vrot.lane.b32.xlu0 %v2021_v9, %s3169_s9  ;;  %2121 = vrot.lane.b32.xlu1 %v2021_v9, %s3164_s26 }
 0x462   : > { %2047 = vrot.lane.b32.xlu0 %v5059_v57, %s3156_s12  ;;  %2157 = vrot.lane.b32.xlu1 %v2020_v56, %s3171_s7 }
 0x466   : > { %2155 = vrot.lane.b32.xlu0 %v2019_v54, %s3171_s7  ;;  %2066 = vrot.lane.b32.xlu1 %v5059_v57, %s3155_s11 }
 0x46a   : > { %2085 = vrot.lane.b32.xlu0 %v5059_v57, %s3160_s16  ;;  %2159 = vrot.lane.b32.xlu1 %v2021_v9, %s3171_s7 }
 0x46e   : > { %2153 = vrot.lane.b32.xlu0 %v2018_v46, %s3171_s7  ;;  %2104 = vrot.lane.b32.xlu1 %v5059_v57, %s3162_s23 }
 0x472   : > { %2123 = vrot.lane.b32.xlu0 %v5059_v57, %s3164_s26  ;;  %2174 = vrot.lane.b32.xlu1 %v2019_v54, %s3177_s8 }
 0x476   : > { %2176 = vrot.lane.b32.xlu0 %v2020_v56, %s3177_s8  ;;  %2142 = vrot.lane.b32.xlu1 %v5059_v57, %s3169_s9 }
 0x47a   : > { %2161 = vrot.lane.b32.xlu0 %v5059_v57, %s3171_s7  ;;  %2172 = vrot.lane.b32.xlu1 %v2018_v46, %s3177_s8 }
 0x47e   : > { %2178 = vrot.lane.b32.xlu0 %v2021_v9, %s3177_s8  ;;  %2180 = vrot.lane.b32.xlu1 %v5059_v57, %s3177_s8 }
 0x498   : > { %v2059_v31 = vpop.permute.xlu1 %2058  ;;  %v2040_v28 = vpop.permute.xlu0 %2039 }
 0x49c   : > { %v2097_v21 = vpop.permute.xlu1 %2096  ;;  %v2078_v19 = vpop.permute.xlu0 %2077 }
 0x4a0   : > { %v2135_v3 = vpop.permute.xlu1 %2134  ;;  %v2116_v53 = vpop.permute.xlu0 %2115 }
 0x4a4   : > { %v2061_v5 = vpop.permute.xlu1 %2060  ;;  %v2042_v18 = vpop.permute.xlu0 %2041 }
 0x4a5   : > { %v2049_v12 = vsel %vm5703_vm6, %v2040_v28, %v2042_v18  ;;  %v2068_v60 = vsel %vm5705_vm1, %v2059_v31, %v2061_v5  ;;  %vm5716_vm6 = vmmov %vm5705_vm1 }
 0x4a8   : > { %v2099_v36 = vpop.permute.xlu1 %2098  ;;  %v2080_v29 = vpop.permute.xlu0 %2079 }
 0x4a9   : > { %v2087_v11 = vsel %vm5707_vm8, %v2078_v19, %v2080_v29  ;;  %v2106_v38 = vsel %vm5709_vm9, %v2097_v21, %v2099_v36  ;;  %vm5721_vm9 = vmmov %vm5708_vm7 }
 0x4ac   : > { %v2137_v23 = vpop.permute.xlu1 %2136  ;;  %v2118_v50 = vpop.permute.xlu0 %2117 }
 0x4ad   : > { %v2125_v27 = vsel %vm5711_vm10, %v2116_v53, %v2118_v50  ;;  %v2144_v24 = vsel %vm5712_vm13, %v2135_v3, %v2137_v23 }
 0x4bc   : > { %v2044_v6 = vpop.permute.xlu1 %2043  ;;  %v2063_v26 = vpop.permute.xlu0 %2062 }
 0x4bd   : > { %v2050_v44 = vsel %vm5702_vm3, %v2042_v18, %v2044_v6  ;;  %v2069_v61 = vsel %vm5704_vm4, %v2061_v5, %v2063_v26  ;;  %vm5715_vm3 = vcmask 777216   ;;  %vm5717_vm4 = vmmov %vm5705_vm1  ;;  %v3053_v5 = vld [vmem:[#allocation3] ss:$8 sps:$4 sm:$0xff]  }
 0x4be   : > { %2207 = vmatprep.subr.bf16.mxu0 %v2050_v44  ;;  %vm5718_vm1 = vmmov %vm5706_vm2 }
 0x4bf   : > { %2208 = vmatpush1.bf16.msra.mxu0 %v2049_v12  ;;  %vm5720_vm8 = vmmov %vm5715_vm3 }
 0x4c0   : > { %v2082_v49 = vpop.permute.xlu1 %2081  ;;  %2209 = vmatprep.subr.bf16.mxu0 %v2069_v61  ;;  %v2101_v39 = vpop.permute.xlu0 %2100 }
 0x4c1   : > { %v2088_v55 = vsel %vm5706_vm2, %v2080_v29, %v2082_v49  ;;  %v2107_v7 = vsel %vm5708_vm7, %v2099_v36, %v2101_v39  ;;  %vm5719_vm2 = vmmov %vm5718_vm1 }
 0x4c3   : > { %2210 = vmatpush1.bf16.msra.mxu0 %v2068_v60 }
 0x4c4   : > { %v2120_v14 = vpop.permute.xlu1 %2119  ;;  %2211 = vmatprep.subr.bf16.mxu0 %v2088_v55  ;;  %v2139_v62 = vpop.permute.xlu0 %2138 }
 0x4c5   : > { %v2126_v33 = vsel %vm5710_vm12, %v2118_v50, %v2120_v14  ;;  %v2145_v48 = vsel %vm5699_vm15, %v2137_v23, %v2139_v62  ;;  %vm5722_vm12 = vmmov %vm5711_vm10 }
 0x4c6   : > { %vm5723_vm15 = vmmov %vm5712_vm13 }
 0x4c7   : > { %2212 = vmatpush1.bf16.msra.mxu0 %v2087_v11 }
 0x4c8   : > { %v2046_v59 = vpop.permute.xlu1 %2045  ;;  %2213 = vmatprep.subr.bf16.mxu0 %v2107_v7  ;;  %v2065_v47 = vpop.permute.xlu0 %2064 }
 0x4c9   : > { %v2051_v35 = vsel %vm5714_vm14, %v2044_v6, %v2046_v59  ;;  %v2070_v40 = vsel %vm5717_vm4, %v2063_v26, %v2065_v47  ;;  %vm5725_vm14 = vmmov %vm5715_vm3 }
 0x4cb   : > { %2214 = vmatpush1.bf16.msra.mxu0 %v2106_v38  ;;  %v5156_v38 = vld.sshfl [vmem:[%s5323_s4] sm:$0x11 pattern:$0x75316420] }
 0x4cc   : > { %v2084_v1 = vpop.permute.xlu1 %2083  ;;  %2215 = vmatprep.subr.bf16.mxu0 %v2126_v33  ;;  %v2103_v20 = vpop.permute.xlu0 %2102  ;;  %v2514_v33 = vcombine.high %v5156_v38, %v5156_v38 }
 0x4cd   : > { %v2089_v0 = vsel %vm5719_vm2, %v2082_v49, %v2084_v1  ;;  %v2108_v56 = vsel %vm5721_vm9, %v2101_v39, %v2103_v20 }
 0x4cf   : > { %2216 = vmatpush1.bf16.msra.mxu0 %v2125_v27 }
 0x4d0   : > { %v2122_v41 = vpop.permute.xlu1 %2121  ;;  %2217 = vmatprep.subr.bf16.mxu0 %v2145_v48  ;;  %v2141_v10 = vpop.permute.xlu0 %2140 }
 0x4d1   : > { %v2127_v30 = vsel %vm5711_vm10, %v2120_v14, %v2122_v41  ;;  %v2146_v28 = vsel %vm5712_vm13, %v2139_v62, %v2141_v10 }
 0x4d3   : > { %2218 = vmatpush1.bf16.msra.mxu0 %v2144_v24 }
 0x4d4   : > { %v2158_v43 = vpop.permute.xlu1 %2157  ;;  %v2048_v8 = vpop.permute.xlu0 %2047 }
 0x4d5   : > { %v2052_v2 = vsel %vm5713_vm11, %v2046_v59, %v2048_v8  ;;  %vm5724_vm11 = vmmov %vm5715_vm3 }
 0x4d6   : > { %2250 = vmatprep.subr.bf16.mxu1 %v2052_v2 }
 0x4d7   : > { %2251 = vmatpush1.bf16.msra.mxu1 %v2051_v35 }
 0x4d8   : > { %v2067_v17 = vpop.permute.xlu1 %2066  ;;  %v2156_v15 = vpop.permute.xlu0 %2155 }
 0x4d9   : > { %v2164_v42 = vsel %vm5715_vm3, %v2156_v15, %v2158_v43  ;;  %v2071_v37 = vsel %vm5716_vm6, %v2065_v47, %v2067_v17  ;;  %vm2341_vm3 = vcmask 703488   ;;  %vm5727_vm6 = vcmask 1039360  }
 0x4da   : > { %2219 = vmatprep.subr.bf16.mxu0 %v2164_v42  ;;  %2252 = vmatprep.subr.bf16.mxu1 %v2071_v37  ;;  %vm5728_vm4 = vmmov %vm5727_vm6 }
 0x4db   : > { %2253 = vmatpush1.bf16.msra.mxu1 %v2070_v40 }
 0x4dc   : > { %v2160_v45 = vpop.permute.xlu1 %2159  ;;  %v2086_v25 = vpop.permute.xlu0 %2085 }
 0x4dd   : > { %v2090_v46 = vsel %vm5718_vm1, %v2084_v1, %v2086_v25  ;;  %v2165_v18 = vsel %vm5725_vm14, %v2158_v43, %v2160_v45  ;;  %v5726_v1 = vld [vmem:[#allocation9_spill] sm:$0xff]  ;;  %vm5729_vm1 = vcmask 1031168  }
 0x4de   : > { %2254 = vmatprep.subr.bf16.mxu1 %v2090_v46  ;;  %vm5730_vm2 = vmmov %vm5729_vm1 }
 0x4df   : > { %2255 = vmatpush1.bf16.msra.mxu1 %v2089_v0 }
 0x4e0   : > { %v2105_v54 = vpop.permute.xlu1 %2104  ;;  %v2154_v32 = vpop.permute.xlu0 %2153 }
 0x4e1   : > { %v2163_v58 = vsel %vm5720_vm8, %v2154_v32, %v2156_v15  ;;  %v2109_v52 = vsel %vm5708_vm7, %v2103_v20, %v2105_v54  ;;  %v5163_v20 = vrot.slane %v2514_v33, %v5726_v1  ;;  %vm5731_vm8 = vcmask 916480  }
 0x4e2   : > { %2220 = vmatpush1.bf16.msra.mxu0 %v2163_v58  ;;  %2256 = vmatprep.subr.bf16.mxu1 %v2109_v52  ;;  %vm5732_vm7 = vmmov %vm5731_vm8 }
 0x4e3   : > { %2257 = vmatpush1.bf16.msra.mxu1 %v2108_v56 }
 0x4e4   : > { %v2175_v13 = vpop.permute.xlu1 %2174  ;;  %v2124_v34 = vpop.permute.xlu0 %2123 }
 0x4e5   : > { %v2128_v9 = vsel %vm5722_vm12, %v2122_v41, %v2124_v34  ;;  %vm5733_vm12 = vmmov %vm5721_vm9 }
 0x4e6   : > { %2258 = vmatprep.subr.bf16.mxu1 %v2128_v9 }
 0x4e7   : > { %2259 = vmatpush1.bf16.msra.mxu1 %v2127_v30 }
 0x4e8   : > { %v2143_v51 = vpop.permute.xlu1 %2142  ;;  %v2177_v63 = vpop.permute.xlu0 %2176 }
 0x4e9   : > { %v2183_v4 = vsel %vm1461_vm0, %v2175_v13, %v2177_v63  ;;  %v2147_v31 = vsel %vm5723_vm15, %v2141_v10, %v2143_v51  ;;  %vm5734_vm15 = vmmov %vm5711_vm10 }
 0x4ea   : > { %2221 = vmatprep.subr.bf16.mxu0 %v2183_v4  ;;  %2260 = vmatprep.subr.bf16.mxu1 %v2147_v31 }
 0x4eb   : > { %2261 = vmatpush1.bf16.msra.mxu1 %v2146_v28 }
 0x4ec   : > { %v2173_v21 = vpop.permute.xlu1 %2172  ;;  %v2162_v19 = vpop.permute.xlu0 %2161 }
 0x4ed   : > { %v2182_v3 = vsel %vm1461_vm0, %v2173_v21, %v2175_v13  ;;  %v2166_v53 = vsel %vm5724_vm11, %v2160_v45, %v2162_v19  ;;  %vm5735_vm11 = vmmov %vm5712_vm13 }
 0x4ee   : > { %2222 = vmatpush1.bf16.msra.mxu0 %v2182_v3  ;;  %2262 = vmatprep.subr.bf16.mxu1 %v2166_v53 }
 0x4ef   : > { %2263 = vmatpush1.bf16.msra.mxu1 %v2165_v18  ;;  %2291 = vmatprep.subr.bf16.mxu0 %v5645_v16 }
 0x4f0   : > { %v2181_v36 = vpop.permute.xlu1 %2180  ;;  %v2179_v29 = vpop.permute.xlu0 %2178 }
 0x4f1   : > { %v2184_v23 = vsel %vm1461_vm0, %v2177_v63, %v2179_v29  ;;  %2238 = vmatmul.mubr.bf16.vlgmr.msra.gmra.mrb[16].mxu0 %v3053_v5  ;;  %v2185_v50 = vsel %vm1461_vm0, %v2179_v29, %v2181_v36 }
 0x4f2   : > { %2264 = vmatprep.subr.bf16.mxu1 %v2185_v50  ;;  %2292 = vmatpush1.bf16.msra.mxu0 %v5059_v57  ;;  %v5232_v50 = vrot.slane %v5156_v38, %v5726_v1 }
 0x4f3   : > { %2265 = vmatpush1.bf16.msra.mxu1 %v2184_v23  ;;  %2293 = vmatprep.subr.bf16.mxu0 %v5645_v16 }
 0x4f4   : > { %2783 = vmatprep.mubr.msk.bf16.mxu0 %vm1887_vm5, %v5073_v22 }
 0x4f6   : > { %2294 = vmatpush1.bf16.msra.mxu0 %v2048_v8  ;;  %2281 = vmatmul.mubr.bf16.vlgmr.msra.gmra.mrb[8].mxu1 %v3053_v5 }
 0x4f7   : > { %2295 = vmatprep.subr.bf16.mxu0 %v5645_v16  ;;  %2785 = vmatprep.mubr.msk.bf16.mxu1 %vm1887_vm5, %v5163_v20 }
 0x4fa   : > { %2296 = vmatpush1.bf16.msra.mxu0 %v2067_v17 }
 0x4fb   : > { %2297 = vmatprep.subr.bf16.mxu0 %v5645_v16 }
 0x4fe   : > { %2298 = vmatpush1.bf16.msra.mxu0 %v2086_v25 }
 0x4ff   : > { %2299 = vmatprep.subr.bf16.mxu0 %v5645_v16 }
 0x502   : > { %2300 = vmatpush1.bf16.msra.mxu0 %v2105_v54 }
 0x503   : > { %2301 = vmatprep.subr.bf16.mxu0 %v5645_v16 }
 0x506   : > { %2302 = vmatpush1.bf16.msra.mxu0 %v2124_v34 }
 0x507   : > { %2303 = vmatprep.subr.bf16.mxu0 %v5645_v16 }
 0x50a   : > { %2304 = vmatpush1.bf16.msra.mxu0 %v2143_v51 }
 0x50b   : > { %2305 = vmatprep.subr.bf16.mxu0 %v5645_v16 }
 0x50e   : > { %2306 = vmatpush1.bf16.msra.mxu0 %v2162_v19 }
 0x50f   : > { %2307 = vmatprep.subr.bf16.mxu0 %v5645_v16 }
 0x512   : > { %2308 = vmatpush1.bf16.msra.mxu0 %v2181_v36 }
 0x515   : > { %2324 = vmatmul.mubr.bf16.vlgmr.msra.gmra.mrb[20].mxu0 %v3053_v5 }
 0x516   : > { %2786 = vmatprep.mubr.msk.bf16.mxu0 %vm1887_vm5, %v5163_v20 }
 0x5c4   : > { %v2239_v57 = vpop.f32.mrb[16].mxu0 }
 0x5c5   : > { %v2241_v22 = vpop.f32.mrb[17].mxu0 }
 0x5c6   : > { %v2243_v6 = vpop.f32.mrb[18].mxu0 }
 0x5c7   : > { %v2332_v26 = vpack.c.bf16 %v2243_v6, %v2239_v57  ;;  %v2245_v44 = vpop.f32.mrb[19].mxu0 }
 0x5c8   : > { %v2333_v12 = vpack.c.bf16 %v2245_v44, %v2241_v22 }
 0x5c9   : > { %v2282_v61 = vpop.f32.mrb[8].mxu1  ;;  %2372 = vrot.lane.b32.xlu1 %v2332_v26, %s3155_s11  ;;  %2353 = vrot.lane.b32.xlu0 %v2332_v26, %s3156_s12 }
 0x5ca   : > { %v2284_v49 = vpop.f32.mrb[9].mxu1  ;;  %2533 = vmatprep.subr.bf16.mxu1 %v2333_v12 }
 0x5cb   : > { %v2286_v39 = vpop.f32.mrb[10].mxu1  ;;  %2534 = vmatpush1.bf16.msra.mxu1 %v2332_v26 }
 0x5cc   : > { %v2334_v60 = vpack.c.bf16 %v2286_v39, %v2282_v61  ;;  %v2288_v55 = vpop.f32.mrb[11].mxu1 }
 0x5cd   : > { %v2335_v14 = vpack.c.bf16 %v2288_v55, %v2284_v49  ;;  %2391 = vrot.lane.b32.xlu0 %v2332_v26, %s3160_s16  ;;  %2374 = vrot.lane.b32.xlu1 %v2333_v12, %s3155_s11 }
 0x5cf   : > { %2573 = vmatprep.subr.bf16.mxu0 %v2335_v14 }
 0x5d0   : > { %2574 = vmatpush1.bf16.msra.mxu0 %v2334_v60 }
 0x5d1   : > { %2412 = vrot.lane.b32.xlu1 %v2333_v12, %s3162_s23  ;;  %2355 = vrot.lane.b32.xlu0 %v2333_v12, %s3156_s12 }
 0x5d5   : > { %2393 = vrot.lane.b32.xlu0 %v2333_v12, %s3160_s16  ;;  %2357 = vrot.lane.b32.xlu1 %v2334_v60, %s3156_s12 }
 0x5d9   : > { %2431 = vrot.lane.b32.xlu0 %v2333_v12, %s3164_s26  ;;  %2410 = vrot.lane.b32.xlu1 %v2332_v26, %s3162_s23 }
 0x5dd   : > { %2376 = vrot.lane.b32.xlu0 %v2334_v60, %s3155_s11  ;;  %2395 = vrot.lane.b32.xlu1 %v2334_v60, %s3160_s16 }
 0x5e1   : > { %2429 = vrot.lane.b32.xlu0 %v2332_v26, %s3164_s26  ;;  %2450 = vrot.lane.b32.xlu1 %v2333_v12, %s3169_s9 }
 0x5e5   : > { %2414 = vrot.lane.b32.xlu0 %v2334_v60, %s3162_s23  ;;  %2433 = vrot.lane.b32.xlu1 %v2334_v60, %s3164_s26 }
 0x5e8   : > { %v2325_v62 = vpop.f32.mrb[20].mxu0 }
 0x5e9   : > { %2469 = vrot.lane.b32.xlu0 %v2333_v12, %s3171_s7  ;;  %2448 = vrot.lane.b32.xlu1 %v2332_v26, %s3169_s9  ;;  %v2327_v11 = vpop.f32.mrb[21].mxu0 }
 0x5ea   : > { %v2328_v7 = vpop.f32.mrb[22].mxu0 }
 0x5eb   : > { %v2336_v59 = vpack.c.bf16 %v2328_v7, %v2325_v62  ;;  %v2330_v47 = vpop.f32.mrb[23].mxu0 }
 0x5ed   : > { %2342 = vst.msk [vmem:[#allocation2 + $0x20] sm:$0xff] %vm2341_vm3, %v2336_v59  ;;  %2452 = vrot.lane.b32.xlu0 %v2334_v60, %s3169_s9  ;;  %2471 = vrot.lane.b32.xlu1 %v2334_v60, %s3171_s7  ;;  %vm5736_vm3 = vmmov %vm5725_vm14 }
 0x5f1   : > { %2467 = vrot.lane.b32.xlu0 %v2332_v26, %s3171_s7  ;;  %2488 = vrot.lane.b32.xlu1 %v2333_v12, %s3177_s8 }
 0x5f4   : > { %v5173_v27 = vld [vmem:[#allocation2 + $0x20] sm:$0xff] }
 0x5f5   : > { %2490 = vrot.lane.b32.xlu0 %v2334_v60, %s3177_s8  ;;  %2486 = vrot.lane.b32.xlu1 %v2332_v26, %s3177_s8 }
 0x5f9   : > { %2361 = vrot.lane.b32.xlu1 %v5173_v27, %s3156_s12  ;;  %2359 = vrot.lane.b32.xlu0 %v2335_v14, %s3156_s12  ;;  %s3182_s12 = smov 6  }
 0x5fd   : > { %2380 = vrot.lane.b32.xlu1 %v5173_v27, %s3155_s11  ;;  %2378 = vrot.lane.b32.xlu0 %v2335_v14, %s3155_s11  ;;  %s3181_s11 = smov 105  }
 0x601   : > { %2399 = vrot.lane.b32.xlu1 %v5173_v27, %s3160_s16  ;;  %2397 = vrot.lane.b32.xlu0 %v2335_v14, %s3160_s16  ;;  %s3183_s16 = smov 12  }
 0x605   : > { %2418 = vrot.lane.b32.xlu1 %v5173_v27, %s3162_s23  ;;  %2416 = vrot.lane.b32.xlu0 %v2335_v14, %s3162_s23 }
 0x609   : > { %2437 = vrot.lane.b32.xlu1 %v5173_v27, %s3164_s26  ;;  %2435 = vrot.lane.b32.xlu0 %v2335_v14, %s3164_s26  ;;  %s228_s26 = sand.u32 1, %s3140_s19  }
 0x60d   : > { %2456 = vrot.lane.b32.xlu1 %v5173_v27, %s3169_s9  ;;  %2454 = vrot.lane.b32.xlu0 %v2335_v14, %s3169_s9 }
 0x611   : > { %2475 = vrot.lane.b32.xlu1 %v5173_v27, %s3171_s7  ;;  %2473 = vrot.lane.b32.xlu0 %v2335_v14, %s3171_s7  ;;  %s229_s7 = scalar_lea.vmem [#allocation6], %s228_s26 }
 0x615   : > { %2494 = vrot.lane.b32.xlu1 %v5173_v27, %s3177_s8  ;;  %2492 = vrot.lane.b32.xlu0 %v2335_v14, %s3177_s8 }
 0x63b   : > { %v2373_v48 = vpop.permute.xlu1 %2372  ;;  %v2354_v41 = vpop.permute.xlu0 %2353 }
 0x63f   : > { %v2375_v10 = vpop.permute.xlu1 %2374  ;;  %v2392_v24 = vpop.permute.xlu0 %2391 }
 0x640   : > { %v2382_v46 = vsel %vm5730_vm2, %v2373_v48, %v2375_v10  ;;  %vm5738_vm2 = vmmov %vm5729_vm1 }
 0x643   : > { %v2413_v43 = vpop.permute.xlu1 %2412  ;;  %v2356_v8 = vpop.permute.xlu0 %2355 }
 0x644   : > { %v2363_v15 = vsel %vm5728_vm4, %v2354_v41, %v2356_v8 }
 0x647   : > { %v2358_v2 = vpop.permute.xlu1 %2357  ;;  %v2394_v35 = vpop.permute.xlu0 %2393 }
 0x648   : > { %v2364_v17 = vsel %vm5727_vm6, %v2356_v8, %v2358_v2  ;;  %v2401_v58 = vsel %vm5732_vm7, %v2392_v24, %v2394_v35  ;;  %vm5737_vm6 = vmmov %vm5728_vm4 }
 0x649   : > { %2535 = vmatprep.subr.bf16.mxu1 %v2364_v17 }
 0x64a   : > { %2536 = vmatpush1.bf16.msra.mxu1 %v2363_v15 }
 0x64b   : > { %v2411_v42 = vpop.permute.xlu1 %2410  ;;  %v2432_v37 = vpop.permute.xlu0 %2431 }
 0x64c   : > { %v2420_v34 = vsel %vm5733_vm12, %v2411_v42, %v2413_v43  ;;  %vm5742_vm12 = vmmov %vm5711_vm10 }
 0x64f   : > { %v5201_v40 = vpop.permute.xlu1 %2395  ;;  %v2377_v45 = vpop.permute.xlu0 %2376 }
 0x650   : > { %v2383_v25 = vsel %vm5729_vm1, %v2375_v10, %v2377_v45  ;;  %v2402_v0 = vsel %vm5731_vm8, %v2394_v35, %v5201_v40  ;;  %vm5739_vm8 = vmmov %vm5732_vm7 }
 0x651   : > { %2537 = vmatprep.subr.bf16.mxu1 %v2383_v25 }
 0x652   : > { %2538 = vmatpush1.bf16.msra.mxu1 %v2382_v46 }
 0x653   : > { %v2451_v54 = vpop.permute.xlu1 %2450  ;;  %2539 = vmatprep.subr.bf16.mxu1 %v2402_v0  ;;  %v2430_v32 = vpop.permute.xlu0 %2429 }
 0x654   : > { %v2439_v63 = vsel %vm5734_vm15, %v2430_v32, %v2432_v37  ;;  %vm5743_vm15 = vmmov %vm5735_vm11 }
 0x656   : > { %2540 = vmatpush1.bf16.msra.mxu1 %v2401_v58 }
 0x657   : > { %v5208_v52 = vpop.permute.xlu1 %2433  ;;  %v2415_v56 = vpop.permute.xlu0 %2414 }
 0x658   : > { %v2421_v13 = vsel %vm5721_vm9, %v2413_v43, %v2415_v56  ;;  %v2440_v9 = vsel %vm5711_vm10, %v2432_v37, %v5208_v52 }
 0x659   : > { %2541 = vmatprep.subr.bf16.mxu1 %v2421_v13 }
 0x65a   : > { %2542 = vmatpush1.bf16.msra.mxu1 %v2420_v34 }
 0x65b   : > { %v2449_v30 = vpop.permute.xlu1 %2448  ;;  %2543 = vmatprep.subr.bf16.mxu1 %v2440_v9  ;;  %v2470_v51 = vpop.permute.xlu0 %2469 }
 0x65c   : > { %v2458_v21 = vsel %vm5735_vm11, %v2449_v30, %v2451_v54 }
 0x65e   : > { %2544 = vmatpush1.bf16.msra.mxu1 %v2439_v63 }
 0x65f   : > { %v5215_v4 = vpop.permute.xlu1 %2471  ;;  %v5217_v31 = vpop.permute.xlu0 %2452 }
 0x660   : > { %v2459_v28 = vsel %vm5712_vm13, %v2451_v54, %v5217_v31  ;;  %v2478_v19 = vsel %vm5725_vm14, %v2470_v51, %v5215_v4  ;;  %vm5744_vm13 = vmmov %vm5735_vm11 }
 0x661   : > { %2545 = vmatprep.subr.bf16.mxu1 %v2459_v28  ;;  %vm5745_vm11 = vmmov %vm5736_vm3 }
 0x662   : > { %2546 = vmatpush1.bf16.msra.mxu1 %v2458_v21  ;;  %vm5746_vm14 = vmmov %vm5736_vm3 }
 0x663   : > { %v2489_v3 = vpop.permute.xlu1 %2488  ;;  %2547 = vmatprep.subr.bf16.mxu1 %v2478_v19  ;;  %v2468_v53 = vpop.permute.xlu0 %2467 }
 0x664   : > { %v2477_v5 = vsel %vm5736_vm3, %v2468_v53, %v2470_v51  ;;  %vm2673_vm3 = vcmask 48128  }
 0x666   : > { %2548 = vmatpush1.bf16.msra.mxu1 %v2477_v5 }
 0x667   : > { %v2487_v18 = vpop.permute.xlu1 %2486  ;;  %v5225_v36 = vpop.permute.xlu0 %2490 }
 0x668   : > { %v2496_v29 = vsel %vm1461_vm0, %v2487_v18, %v2489_v3  ;;  %v2497_v23 = vsel %vm1461_vm0, %v2489_v3, %v5225_v36 }
 0x669   : > { %2549 = vmatprep.subr.bf16.mxu1 %v2497_v23 }
 0x66a   : > { %2550 = vmatpush1.bf16.msra.mxu1 %v2496_v29 }
 0x66b   : > { %v2362_v57 = vpop.permute.xlu1 %2361  ;;  %v2360_v22 = vpop.permute.xlu0 %2359  ;;  %2613 = vmatprep.subr.bf16.mxu1 %v5645_v16 }
 0x66c   : > { %v2365_v6 = vsel %vm5737_vm6, %v2358_v2, %v2360_v22  ;;  %v2366_v26 = vsel %vm5728_vm4, %v2360_v22, %v2362_v57  ;;  %vm2675_vm6 = vcmask 72704   ;;  %vm2677_vm4 = vcmask 97280  }
 0x66d   : > { %2566 = vmatmul.mubr.bf16.vlgmr.msra.gmra.mrb[12].mxu1 %v5232_v50  ;;  %2575 = vmatprep.subr.bf16.mxu0 %v2366_v26 }
 0x66e   : > { %2576 = vmatpush1.bf16.msra.mxu0 %v2365_v6  ;;  %2614 = vmatpush1.bf16.msra.mxu1 %v5173_v27 }
 0x66f   : > { %v2381_v44 = vpop.permute.xlu1 %2380  ;;  %v2379_v12 = vpop.permute.xlu0 %2378  ;;  %2615 = vmatprep.subr.bf16.mxu1 %v5645_v16  ;;  %2787 = vmatprep.mubr.msk.bf16.mxu1 %vm1887_vm5, %v5163_v20  ;;  %vm5740_vm5 = vmmov %vm5721_vm9 }
 0x670   : > { %v2384_v61 = vsel %vm5729_vm1, %v2377_v45, %v2379_v12  ;;  %v2385_v49 = vsel %vm5738_vm2, %v2379_v12, %v2381_v44  ;;  %vm5741_vm9 = vmmov %vm5740_vm5  ;;  %vm2679_vm1 = vcmask 121856   ;;  %vm2681_vm2 = vcmask 146432  }
 0x671   : > { %2577 = vmatprep.subr.bf16.mxu0 %v2385_v49 }
 0x672   : > { %2578 = vmatpush1.bf16.msra.mxu0 %v2384_v61  ;;  %2616 = vmatpush1.bf16.msra.mxu1 %v2362_v57 }
 0x673   : > { %v2400_v39 = vpop.permute.xlu1 %2399  ;;  %v2398_v60 = vpop.permute.xlu0 %2397  ;;  %2617 = vmatprep.subr.bf16.mxu1 %v5645_v16 }
 0x674   : > { %v2403_v55 = vsel %vm5739_vm8, %v5201_v40, %v2398_v60  ;;  %v2404_v14 = vsel %vm5732_vm7, %v2398_v60, %v2400_v39 }
 0x675   : > { %2579 = vmatprep.subr.bf16.mxu0 %v2404_v14 }
 0x676   : > { %2580 = vmatpush1.bf16.msra.mxu0 %v2403_v55  ;;  %2618 = vmatpush1.bf16.msra.mxu1 %v2381_v44 }
 0x677   : > { %v2419_v62 = vpop.permute.xlu1 %2418  ;;  %v2417_v11 = vpop.permute.xlu0 %2416  ;;  %2619 = vmatprep.subr.bf16.mxu1 %v5645_v16 }
 0x678   : > { %v2422_v7 = vsel %vm5740_vm5, %v2415_v56, %v2417_v11  ;;  %v2423_v59 = vsel %vm5741_vm9, %v2417_v11, %v2419_v62 }
 0x679   : > { %2581 = vmatprep.subr.bf16.mxu0 %v2423_v59 }
 0x67a   : > { %2582 = vmatpush1.bf16.msra.mxu0 %v2422_v7  ;;  %2620 = vmatpush1.bf16.msra.mxu1 %v2400_v39 }
 0x67b   : > { %v2438_v47 = vpop.permute.xlu1 %2437  ;;  %v2436_v38 = vpop.permute.xlu0 %2435  ;;  %2621 = vmatprep.subr.bf16.mxu1 %v5645_v16 }
 0x67c   : > { %v2441_v33 = vsel %vm5742_vm12, %v5208_v52, %v2436_v38  ;;  %v2442_v1 = vsel %vm5711_vm10, %v2436_v38, %v2438_v47 }
 0x67d   : > { %2583 = vmatprep.subr.bf16.mxu0 %v2442_v1 }
 0x67e   : > { %2584 = vmatpush1.bf16.msra.mxu0 %v2441_v33  ;;  %2622 = vmatpush1.bf16.msra.mxu1 %v2419_v62 }
 0x67f   : > { %v2457_v20 = vpop.permute.xlu1 %2456  ;;  %v2455_v27 = vpop.permute.xlu0 %2454  ;;  %2623 = vmatprep.subr.bf16.mxu1 %v5645_v16 }
 0x680   : > { %v2460_v48 = vsel %vm5743_vm15, %v5217_v31, %v2455_v27  ;;  %v2461_v41 = vsel %vm5744_vm13, %v2455_v27, %v2457_v20 }
 0x681   : > { %2585 = vmatprep.subr.bf16.mxu0 %v2461_v41 }
 0x682   : > { %2586 = vmatpush1.bf16.msra.mxu0 %v2460_v48  ;;  %2624 = vmatpush1.bf16.msra.mxu1 %v2438_v47 }
 0x683   : > { %v2476_v10 = vpop.permute.xlu1 %2475  ;;  %v2474_v24 = vpop.permute.xlu0 %2473  ;;  %2625 = vmatprep.subr.bf16.mxu1 %v5645_v16 }
 0x684   : > { %v2479_v43 = vsel %vm5745_vm11, %v5215_v4, %v2474_v24  ;;  %v2480_v8 = vsel %vm5746_vm14, %v2474_v24, %v2476_v10 }
 0x685   : > { %2587 = vmatprep.subr.bf16.mxu0 %v2480_v8 }
 0x686   : > { %2588 = vmatpush1.bf16.msra.mxu0 %v2479_v43  ;;  %2626 = vmatpush1.bf16.msra.mxu1 %v2457_v20 }
 0x687   : > { %v2495_v2 = vpop.permute.xlu1 %2494  ;;  %v2493_v35 = vpop.permute.xlu0 %2492  ;;  %2627 = vmatprep.subr.bf16.mxu1 %v5645_v16 }
 0x688   : > { %v2498_v17 = vsel %vm1461_vm0, %v5225_v36, %v2493_v35  ;;  %v2499_v15 = vsel %vm1461_vm0, %v2493_v35, %v2495_v2  ;;  %vm2671_vm0 = vcmask 23552  }
 0x689   : > { %2589 = vmatprep.subr.bf16.mxu0 %v2499_v15 }
 0x68a   : > { %2590 = vmatpush1.bf16.msra.mxu0 %v2498_v17  ;;  %2628 = vmatpush1.bf16.msra.mxu1 %v2476_v10 }
 0x68b   : > { %2629 = vmatprep.subr.bf16.mxu1 %v5645_v16 }
 0x68d   : > { %2606 = vmatmul.mubr.bf16.vlgmr.msra.gmra.mrb[24].mxu0 %v5232_v50 }
 0x68e   : > { %2630 = vmatpush1.bf16.msra.mxu1 %v2495_v2 }
 0x691   : > { %2646 = vmatmul.mubr.bf16.vlgmr.msra.gmra.mrb[16].mxu1 %v5232_v50 }
 0x740   : > { %v2567_v42 = vpop.f32.mrb[12].mxu1 }
 0x741   : > { %2654 = vrot.lane.b32.xlu0 %v2567_v42, %s3172_s30  ;;  %v2569_v37 = vpop.f32.mrb[13].mxu1  ;;  %s2788_s30 = sshll.u32 %s3236_s22, 4  ;;  %s2685_s22 = scalar_lea.sflag [#allocation5], %s228_s26 }
 0x742   : > { %v2570_v40 = vpop.f32.mrb[14].mxu1  ;;  %s5277_s15 = scalar_lea.hbm %s5324_s5, %s2788_s30 }
 0x743   : > { %v2571_v45 = vpop.f32.mrb[15].mxu1 }
 0x760   : > { %v2607_v25 = vpop.f32.mrb[24].mxu0 }
 0x761   : > { %2661 = vrot.lane.b32.xlu0 %v2607_v25, %s3181_s11  ;;  %2658 = vrot.lane.b32.xlu1 %v2607_v25, %s3182_s12  ;;  %v2609_v46 = vpop.f32.mrb[25].mxu0 }
 0x762   : > { %v2610_v0 = vpop.f32.mrb[26].mxu0 }
 0x763   : > { %v2611_v16 = vpop.f32.mrb[27].mxu0 }
 0x764   : > { %v2647_v54 = vpop.f32.mrb[16].mxu1 }
 0x765   : > { %v2649_v32 = vpop.f32.mrb[17].mxu1  ;;  %2668 = vrot.lane.b32.xlu0 %v2647_v54, %s3162_s23  ;;  %2665 = vrot.lane.b32.xlu1 %v2647_v54, %s3183_s16  ;;  %s2697_s23 = sshll.u32 %s229_s7, 4  ;;  %s5279_s23 = int_to_ptr.vmem [resolvable:$true] %s2697_s23 }
 0x766   : > { %v2650_v58 = vpop.f32.mrb[18].mxu1  ;;  %s3082_s17 = scalar_lea.vmem %s5279_s23, 16  ;;  %p3089_p2 = scmp.lt.s32.totalorder %s5279_s23, %s3087_s6 }
 0x767   : > { %v2651_v52 = vpop.f32.mrb[19].mxu1  ;;  %p3083_p6 = scmp.ne.s32.totalorder %s5279_s23, %s3082_s17  ;;  %p3090_p3 = scmp.lt.s32.totalorder %s3088_s10, %s3082_s17 }
 0x769   : > { %p3084_p10 = pnand %p3083_p6, %p5747_p9  ;;  %p3091_p4 = por %p3090_p3, %p3089_p2 }
 0x76b   : > { %p3085_p12 = pneg %p3084_p10 }
 0x76d   : > { %p3092_p7 = pnand %p3091_p4, %p3085_p12 }
 0x7b3   : > { %v2655_v56 = vpop.permute.xlu0 %2654 }
 0x7b4   : > { %v2672_v13 = vsel %vm2671_vm0, %v2567_v42, %v2655_v56 }
 0x7d3   : > { %v2659_v34 = vpop.permute.xlu1 %2658  ;;  %v2662_v9 = vpop.permute.xlu0 %2661 }
 0x7d4   : > { %v2674_v30 = vsel %vm2673_vm3, %v2672_v13, %v2659_v34 }
 0x7d5   : > { %v2676_v51 = vsel %vm2675_vm6, %v2674_v30, %v2662_v9 }
 0x7d7   : > { %v2666_v63 = vpop.permute.xlu1 %2665  ;;  %v2669_v4 = vpop.permute.xlu0 %2668 }
 0x7d8   : > { %v2678_v31 = vsel %vm2677_vm4, %v2676_v51, %v2666_v63 }
 0x7d9   : > { %v2680_v28 = vsel %vm2679_vm1, %v2678_v31, %v2669_v4 }
 0x7da   : > { %v2682_v21 = vsel %vm2681_vm2, %v2680_v28, 0.0 }
 0x7db   : > { %2683 = vst [vmem:[%s229_s7] sm:$0x1] %v2682_v21 }
 0x7dc   : > { %3095 = shalt.err (!%p3092_p7)
}
 0x7dd   : > { %s3096_s13 = scalar_lea.hbm %s5277_s15, 16  ;;  %s3100_s12 = scalar_lea.hbm %s5324_s5, 32 }
 0x7de   : > { %p3097_p8 = scmp.ne.s32.totalorder %s5277_s15, %s3096_s13  ;;  %p3101_p1 = scmp.lt.u32.totalorder %s5277_s15, %s5324_s5 }
 0x7df   : > { %p3102_p0 = scmp.lt.u32.totalorder %s3100_s12, %s3096_s13  ;;  %p3104_p6 = scmp.lt.u32.totalorder %s3096_s13, %s5277_s15 }
 0x7e0   : > { %p3098_p11 = pnand %p3097_p8, %p5747_p9 }
 0x7e1   : > { %p3103_p5 = por %p3102_p0, %p3101_p1 }
 0x7e2   : > { %p3099_p13 = pneg %p3098_p11 }
 0x7e3   : > { %p3105_p10 = por %p3104_p6, %p3103_p5 }
 0x7e5   : > { %p3106_p12 = pnand %p3105_p10, %p3099_p13 }
 0x7e7   : > { %3109 = shalt.err (!%p3106_p12)
}
 0x7e8   : > { %2796 = dma.vmem_to_hbm [thread:$0]  (%p5747_p9), %s5279_s23, 16, %s5277_s15, %s2685_s22  }
 0x7e9 PF: > { %p2808_p2 = scmp.ge.s32.totalorder %s3148_s21, 2  ;;  %s2709_s30 = sand.u32 1, %s3136_s18  }
 0x7ea   : > { %p5748_p3 = scmp.ne.s32.totalorder %s5402_s29, 0  ;;  %s2710_s7 = scalar_lea.sflag [#allocation5], %s2709_s30 }
 0x7ec   : > { %p2803_p4 = pnand %p2808_p2, %p5748_p3 }
 0x7ee   : > { %3131 = dma.done.wait (!%p2803_p4), %s2710_s7, 16  }
 0x7ef   : > { %3133 = vsyncadd (!%p2803_p4), %s2710_s7, 4294967280  ;;  %p16_p7 = scmp.ge.s32.totalorder %s3240_s24, 4   ;;  %s5749_s18 = smov %s3140_s19 }
 0x7f0   : > { %s5750_s19 = smov %s3144_s20  ;;  %s5751_s20 = smov %s3251_s27 }
 0x7f1   : > { %s5752_s21 = smov %s3240_s24  ;;  %18 = sbr.rel (!%p16_p7) target bundleno = 4 (0x4), region = 80 }
 0x7f8   :  { %2714 = vsyncpa [#allocation4], 1 }
 0x7f9   :  { %2716 = vsyncpa [#allocation4 + $0x1], 1 }
 0x7fa   :  { %2717 = vsyncpa [#allocation5], 1 }
 0x7fb   :  { %2719 = vsyncpa [#allocation5 + $0x1], 1 }

</bundles_post_ra>
